<compile_context>
chip_gen: v6e
topology: v6e:2x2x1
jax: 0.10.0
libtpu: 0.0.40
codegen_flags: <defaults>
</compile_context>

<pallas_src>
import jax
import jax.numpy as jnp
from jax.experimental import pallas as pl
from jax.experimental.pallas import tpu as pltpu

LATENT_DIMS = 32           # latent_dims
HIDDEN = 512               # linear1 out features
OUT = 2352                 # linear2 out features = 3 * 28 * 28
OUT_PAD = 2432             # 19 * 128: lane-dense padded output width


def _round_up(x, m):
    return ((x + m - 1) // m) * m


def _num_tensorcores():
    """Best-effort TensorCores-per-device count (v7x/v4 megacore = 2, else 1)."""
    try:
        info = pltpu.get_tpu_info()
        for attr in ("num_cores", "num_tensorcores", "tensorcore_count",
                     "cores_per_chip"):
            n = getattr(info, attr, None)
            if isinstance(n, int) and n > 0:
                return n
    except Exception:
        pass
    try:
        kind = jax.devices()[0].device_kind.lower()
        if "v7" in kind or "v4" in kind:
            return 2
    except Exception:
        pass
    return 1


_NUM_TC = _num_tensorcores()


def decoder_kernel(z_ref, w1_ref, b1_ref, w2_ref, b2_ref, o_ref):
    # linear1: bf16 MXU matmul with f32 accumulate; bias + ReLU in f32.
    h = jnp.dot(z_ref[...], w1_ref[...], preferred_element_type=jnp.float32)
    h = jnp.maximum(h + b1_ref[...], 0.0)                    # (TB, 512) f32
    # linear2: cast activations to bf16 for the MXU, accumulate in f32.
    y = jnp.dot(h.astype(jnp.bfloat16), w2_ref[...],
                preferred_element_type=jnp.float32)
    y = y + b2_ref[...]                                      # (TB, 2432) f32
    # sigmoid in f32 (safe on v5e, which has no bf16 VPU/EUP); store bf16.
    o_ref[...] = jax.nn.sigmoid(y).astype(o_ref.dtype)


def prepare_params(w1, b1, w2, b2):
    """One-time weight prep: lane-pad W2/b2 to OUT_PAD, cast weights to bf16.

    Call this once at init and reuse the result for every forward pass so the
    4.8 MB f32->bf16 cast/pad of W2 is not re-run on the hot path."""
    w1b = w1.astype(jnp.bfloat16)                                    # (L, 512)
    b1f = b1.reshape(1, -1).astype(jnp.float32)                      # (1, 512)
    w2b = (jnp.zeros((HIDDEN, OUT_PAD), jnp.bfloat16)
           .at[:, :OUT].set(w2.astype(jnp.bfloat16)))                # (512, 2432)
    b2p = (jnp.zeros((1, OUT_PAD), jnp.float32)
           .at[:, :OUT].set(b2.reshape(1, -1).astype(jnp.float32)))  # (1, 2432)
    return (w1b, b1f, w2b, b2p)


def continuous_decoder(z, params, flat_output=False):
    """z: (B, LATENT_DIMS) f32 (or bf16); params = prepare_params(...).

    flat_output=False (default): returns (B, 3, 28, 28) f32, matching the
    PyTorch module exactly.
    flat_output=True: returns the raw (B_pad, OUT_PAD) bf16 kernel output
    (cols >= 2352 and rows >= B are padding) -- avoids the post-kernel
    slice+reshape copy for consumers that can handle the padded flat layout."""
    w1b, b1f, w2b, b2p = params
    B, L = z.shape
    assert L == w1b.shape[0]
    hidden = w1b.shape[1]
    out_pad = w2b.shape[1]

    # --- batch tile: multiple of 8, capped at 512.  Only force >=2 grid steps
    # when the chip actually has multiple TensorCores (megacore sharding);
    # single-TC v5e/v6e just take the biggest tile (grid is a serial loop there).
    TB = _round_up(B, 8)
    if _NUM_TC >= 2 and B >= 16:
        TB = min(TB, _round_up(pl.cdiv(B, _NUM_TC), 8))
    TB = min(TB, 512)
    grid_b = pl.cdiv(B, TB)
    B_pad = grid_b * TB

    # --- only the (small) z needs per-call prep: bf16 cast + batch pad.
    z_b = z.astype(jnp.bfloat16)
    if B_pad != B:
        z_b = jnp.zeros((B_pad, L), jnp.bfloat16).at[:B].set(z_b)

    cost = pl.CostEstimate(
        flops=2 * B_pad * (L * hidden + hidden * out_pad),
        transcendentals=B_pad * out_pad,                      # sigmoid exp
        bytes_accessed=(z_b.size * 2 + w1b.size * 2 + b1f.size * 4
                        + w2b.size * 2 + b2p.size * 4
                        + B_pad * out_pad * 2),               # bf16 output
    )

    flat = pl.pallas_call(
        decoder_kernel,
        out_shape=jax.ShapeDtypeStruct((B_pad, out_pad), jnp.bfloat16),
        grid=(grid_b,),
        in_specs=[
            pl.BlockSpec((TB, L), lambda i: (i, 0)),            # z batch tile
            pl.BlockSpec((L, hidden), lambda i: (0, 0)),        # W1, VMEM-resident
            pl.BlockSpec((1, hidden), lambda i: (0, 0)),        # b1
            pl.BlockSpec((hidden, out_pad), lambda i: (0, 0)),  # W2, VMEM-resident
            pl.BlockSpec((1, out_pad), lambda i: (0, 0)),       # b2
        ],
        out_specs=pl.BlockSpec((TB, out_pad), lambda i: (i, 0)),
        compiler_params=pltpu.CompilerParams(
            dimension_semantics=("parallel",),
            vmem_limit_bytes=48 * 1024 * 1024),
        cost_estimate=cost,
    )(z_b, w1b, b1f, w2b, b2p)

    if flat_output:
        return flat
    # Module-exact output: slice off batch/lane padding, upcast, reshape NCHW.
    return flat[:B, :OUT].astype(jnp.float32).reshape((-1, 3, 28, 28))


def init_params(key, latent_dims=LATENT_DIMS):
    """Deterministic init matching nn.Linear's U(-1/sqrt(fan_in), 1/sqrt(fan_in)).
    Weights stored as (in_features, out_features) so the kernel does x @ W."""
    k1, k2, k3, k4 = jax.random.split(key, 4)
    bound1 = 1.0 / jnp.sqrt(latent_dims)
    w1 = jax.random.uniform(k1, (latent_dims, HIDDEN), jnp.float32, -bound1, bound1)
    b1 = jax.random.uniform(k2, (1, HIDDEN), jnp.float32, -bound1, bound1)
    bound2 = 1.0 / jnp.sqrt(HIDDEN)
    w2 = jax.random.uniform(k3, (HIDDEN, OUT), jnp.float32, -bound2, bound2)
    b2 = jax.random.uniform(k4, (1, OUT), jnp.float32, -bound2, bound2)
    return w1, b1, w2, b2


if __name__ == "__main__":
    key = jax.random.PRNGKey(0)
    kz, kp = jax.random.split(key)
    B = 20  # exercises batch padding (TB=24 on 1-TC chips, 2x16 tiles on v7x)
    z = jax.random.normal(kz, (B, LATENT_DIMS), jnp.float32)
    w1, b1, w2, b2 = init_params(kp)

    # One-time weight prep (hoisted out of the hot path).
    params = prepare_params(w1, b1, w2, b2)

    decode = jax.jit(continuous_decoder)
    out = decode(z, params)
    jax.block_until_ready(out)

    # Full-precision reference (same math as the PyTorch module); tolerance is
    # loosened because the kernel uses bf16 weights/activations and bf16 output.
    ref = jax.nn.sigmoid(
        jnp.maximum(z @ w1 + b1, 0.0) @ w2 + b2
    ).reshape((-1, 3, 28, 28))
    assert out.shape == (B, 3, 28, 28)
    assert out.dtype == jnp.float32
    assert jnp.allclose(out, ref, atol=2e-2, rtol=2e-2), (
        float(jnp.max(jnp.abs(out - ref))))
    print("KERNEL_OK")
</pallas_src>

<mosaic_0001>
module attributes {stable_mosaic.version = 11 : i64} {
  func.func @decoder_kernel(%arg0: i32, %arg1: memref<24x32xbf16, #tpu.memory_space<vmem>>, %arg2: memref<32x512xbf16, #tpu.memory_space<vmem>>, %arg3: memref<1x512xf32, #tpu.memory_space<vmem>>, %arg4: memref<512x2432xbf16, #tpu.memory_space<vmem>>, %arg5: memref<1x2432xf32, #tpu.memory_space<vmem>>, %arg6: memref<24x2432xbf16, #tpu.memory_space<vmem>>) attributes {dimension_semantics = [#tpu.dimension_semantics<parallel>], iteration_bounds = array<i64: 1>, scalar_prefetch = 0 : i64, scratch_operands = 0 : i64, tpu.core_type = #tpu.core_type<tc>, window_params = [{transform_indices = @transform_0, window_bounds = array<i64: 24, 32>}, {pipeline_mode = #tpu.pipeline_mode<synchronous>, transform_indices = @transform_1, window_bounds = array<i64: 32, 512>}, {pipeline_mode = #tpu.pipeline_mode<synchronous>, transform_indices = @transform_2, window_bounds = array<i64: 1, 512>}, {pipeline_mode = #tpu.pipeline_mode<synchronous>, transform_indices = @transform_3, window_bounds = array<i64: 512, 2432>}, {pipeline_mode = #tpu.pipeline_mode<synchronous>, transform_indices = @transform_4, window_bounds = array<i64: 1, 2432>}, {transform_indices = @transform_5, window_bounds = array<i64: 24, 2432>}]} {
    %c0 = arith.constant 0 : index
    %c0_0 = arith.constant 0 : index
    %0 = vector.load %arg1[%c0, %c0_0] : memref<24x32xbf16, #tpu.memory_space<vmem>>, vector<24x32xbf16>
    %c0_1 = arith.constant 0 : index
    %c0_2 = arith.constant 0 : index
    %1 = vector.load %arg2[%c0_1, %c0_2] : memref<32x512xbf16, #tpu.memory_space<vmem>>, vector<32x512xbf16>
    %cst = arith.constant dense<0.000000e+00> : vector<24x512xf32>
    %2 = tpu.matmul %0, %1, %cst {dimension_numbers = #tpu.dot_dimension_numbers<[1], [0], [0], [1], [0, 0, 1, 1], [], []>} : vector<24x32xbf16>, vector<32x512xbf16>, vector<24x512xf32> -> vector<24x512xf32>
    %c0_3 = arith.constant 0 : index
    %c0_4 = arith.constant 0 : index
    %3 = vector.load %arg3[%c0_3, %c0_4] : memref<1x512xf32, #tpu.memory_space<vmem>>, vector<1x512xf32>
    %4 = vector.broadcast %3 : vector<1x512xf32> to vector<24x512xf32>
    %5 = arith.addf %2, %4 : vector<24x512xf32>
    %cst_5 = arith.constant 0.000000e+00 : f32
    %6 = vector.broadcast %cst_5 : f32 to vector<24x512xf32>
    %7 = arith.maximumf %5, %6 : vector<24x512xf32>
    %8 = arith.truncf %7 : vector<24x512xf32> to vector<24x512xbf16>
    %c0_6 = arith.constant 0 : index
    %c0_7 = arith.constant 0 : index
    %9 = vector.load %arg4[%c0_6, %c0_7] : memref<512x2432xbf16, #tpu.memory_space<vmem>>, vector<512x2432xbf16>
    %cst_8 = arith.constant dense<0.000000e+00> : vector<24x2432xf32>
    %10 = tpu.matmul %8, %9, %cst_8 {dimension_numbers = #tpu.dot_dimension_numbers<[1], [0], [0], [1], [0, 0, 1, 1], [], []>} : vector<24x512xbf16>, vector<512x2432xbf16>, vector<24x2432xf32> -> vector<24x2432xf32>
    %c0_9 = arith.constant 0 : index
    %c0_10 = arith.constant 0 : index
    %11 = vector.load %arg5[%c0_9, %c0_10] : memref<1x2432xf32, #tpu.memory_space<vmem>>, vector<1x2432xf32>
    %12 = vector.broadcast %11 : vector<1x2432xf32> to vector<24x2432xf32>
    %13 = arith.addf %10, %12 : vector<24x2432xf32>
    %14 = arith.negf %13 : vector<24x2432xf32>
    %15 = math.exp %14 : vector<24x2432xf32>
    %cst_11 = arith.constant 1.000000e+00 : f32
    %16 = vector.broadcast %cst_11 : f32 to vector<24x2432xf32>
    %17 = arith.addf %16, %15 : vector<24x2432xf32>
    %18 = arith.divf %16, %17 : vector<24x2432xf32>
    %19 = arith.truncf %18 : vector<24x2432xf32> to vector<24x2432xbf16>
    %c0_12 = arith.constant 0 : index
    %c0_13 = arith.constant 0 : index
    %20 = vector.load %arg6[%c0_12, %c0_13] : memref<24x2432xbf16, #tpu.memory_space<vmem>>, vector<24x2432xbf16>
    tpu.vector_store %arg6[%c0_12, %c0_13], %19 {strides = array<i32>} : memref<24x2432xbf16, #tpu.memory_space<vmem>>, vector<24x2432xbf16>,
    return
  }
  func.func @transform_0(%arg0: i32) -> (i32, i32) {
    %c0_i32 = arith.constant 0 : i32
    %c0_i32_0 = arith.constant 0 : i32
    return %arg0, %c0_i32 : i32, i32
  }
  func.func @transform_1(%arg0: i32) -> (i32, i32) {
    %c0_i32 = arith.constant 0 : i32
    %c0_i32_0 = arith.constant 0 : i32
    %c0_i32_1 = arith.constant 0 : i32
    return %c0_i32, %c0_i32_0 : i32, i32
  }
  func.func @transform_2(%arg0: i32) -> (i32, i32) {
    %c0_i32 = arith.constant 0 : i32
    %c0_i32_0 = arith.constant 0 : i32
    %c0_i32_1 = arith.constant 0 : i32
    return %c0_i32, %c0_i32_0 : i32, i32
  }
  func.func @transform_3(%arg0: i32) -> (i32, i32) {
    %c0_i32 = arith.constant 0 : i32
    %c0_i32_0 = arith.constant 0 : i32
    %c0_i32_1 = arith.constant 0 : i32
    return %c0_i32, %c0_i32_0 : i32, i32
  }
  func.func @transform_4(%arg0: i32) -> (i32, i32) {
    %c0_i32 = arith.constant 0 : i32
    %c0_i32_0 = arith.constant 0 : i32
    %c0_i32_1 = arith.constant 0 : i32
    return %c0_i32, %c0_i32_0 : i32, i32
  }
  func.func @transform_5(%arg0: i32) -> (i32, i32) {
    %c0_i32 = arith.constant 0 : i32
    %c0_i32_0 = arith.constant 0 : i32
    return %arg0, %c0_i32 : i32, i32
  }
}

</mosaic_0001>

<bundles_post_ra>
// kernel: continuous_decoder.1
= control target key start
LH: loop header
LB: loop body
LE: loop exit
PB: predicated region body
PF: predicated region fallthrough
CT: control target
= control target key end

     0   :  { %10 = vsyncpa [#allocation3], 0  ;;  %s8029_s0 = inlined_call_operand.vmem [shape: bf16[24,32], index: 0, kind: input, shape index: {}]   ;;  %s8030_s1 = inlined_call_operand.hbm [shape: bf16[32,512], index: 1, kind: input, shape index: {}]   ;;  %s8031_s2 = inlined_call_operand.hbm [shape: f32[1,512], index: 2, kind: input, shape index: {}]   ;;  %s8032_s3 = inlined_call_operand.hbm [shape: bf16[512,2432], index: 3, kind: input, shape index: {}]   ;;  %s8033_s4 = inlined_call_operand.hbm [shape: f32[1,2432], index: 4, kind: input, shape index: {}]   ;;  %s8034_s5 = inlined_call_operand.vmem [shape: bf16[24,2432], index: 5, kind: output, shape index: {}]  }
   0x1   :  { %11 = vsyncpa [#allocation5], 0 }
   0x2   :  { %12 = vsyncpa [#allocation8], 0  ;;  %s7710_s18 = smov [#allocation4]   ;;  %s7711_s20 = smov [#allocation2]  }
   0x3   :  { %s33_s19 = sshll.u32 %s7710_s18, 4  ;;  %s20_s21 = sshll.u32 %s7711_s20, 4  ;;  %s34_s19 = int_to_ptr.vmem [resolvable:$true] %s33_s19  ;;  %s21_s21 = int_to_ptr.vmem [resolvable:$true] %s20_s21 }
   0x4   :  { %s7632_s22 = scalar_lea.vmem %s34_s19, 64  ;;  %p7637_p1 = scmp.lt.s32.totalorder %s34_s19, %s34_s19 }
   0x5   :  { %p7633_p0 = scmp.ne.s32.totalorder %s34_s19, %s7632_s22  ;;  %p7638_p2 = scmp.lt.s32.totalorder %s7632_s22, %s7632_s22 }
   0x7   :  { %p7639_p3 = por %p7638_p2, %p7637_p1 }
   0x9   :  { %p7640_p4 = pnand %p7639_p3, %p7633_p0 }
   0xb   :  { %7643 = shalt.err (!%p7640_p4)
}
   0xc   :  { %36 = dma.hbm_to_vmem [thread:$0]  %s8031_s2, 64, %s34_s19, [#allocation5]  }
   0xd   :  { %s7652_s25 = scalar_lea.vmem %s21_s21, 1024  ;;  %p7657_p6 = scmp.lt.s32.totalorder %s21_s21, %s21_s21 }
   0xe   :  { %p7653_p5 = scmp.ne.s32.totalorder %s21_s21, %s7652_s25  ;;  %p7658_p7 = scmp.lt.s32.totalorder %s7652_s25, %s7652_s25 }
  0x10   :  { %p7659_p8 = por %p7658_p7, %p7657_p6 }
  0x12   :  { %p7660_p9 = pnand %p7659_p8, %p7653_p5 }
  0x14   :  { %7663 = shalt.err (!%p7660_p9)
}
  0x15   :  { %s7712_s26 = smov 256   ;;  %s7713_s27 = smov 16  }
  0x16   :  { %26 = dma.hbm_to_vmem [thread:$0]  %s8030_s1, 1024, %s21_s21, [#allocation3], %s7712_s26, %s7712_s26, %s7713_s27  }
  0x17   :  { %s7714_s30 = smov [#allocation6]  }
  0x18   :  { %s42_s6 = sshll.u32 %s7714_s30, 4  ;;  %s43_s6 = int_to_ptr.vmem [resolvable:$true] %s42_s6 }
  0x19   :  { %s7672_s7 = scalar_lea.vmem %s43_s6, 77824  ;;  %p7677_p11 = scmp.lt.s32.totalorder %s43_s6, %s43_s6 }
  0x1a   :  { %p7673_p10 = scmp.ne.s32.totalorder %s43_s6, %s7672_s7  ;;  %p7678_p12 = scmp.lt.s32.totalorder %s7672_s7, %s7672_s7 }
  0x1c   :  { %p7679_p13 = por %p7678_p12, %p7677_p11 }
  0x1e   :  { %p7680_p0 = pnand %p7679_p13, %p7673_p10 }
  0x20   :  { %7683 = shalt.err (!%p7680_p0)
}
  0x21   :  { %s7715_s2 = smov 1216   ;;  %s7716_s8 = smov 76  }
  0x22   :  { %48 = dma.hbm_to_vmem [thread:$0]  %s8032_s3, 77824, %s43_s6, [#allocation5], %s7715_s2, %s7715_s2, %s7716_s8  }
  0x23   :  { %s7717_s11 = smov [#allocation7]  }
  0x24   :  { %s55_s12 = sshll.u32 %s7717_s11, 4  ;;  %s56_s12 = int_to_ptr.vmem [resolvable:$true] %s55_s12 }
  0x25   :  { %s7692_s1 = scalar_lea.vmem %s56_s12, 304  ;;  %s7696_s13 = scalar_lea.vmem %s56_s12, 320 }
  0x26   :  { %p7693_p1 = scmp.ne.s32.totalorder %s56_s12, %s7692_s1  ;;  %p7697_p2 = scmp.lt.s32.totalorder %s56_s12, %s56_s12 }
  0x27   :  { %p7698_p3 = scmp.lt.s32.totalorder %s7696_s13, %s7692_s1 }
  0x29   :  { %p7699_p4 = por %p7698_p3, %p7697_p2 }
  0x2b   :  { %p7700_p5 = pnand %p7699_p4, %p7693_p1 }
  0x2d   :  { %7703 = shalt.err (!%p7700_p5)
}
  0x2e   :  { %58 = dma.hbm_to_vmem [thread:$0]  %s8033_s4, 304, %s56_s12, [#allocation8]  }
  0x2f   :  { %7704 = dma.done.wait [#allocation3], 1024  }
  0x30   :  { %7705 = vsyncadd [#allocation3], 4294966272 }
  0x31   :  { %7706 = dma.done.wait [#allocation5], 77888  }
  0x32   :  { %7707 = vsyncadd [#allocation5], 4294889408 }
  0x33   :  { %7708 = dma.done.wait [#allocation8], 304  }
  0x34   :  { %7709 = vsyncadd [#allocation8], 4294966992  ;;  %v7718_v0 = vmov 0   ;;  %v6485_v1 = vld [vmem:[#allocation2 + $0x24] ss:$16 sps:$4 sm:$0xff]   ;;  %vm153_vm0 = vcmask 261120  }
  0x35   :  { %192 = vmatprep.mubr.bf16.mxu0 %v7718_v0  ;;  %243 = vmatprep.mubr.bf16.mxu1 %v7718_v0  ;;  %v6487_v2 = vld [vmem:[#allocation2 + $0x2c] ss:$16 sps:$4 sm:$0xff]   ;;  %v6489_v3 = vld [vmem:[#allocation2 + $0x20] ss:$16 sps:$4 sm:$0xff]   ;;  %v6490_v4 = vld [vmem:[#allocation2 + $0x28] ss:$16 sps:$4 sm:$0xff]  }
  0x36   :  { %172 = vmatprep.subr.bf16.mxu0 %v6485_v1  ;;  %223 = vmatprep.subr.bf16.mxu1 %v6487_v2  ;;  %v6491_v5 = vld [vmem:[#allocation2 + $0x4] ss:$16 sps:$4 sm:$0xff]   ;;  %v6493_v6 = vld [vmem:[#allocation2 + $0xc] ss:$16 sps:$4 sm:$0xff]   ;;  %v6495_v7 = vld [vmem:[#allocation2] ss:$16 sps:$4 sm:$0xff]  }
  0x37   :  { %173 = vmatpush1.bf16.msra.mxu0 %v6489_v3  ;;  %224 = vmatpush1.bf16.msra.mxu1 %v6490_v4  ;;  %v6496_v8 = vld [vmem:[#allocation2 + $0x8] ss:$16 sps:$4 sm:$0xff]   ;;  %v6497_v9 = vld [vmem:[%s8029_s0] sm:$0xff]   ;;  %v6501_v10 = vld [vmem:[#allocation6 + $0x42c] ss:$76 sps:$4 sm:$0xff]  }
  0x38   :  { %174 = vmatprep.subr.bf16.mxu0 %v6491_v5  ;;  %225 = vmatprep.subr.bf16.mxu1 %v6493_v6  ;;  %v6499_v11 = vld [vmem:[#allocation6 + $0x428] ss:$76 sps:$4 sm:$0xff]   ;;  %v6504_v12 = vld [vmem:[#allocation6 + $0xdac] ss:$76 sps:$4 sm:$0xff]   ;;  %v6505_v16 = vld [vmem:[#allocation6 + $0x390] ss:$76 sps:$4 sm:$0xff]  }
  0x39   :  { %v6502_v13 = vld [vmem:[#allocation6 + $0xda8] ss:$76 sps:$4 sm:$0xff]   ;;  %v6508_v17 = vld [vmem:[#allocation6 + $0xd10] ss:$76 sps:$4 sm:$0xff]   ;;  %v6498_v19 = vld [vmem:[%s8029_s0 + $0x8] ss:$0 sps:$4 sm:$0xff]  }
  0x3a   :  { %v6507_v14 = vld [vmem:[#allocation6 + $0x394] ss:$76 sps:$4 sm:$0xff]   ;;  %v6513_v18 = vld [vmem:[#allocation6 + $0x2fc] ss:$76 sps:$4 sm:$0xff]   ;;  %v6511_v21 = vld [vmem:[#allocation6 + $0x2f8] ss:$76 sps:$4 sm:$0xff]  }
  0x3b   :  { %175 = vmatpush1.bf16.msra.mxu0 %v6495_v7  ;;  %226 = vmatpush1.bf16.msra.mxu1 %v6496_v8  ;;  %v6510_v15 = vld [vmem:[#allocation6 + $0xd14] ss:$76 sps:$4 sm:$0xff]   ;;  %v6516_v20 = vld [vmem:[#allocation6 + $0xc7c] ss:$76 sps:$4 sm:$0xff]   ;;  %v6514_v22 = vld [vmem:[#allocation6 + $0xc78] ss:$76 sps:$4 sm:$0xff]  }
  0x3c   :  { %4095 = vmatprep.subr.bf16.mxu0 %v6501_v10  ;;  %4146 = vmatprep.subr.bf16.mxu1 %v6504_v12  ;;  %v6519_v23 = vld [vmem:[#allocation6 + $0x264] ss:$76 sps:$4 sm:$0xff]   ;;  %v6517_v25 = vld [vmem:[#allocation6 + $0x260] ss:$76 sps:$4 sm:$0xff]   ;;  %v6523_v29 = vld [vmem:[#allocation6 + $0x1c8] ss:$76 sps:$4 sm:$0xff]  }
  0x3d   :  { %v6522_v24 = vld [vmem:[#allocation6 + $0xbe4] ss:$76 sps:$4 sm:$0xff]   ;;  %v6520_v26 = vld [vmem:[#allocation6 + $0xbe0] ss:$76 sps:$4 sm:$0xff]   ;;  %v6526_v30 = vld [vmem:[#allocation6 + $0xb48] ss:$76 sps:$4 sm:$0xff]  }
  0x3e   :  { %5691 = vmatmul.mubr.msk.bf16.vlgmr.msra.gmra.mxu0 %vm153_vm0, %v6497_v9  ;;  %5693 = vmatmul.mubr.msk.bf16.vlgmr.msra.gmra.mxu1 %vm153_vm0, %v6497_v9  ;;  %v6525_v27 = vld [vmem:[#allocation6 + $0x1cc] ss:$76 sps:$4 sm:$0xff]   ;;  %v6531_v31 = vld [vmem:[#allocation6 + $0x134] ss:$76 sps:$4 sm:$0xff]   ;;  %v6529_v33 = vld [vmem:[#allocation6 + $0x130] ss:$76 sps:$4 sm:$0xff]  }
  0x3f   :  { %202 = vmatprep.mubr.bf16.mxu0 %v7718_v0  ;;  %253 = vmatprep.mubr.bf16.mxu1 %v7718_v0  ;;  %v6528_v28 = vld [vmem:[#allocation6 + $0xb4c] ss:$76 sps:$4 sm:$0xff]   ;;  %v6534_v32 = vld [vmem:[#allocation6 + $0xab4] ss:$76 sps:$4 sm:$0xff]   ;;  %v6532_v34 = vld [vmem:[#allocation6 + $0xab0] ss:$76 sps:$4 sm:$0xff]  }
  0x40   :  { %4096 = vmatpush1.bf16.msra.mxu0 %v6499_v11  ;;  %4147 = vmatpush1.bf16.msra.mxu1 %v6502_v13  ;;  %v6537_v35 = vld [vmem:[#allocation6 + $0x9c] ss:$76 sps:$4 sm:$0xff]   ;;  %v6535_v37 = vld [vmem:[#allocation6 + $0x98] ss:$76 sps:$4 sm:$0xff]   ;;  %v6541_v41 = vld [vmem:[#allocation6] ss:$76 sps:$4 sm:$0xff]   ;;  %v85_v13 = vlaneseq }
  0x41   :  { %4097 = vmatprep.subr.bf16.mxu0 %v6507_v14  ;;  %4148 = vmatprep.subr.bf16.mxu1 %v6510_v15  ;;  %v6540_v36 = vld [vmem:[#allocation6 + $0xa1c] ss:$76 sps:$4 sm:$0xff]   ;;  %v6538_v38 = vld [vmem:[#allocation6 + $0xa18] ss:$76 sps:$4 sm:$0xff]   ;;  %v6544_v42 = vld [vmem:[#allocation6 + $0x980] ss:$76 sps:$4 sm:$0xff]  }
  0x42   :  { %v6543_v39 = vld [vmem:[#allocation6 + $0x4] ss:$76 sps:$4 sm:$0xff]   ;;  %v6549_v43 = vld [vmem:[#allocation6 + $0x8ec] ss:$76 sps:$4 sm:$0xff]   ;;  %v6547_v45 = vld [vmem:[#allocation6 + $0x8e8] ss:$76 sps:$4 sm:$0xff]  }
  0x43   :  { %v6546_v40 = vld [vmem:[#allocation6 + $0x984] ss:$76 sps:$4 sm:$0xff]   ;;  %v6552_v44 = vld [vmem:[#allocation6 + $0x126c] ss:$76 sps:$4 sm:$0xff]   ;;  %v6550_v46 = vld [vmem:[#allocation6 + $0x1268] ss:$76 sps:$4 sm:$0xff]  }
  0x44   :  { %4098 = vmatpush1.bf16.msra.mxu0 %v6505_v16  ;;  %4149 = vmatpush1.bf16.msra.mxu1 %v6508_v17  ;;  %v6555_v47 = vld [vmem:[#allocation6 + $0x854] ss:$76 sps:$4 sm:$0xff]   ;;  %v6553_v49 = vld [vmem:[#allocation6 + $0x850] ss:$76 sps:$4 sm:$0xff]   ;;  %v6559_v53 = vld [vmem:[#allocation6 + $0x7b8] ss:$76 sps:$4 sm:$0xff]  }
  0x45   :  { %4099 = vmatprep.subr.bf16.mxu0 %v6513_v18  ;;  %4150 = vmatprep.subr.bf16.mxu1 %v6516_v20  ;;  %v6558_v48 = vld [vmem:[#allocation6 + $0x11d4] ss:$76 sps:$4 sm:$0xff]   ;;  %v6556_v50 = vld [vmem:[#allocation6 + $0x11d0] ss:$76 sps:$4 sm:$0xff]   ;;  %v6562_v54 = vld [vmem:[#allocation6 + $0x1138] ss:$76 sps:$4 sm:$0xff]  }
  0x46   :  { %5692 = vmatmul.mubr.msk.bf16.gmra.mxu0 %vm153_vm0, %v6498_v19  ;;  %5694 = vmatmul.mubr.msk.bf16.gmra.mxu1 %vm153_vm0, %v6498_v19  ;;  %v6561_v51 = vld [vmem:[#allocation6 + $0x7bc] ss:$76 sps:$4 sm:$0xff]   ;;  %v6567_v55 = vld [vmem:[#allocation6 + $0x724] ss:$76 sps:$4 sm:$0xff]   ;;  %v6565_v57 = vld [vmem:[#allocation6 + $0x720] ss:$76 sps:$4 sm:$0xff]  }
  0x47   :  { %v6564_v52 = vld [vmem:[#allocation6 + $0x113c] ss:$76 sps:$4 sm:$0xff]   ;;  %v6570_v56 = vld [vmem:[#allocation6 + $0x10a4] ss:$76 sps:$4 sm:$0xff]   ;;  %v6568_v58 = vld [vmem:[#allocation6 + $0x10a0] ss:$76 sps:$4 sm:$0xff]  }
  0x48   :  { %4100 = vmatpush1.bf16.msra.mxu0 %v6511_v21  ;;  %4151 = vmatpush1.bf16.msra.mxu1 %v6514_v22  ;;  %v6573_v59 = vld [vmem:[#allocation6 + $0x68c] ss:$76 sps:$4 sm:$0xff]   ;;  %v6571_v61 = vld [vmem:[#allocation6 + $0x688] ss:$76 sps:$4 sm:$0xff]   ;;  %v6577_v1 = vld [vmem:[#allocation6 + $0x5f0] ss:$76 sps:$4 sm:$0xff]  }
  0x49   :  { %4101 = vmatprep.subr.bf16.mxu0 %v6519_v23  ;;  %4152 = vmatprep.subr.bf16.mxu1 %v6522_v24  ;;  %v6576_v60 = vld [vmem:[#allocation6 + $0x100c] ss:$76 sps:$4 sm:$0xff]   ;;  %v6574_v62 = vld [vmem:[#allocation6 + $0x1008] ss:$76 sps:$4 sm:$0xff]   ;;  %v6580_v2 = vld [vmem:[#allocation6 + $0xf70] ss:$76 sps:$4 sm:$0xff]  }
  0x4a   :  { %v6579_v63 = vld [vmem:[#allocation6 + $0x5f4] ss:$76 sps:$4 sm:$0xff]   ;;  %v6585_v3 = vld [vmem:[#allocation6 + $0x55c] ss:$76 sps:$4 sm:$0xff]   ;;  %v6583_v5 = vld [vmem:[#allocation6 + $0x558] ss:$76 sps:$4 sm:$0xff]  }
  0x4b   :  { %v6582_v0 = vld [vmem:[#allocation6 + $0xf74] ss:$76 sps:$4 sm:$0xff]   ;;  %v6588_v4 = vld [vmem:[#allocation6 + $0xedc] ss:$76 sps:$4 sm:$0xff]   ;;  %v6586_v6 = vld [vmem:[#allocation6 + $0xed8] ss:$76 sps:$4 sm:$0xff]  }
  0x4c   :  { %4102 = vmatpush1.bf16.msra.mxu0 %v6517_v25  ;;  %4153 = vmatpush1.bf16.msra.mxu1 %v6520_v26  ;;  %v6591_v7 = vld [vmem:[#allocation6 + $0x4c4] ss:$76 sps:$4 sm:$0xff]   ;;  %v6589_v9 = vld [vmem:[#allocation6 + $0x4c0] ss:$76 sps:$4 sm:$0xff]   ;;  %v7771_v14 = vshrl.u32 %v85_v13, 7 }
  0x4d   :  { %4103 = vmatprep.subr.bf16.mxu0 %v6525_v27  ;;  %4154 = vmatprep.subr.bf16.mxu1 %v6528_v28  ;;  %v6594_v8 = vld [vmem:[#allocation6 + $0xe44] ss:$76 sps:$4 sm:$0xff]   ;;  %v6592_v10 = vld [vmem:[#allocation6 + $0xe40] ss:$76 sps:$4 sm:$0xff]   ;;  %v83_v15 = vld [vmem:[#allocation4] sm:$0xf] }
  0x4e   :  { %v6597_v11 = vld [vmem:[#allocation6 + $0x434] ss:$76 sps:$4 sm:$0xff]   ;;  %v7774_v16 = vsub.s32 1, %v7771_v14  ;;  %v7777_v17 = vsub.s32 3, %v7771_v14  ;;  %v7780_v18 = vsub.s32 0, %v7771_v14  ;;  %v7783_v19 = vsub.s32 2, %v7771_v14 }
  0x4f   :  { %v6600_v12 = vld [vmem:[#allocation6 + $0xdb4] ss:$76 sps:$4 sm:$0xff]  }
  0x50   :  { %4104 = vmatpush1.bf16.msra.mxu0 %v6523_v29  ;;  %4155 = vmatpush1.bf16.msra.mxu1 %v6526_v30  ;;  %v92_v22 = vrot.slane %v83_v15, %v7774_v16  ;;  %v100_v23 = vrot.slane %v83_v15, %v7777_v17  ;;  %v88_v24 = vrot.slane %v83_v15, %v7780_v18 }
  0x51   :  { %4105 = vmatprep.subr.bf16.mxu0 %v6531_v31  ;;  %4156 = vmatprep.subr.bf16.mxu1 %v6534_v32  ;;  %v96_v25 = vrot.slane %v83_v15, %v7783_v19 }
  0x54   :  { %4106 = vmatpush1.bf16.msra.mxu0 %v6529_v33  ;;  %4157 = vmatpush1.bf16.msra.mxu1 %v6532_v34 }
  0x55   :  { %4107 = vmatprep.subr.bf16.mxu0 %v6537_v35  ;;  %4158 = vmatprep.subr.bf16.mxu1 %v6540_v36 }
  0x58   :  { %4108 = vmatpush1.bf16.msra.mxu0 %v6535_v37  ;;  %4159 = vmatpush1.bf16.msra.mxu1 %v6538_v38 }
  0x59   :  { %4109 = vmatprep.subr.bf16.mxu0 %v6543_v39  ;;  %4160 = vmatprep.subr.bf16.mxu1 %v6546_v40 }
  0x5c   :  { %4110 = vmatpush1.bf16.msra.mxu0 %v6541_v41  ;;  %4161 = vmatpush1.bf16.msra.mxu1 %v6544_v42 }
  0x5d   :  { %4111 = vmatprep.subr.bf16.mxu0 %v6549_v43  ;;  %4162 = vmatprep.subr.bf16.mxu1 %v6552_v44 }
  0x60   :  { %4112 = vmatpush2.bf16.msra.mxu0 %v6547_v45  ;;  %4163 = vmatpush2.bf16.msra.mxu1 %v6550_v46 }
  0x61   :  { %4113 = vmatprep.subr.bf16.mxu0 %v6555_v47  ;;  %4164 = vmatprep.subr.bf16.mxu1 %v6558_v48  ;;  %v6595_v48 = vld [vmem:[#allocation6 + $0x430] ss:$76 sps:$4 sm:$0xff]  }
  0x64   :  { %4114 = vmatpush2.bf16.msra.mxu0 %v6553_v49  ;;  %4165 = vmatpush2.bf16.msra.mxu1 %v6556_v50  ;;  %v6598_v49 = vld [vmem:[#allocation6 + $0xdb0] ss:$76 sps:$4 sm:$0xff]  }
  0x65   :  { %4115 = vmatprep.subr.bf16.mxu0 %v6561_v51  ;;  %4166 = vmatprep.subr.bf16.mxu1 %v6564_v52 }
  0x68   :  { %4116 = vmatpush2.bf16.msra.mxu0 %v6559_v53  ;;  %4167 = vmatpush2.bf16.msra.mxu1 %v6562_v54 }
  0x69   :  { %4117 = vmatprep.subr.bf16.mxu0 %v6567_v55  ;;  %4168 = vmatprep.subr.bf16.mxu1 %v6570_v56  ;;  %v6603_v56 = vld [vmem:[#allocation6 + $0x39c] ss:$76 sps:$4 sm:$0xff]  }
  0x6c   :  { %4118 = vmatpush2.bf16.msra.mxu0 %v6565_v57  ;;  %4169 = vmatpush2.bf16.msra.mxu1 %v6568_v58  ;;  %v6606_v57 = vld [vmem:[#allocation6 + $0xd1c] ss:$76 sps:$4 sm:$0xff]  }
  0x6d   :  { %4119 = vmatprep.subr.bf16.mxu0 %v6573_v59  ;;  %4170 = vmatprep.subr.bf16.mxu1 %v6576_v60 }
  0x70   :  { %4120 = vmatpush2.bf16.msra.mxu0 %v6571_v61  ;;  %4171 = vmatpush2.bf16.msra.mxu1 %v6574_v62 }
  0x71   :  { %4121 = vmatprep.subr.bf16.mxu0 %v6579_v63  ;;  %4172 = vmatprep.subr.bf16.mxu1 %v6582_v0 }
  0x74   :  { %4122 = vmatpush2.bf16.msra.mxu0 %v6577_v1  ;;  %4173 = vmatpush2.bf16.msra.mxu1 %v6580_v2 }
  0x75   :  { %4123 = vmatprep.subr.bf16.mxu0 %v6585_v3  ;;  %4174 = vmatprep.subr.bf16.mxu1 %v6588_v4  ;;  %v6601_v4 = vld [vmem:[#allocation6 + $0x398] ss:$76 sps:$4 sm:$0xff]  }
  0x78   :  { %4124 = vmatpush2.bf16.msra.mxu0 %v6583_v5  ;;  %4175 = vmatpush2.bf16.msra.mxu1 %v6586_v6  ;;  %v6604_v5 = vld [vmem:[#allocation6 + $0xd18] ss:$76 sps:$4 sm:$0xff]  }
  0x79   :  { %4125 = vmatprep.subr.bf16.mxu0 %v6591_v7  ;;  %4176 = vmatprep.subr.bf16.mxu1 %v6594_v8  ;;  %v6609_v8 = vld [vmem:[#allocation6 + $0x304] ss:$76 sps:$4 sm:$0xff]  }
  0x7c   :  { %4126 = vmatpush2.bf16.msra.mxu0 %v6589_v9  ;;  %4177 = vmatpush2.bf16.msra.mxu1 %v6592_v10  ;;  %v6612_v9 = vld [vmem:[#allocation6 + $0xc84] ss:$76 sps:$4 sm:$0xff]  }
  0x7d   :  { %4197 = vmatprep.subr.bf16.mxu0 %v6597_v11  ;;  %4248 = vmatprep.subr.bf16.mxu1 %v6600_v12 }
  0xfe   :  { %v194_v20 = vpop.f32.mrf.mxu0  ;;  %v245_v21 = vpop.f32.mrf.mxu1 }
  0xff   :  { %v195_v34 = vadd.f32 %v194_v20, %v88_v24  ;;  %v246_v35 = vadd.f32 %v245_v21, %v96_v25  ;;  %v6607_v21 = vld [vmem:[#allocation6 + $0x300] ss:$76 sps:$4 sm:$0xff]  }
 0x100   :  { %v196_v26 = vpop.f32.mrf.mxu0  ;;  %v247_v27 = vpop.f32.mrf.mxu1 }
 0x101   :  { %v197_v30 = vadd.f32 %v196_v26, %v92_v22  ;;  %v248_v31 = vadd.f32 %v247_v27, %v100_v23  ;;  %v262_v50 = vmax.f32 %v195_v34, 0.0  ;;  %v264_v51 = vmax.f32 %v246_v35, 0.0  ;;  %v6616_v26 = vld [vmem:[#allocation6 + $0xbe8] ss:$76 sps:$4 sm:$0xff]   ;;  %v6628_v34 = vld [vmem:[#allocation6 + $0xab8] ss:$76 sps:$4 sm:$0xff]  }
 0x102   :  { %v198_v28 = vpop.f32.mrf.mxu0  ;;  %v249_v29 = vpop.f32.mrf.mxu1  ;;  %v6621_v27 = vld [vmem:[#allocation6 + $0x1d4] ss:$76 sps:$4 sm:$0xff]   ;;  %v6633_v35 = vld [vmem:[#allocation6 + $0xa4] ss:$76 sps:$4 sm:$0xff]  }
 0x103   :  { %v199_v32 = vadd.f32 %v198_v28, %v88_v24  ;;  %v250_v33 = vadd.f32 %v249_v29, %v96_v25  ;;  %v263_v44 = vmax.f32 %v197_v30, 0.0  ;;  %v265_v45 = vmax.f32 %v248_v31, 0.0  ;;  %v6624_v28 = vld [vmem:[#allocation6 + $0xb54] ss:$76 sps:$4 sm:$0xff]   ;;  %v6619_v29 = vld [vmem:[#allocation6 + $0x1d0] ss:$76 sps:$4 sm:$0xff]  }
 0x104   :  { %v200_v36 = vpop.f32.mrf.mxu0  ;;  %v251_v37 = vpop.f32.mrf.mxu1  ;;  %v6622_v30 = vld [vmem:[#allocation6 + $0xb50] ss:$76 sps:$4 sm:$0xff]  }
 0x105   :  { %v201_v38 = vadd.f32 %v200_v36, %v92_v22  ;;  %v252_v39 = vadd.f32 %v251_v37, %v100_v23  ;;  %v266_v40 = vmax.f32 %v199_v32, 0.0  ;;  %v268_v41 = vmax.f32 %v250_v33, 0.0  ;;  %v6627_v31 = vld [vmem:[#allocation6 + $0x13c] ss:$76 sps:$4 sm:$0xff]   ;;  %v6625_v33 = vld [vmem:[#allocation6 + $0x138] ss:$76 sps:$4 sm:$0xff]  }
 0x106   :  { %v204_v42 = vpop.f32.mrf.mxu0  ;;  %v255_v43 = vpop.f32.mrf.mxu1  ;;  %v6630_v32 = vld [vmem:[#allocation6 + $0xabc] ss:$76 sps:$4 sm:$0xff]   ;;  %v6636_v36 = vld [vmem:[#allocation6 + $0xa24] ss:$76 sps:$4 sm:$0xff]   ;;  %v6631_v37 = vld [vmem:[#allocation6 + $0xa0] ss:$76 sps:$4 sm:$0xff]  }
 0x107   :  { %v267_v46 = vmax.f32 %v201_v38, 0.0  ;;  %v269_v47 = vmax.f32 %v252_v39, 0.0  ;;  %v205_v52 = vadd.f32 %v204_v42, %v88_v24  ;;  %v256_v53 = vadd.f32 %v255_v43, %v96_v25  ;;  %v6618_v24 = vld [vmem:[#allocation6 + $0xbec] ss:$76 sps:$4 sm:$0xff]   ;;  %v6613_v25 = vld [vmem:[#allocation6 + $0x268] ss:$76 sps:$4 sm:$0xff]  }
 0x108   :  { %v206_v54 = vpop.f32.mrf.mxu0  ;;  %v257_v55 = vpop.f32.mrf.mxu1  ;;  %v7793_v62 = vpack.c.bf16 %v266_v40, %v262_v50  ;;  %v7795_v63 = vpack.c.bf16 %v268_v41, %v264_v51  ;;  %v6634_v38 = vld [vmem:[#allocation6 + $0xa20] ss:$76 sps:$4 sm:$0xff]   ;;  %v6637_v41 = vld [vmem:[#allocation6 + $0x8] ss:$76 sps:$4 sm:$0xff]   ;;  %v6652_v50 = vld [vmem:[#allocation6 + $0x11d8] ss:$76 sps:$4 sm:$0xff]  }
 0x109   :  { %v7789_v58 = vpack.c.bf16 %v267_v46, %v263_v44  ;;  %v7791_v59 = vpack.c.bf16 %v269_v47, %v265_v45  ;;  %v207_v60 = vadd.f32 %v206_v54, %v92_v22  ;;  %v258_v61 = vadd.f32 %v257_v55, %v100_v23  ;;  %v6610_v22 = vld [vmem:[#allocation6 + $0xc80] ss:$76 sps:$4 sm:$0xff]   ;;  %v6640_v42 = vld [vmem:[#allocation6 + $0x988] ss:$76 sps:$4 sm:$0xff]   ;;  %v6643_v45 = vld [vmem:[#allocation6 + $0x8f0] ss:$76 sps:$4 sm:$0xff]  }
 0x10a   :  { %v208_v0 = vpop.f32.mrf.mxu0  ;;  %v259_v1 = vpop.f32.mrf.mxu1  ;;  %v270_v6 = vmax.f32 %v205_v52, 0.0  ;;  %v272_v7 = vmax.f32 %v256_v53, 0.0  ;;  %v6615_v23 = vld [vmem:[#allocation6 + $0x26c] ss:$76 sps:$4 sm:$0xff]   ;;  %v6645_v43 = vld [vmem:[#allocation6 + $0x8f4] ss:$76 sps:$4 sm:$0xff]  }
 0x10b   :  { %4127 = vmatprep.mubr.bf16.mxu0 %v7789_v58  ;;  %4178 = vmatprep.mubr.bf16.mxu1 %v7791_v59  ;;  %v271_v2 = vmax.f32 %v207_v60, 0.0  ;;  %v273_v3 = vmax.f32 %v258_v61, 0.0  ;;  %v6639_v39 = vld [vmem:[#allocation6 + $0xc] ss:$76 sps:$4 sm:$0xff]   ;;  %v6648_v44 = vld [vmem:[#allocation6 + $0x1274] ss:$76 sps:$4 sm:$0xff]  }
 0x10c   :  { %4128 = vmatmul.mubr.bf16.vlgmr.msra.gmra.mxu0 %v7793_v62  ;;  %4179 = vmatmul.mubr.bf16.vlgmr.msra.gmra.mxu1 %v7795_v63  ;;  %v209_v10 = vpop.f32.mrf.mxu0  ;;  %v260_v11 = vpop.f32.mrf.mxu1  ;;  %v7807_v15 = vpack.c.bf16 %v270_v6, %v270_v6  ;;  %v7809_v20 = vpack.c.bf16 %v272_v7, %v272_v7  ;;  %v6642_v40 = vld [vmem:[#allocation6 + $0x98c] ss:$76 sps:$4 sm:$0xff]   ;;  %v6646_v46 = vld [vmem:[#allocation6 + $0x1270] ss:$76 sps:$4 sm:$0xff]   ;;  %v6664_v60 = vld [vmem:[#allocation6 + $0x10a8] ss:$76 sps:$4 sm:$0xff]  }
 0x10d   :  { %v7801_v12 = vpack.c.bf16 %v271_v2, %v271_v2  ;;  %v7803_v13 = vpack.c.bf16 %v273_v3, %v273_v3  ;;  %4198 = vmatpush1.bf16.msra.mxu0 %v6595_v48  ;;  %4249 = vmatpush1.bf16.msra.mxu1 %v6598_v49  ;;  %v6651_v47 = vld [vmem:[#allocation6 + $0x85c] ss:$76 sps:$4 sm:$0xff]   ;;  %v6649_v49 = vld [vmem:[#allocation6 + $0x858] ss:$76 sps:$4 sm:$0xff]   ;;  %v6655_v53 = vld [vmem:[#allocation6 + $0x7c0] ss:$76 sps:$4 sm:$0xff]  }
 0x10e   :  { %4199 = vmatprep.subr.bf16.mxu0 %v6603_v56  ;;  %4250 = vmatprep.subr.bf16.mxu1 %v6606_v57  ;;  %v6654_v48 = vld [vmem:[#allocation6 + $0x11dc] ss:$76 sps:$4 sm:$0xff]   ;;  %v6657_v51 = vld [vmem:[#allocation6 + $0x7c4] ss:$76 sps:$4 sm:$0xff]   ;;  %v6658_v54 = vld [vmem:[#allocation6 + $0x1140] ss:$76 sps:$4 sm:$0xff]  }
 0x10f   :  { %4137 = vmatprep.mubr.bf16.mxu0 %v7801_v12  ;;  %4188 = vmatprep.mubr.bf16.mxu1 %v7803_v13  ;;  %v6660_v52 = vld [vmem:[#allocation6 + $0x1144] ss:$76 sps:$4 sm:$0xff]   ;;  %v6663_v55 = vld [vmem:[#allocation6 + $0x72c] ss:$76 sps:$4 sm:$0xff]   ;;  %v6661_v57 = vld [vmem:[#allocation6 + $0x728] ss:$76 sps:$4 sm:$0xff]  }
 0x110   :  { %v6666_v56 = vld [vmem:[#allocation6 + $0x10ac] ss:$76 sps:$4 sm:$0xff]   ;;  %v6669_v61 = vld [vmem:[#allocation6 + $0x694] ss:$76 sps:$4 sm:$0xff]   ;;  %v6667_v1 = vld [vmem:[#allocation6 + $0x690] ss:$76 sps:$4 sm:$0xff]  }
 0x111   :  { %4200 = vmatpush1.bf16.msra.mxu0 %v6601_v4  ;;  %4251 = vmatpush1.bf16.msra.mxu1 %v6604_v5  ;;  %v6672_v0 = vld [vmem:[#allocation6 + $0x1014] ss:$76 sps:$4 sm:$0xff]   ;;  %v6670_v2 = vld [vmem:[#allocation6 + $0x1010] ss:$76 sps:$4 sm:$0xff]   ;;  %v6673_v5 = vld [vmem:[#allocation6 + $0x5f8] ss:$76 sps:$4 sm:$0xff]  }
 0x112   :  { %4201 = vmatprep.subr.bf16.mxu0 %v6609_v8  ;;  %4252 = vmatprep.subr.bf16.mxu1 %v6612_v9  ;;  %v6675_v3 = vld [vmem:[#allocation6 + $0x5fc] ss:$76 sps:$4 sm:$0xff]   ;;  %v6676_v6 = vld [vmem:[#allocation6 + $0xf78] ss:$76 sps:$4 sm:$0xff]   ;;  %v6679_v9 = vld [vmem:[#allocation6 + $0x560] ss:$76 sps:$4 sm:$0xff]  }
 0x113   :  { %v6678_v4 = vld [vmem:[#allocation6 + $0xf7c] ss:$76 sps:$4 sm:$0xff]   ;;  %v6681_v7 = vld [vmem:[#allocation6 + $0x564] ss:$76 sps:$4 sm:$0xff]   ;;  %v6682_v10 = vld [vmem:[#allocation6 + $0xee0] ss:$76 sps:$4 sm:$0xff]  }
 0x114   :  { %4138 = vmatmul.mubr.bf16.gmra.mxu0 %v7807_v15  ;;  %4189 = vmatmul.mubr.bf16.gmra.mxu1 %v7809_v20  ;;  %v6684_v8 = vld [vmem:[#allocation6 + $0xee4] ss:$76 sps:$4 sm:$0xff]   ;;  %v6687_v11 = vld [vmem:[#allocation6 + $0x4cc] ss:$76 sps:$4 sm:$0xff]  }
 0x115   :  { %4202 = vmatpush1.bf16.msra.mxu0 %v6607_v21  ;;  %4253 = vmatpush1.bf16.msra.mxu1 %v6610_v22  ;;  %v6690_v21 = vld [vmem:[#allocation6 + $0xe4c] ss:$76 sps:$4 sm:$0xff]   ;;  %v6685_v22 = vld [vmem:[#allocation6 + $0x4c8] ss:$76 sps:$4 sm:$0xff]  }
 0x116   :  { %4229 = vmatprep.mubr.bf16.mxu0 %v7789_v58  ;;  %4280 = vmatprep.mubr.bf16.mxu1 %v7791_v59 }
 0x117   :  { %4203 = vmatprep.subr.bf16.mxu0 %v6615_v23  ;;  %4254 = vmatprep.subr.bf16.mxu1 %v6618_v24  ;;  %v6688_v23 = vld [vmem:[#allocation6 + $0xe48] ss:$76 sps:$4 sm:$0xff]  }
 0x118   :  { %v6693_v24 = vld [vmem:[#allocation6 + $0x43c] ss:$76 sps:$4 sm:$0xff]  }
 0x119   :  { %4204 = vmatpush1.bf16.msra.mxu0 %v6613_v25  ;;  %4255 = vmatpush1.bf16.msra.mxu1 %v6616_v26  ;;  %v6696_v25 = vld [vmem:[#allocation6 + $0xdbc] ss:$76 sps:$4 sm:$0xff]   ;;  %v6691_v26 = vld [vmem:[#allocation6 + $0x438] ss:$76 sps:$4 sm:$0xff]  }
 0x11a   :  { %4205 = vmatprep.subr.bf16.mxu0 %v6621_v27  ;;  %4256 = vmatprep.subr.bf16.mxu1 %v6624_v28  ;;  %v6694_v27 = vld [vmem:[#allocation6 + $0xdb8] ss:$76 sps:$4 sm:$0xff]  }
 0x11b   :  { %v6699_v28 = vld [vmem:[#allocation6 + $0x3a4] ss:$76 sps:$4 sm:$0xff]  }
 0x11d   :  { %4206 = vmatpush1.bf16.msra.mxu0 %v6619_v29  ;;  %4257 = vmatpush1.bf16.msra.mxu1 %v6622_v30  ;;  %v6702_v29 = vld [vmem:[#allocation6 + $0xd24] ss:$76 sps:$4 sm:$0xff]   ;;  %v6697_v30 = vld [vmem:[#allocation6 + $0x3a0] ss:$76 sps:$4 sm:$0xff]  }
 0x11e   :  { %4207 = vmatprep.subr.bf16.mxu0 %v6627_v31  ;;  %4258 = vmatprep.subr.bf16.mxu1 %v6630_v32  ;;  %v6700_v31 = vld [vmem:[#allocation6 + $0xd20] ss:$76 sps:$4 sm:$0xff]  }
 0x11f   :  { %v6705_v32 = vld [vmem:[#allocation6 + $0x30c] ss:$76 sps:$4 sm:$0xff]  }
 0x121   :  { %4208 = vmatpush1.bf16.msra.mxu0 %v6625_v33  ;;  %4259 = vmatpush1.bf16.msra.mxu1 %v6628_v34  ;;  %v6708_v33 = vld [vmem:[#allocation6 + $0xc8c] ss:$76 sps:$4 sm:$0xff]   ;;  %v6703_v34 = vld [vmem:[#allocation6 + $0x308] ss:$76 sps:$4 sm:$0xff]  }
 0x122   :  { %4209 = vmatprep.subr.bf16.mxu0 %v6633_v35  ;;  %4260 = vmatprep.subr.bf16.mxu1 %v6636_v36  ;;  %v6706_v35 = vld [vmem:[#allocation6 + $0xc88] ss:$76 sps:$4 sm:$0xff]  }
 0x123   :  { %v6711_v36 = vld [vmem:[#allocation6 + $0x274] ss:$76 sps:$4 sm:$0xff]  }
 0x125   :  { %4210 = vmatpush1.bf16.msra.mxu0 %v6631_v37  ;;  %4261 = vmatpush1.bf16.msra.mxu1 %v6634_v38  ;;  %v6714_v37 = vld [vmem:[#allocation6 + $0xbf4] ss:$76 sps:$4 sm:$0xff]   ;;  %v6709_v38 = vld [vmem:[#allocation6 + $0x270] ss:$76 sps:$4 sm:$0xff]  }
 0x126   :  { %4211 = vmatprep.subr.bf16.mxu0 %v6639_v39  ;;  %4262 = vmatprep.subr.bf16.mxu1 %v6642_v40  ;;  %v6712_v39 = vld [vmem:[#allocation6 + $0xbf0] ss:$76 sps:$4 sm:$0xff]  }
 0x127   :  { %v6717_v40 = vld [vmem:[#allocation6 + $0x1dc] ss:$76 sps:$4 sm:$0xff]  }
 0x129   :  { %4212 = vmatpush1.bf16.msra.mxu0 %v6637_v41  ;;  %4263 = vmatpush1.bf16.msra.mxu1 %v6640_v42  ;;  %v6720_v41 = vld [vmem:[#allocation6 + $0xb5c] ss:$76 sps:$4 sm:$0xff]   ;;  %v6715_v42 = vld [vmem:[#allocation6 + $0x1d8] ss:$76 sps:$4 sm:$0xff]  }
 0x12a   :  { %4213 = vmatprep.subr.bf16.mxu0 %v6645_v43  ;;  %4264 = vmatprep.subr.bf16.mxu1 %v6648_v44  ;;  %v6718_v43 = vld [vmem:[#allocation6 + $0xb58] ss:$76 sps:$4 sm:$0xff]  }
 0x12b   :  { %v6723_v44 = vld [vmem:[#allocation6 + $0x144] ss:$76 sps:$4 sm:$0xff]  }
 0x12d   :  { %4214 = vmatpush2.bf16.msra.mxu0 %v6643_v45  ;;  %4265 = vmatpush2.bf16.msra.mxu1 %v6646_v46  ;;  %v6726_v45 = vld [vmem:[#allocation6 + $0xac4] ss:$76 sps:$4 sm:$0xff]   ;;  %v6721_v46 = vld [vmem:[#allocation6 + $0x140] ss:$76 sps:$4 sm:$0xff]  }
 0x12e   :  { %4215 = vmatprep.subr.bf16.mxu0 %v6651_v47  ;;  %4266 = vmatprep.subr.bf16.mxu1 %v6654_v48  ;;  %v6724_v47 = vld [vmem:[#allocation6 + $0xac0] ss:$76 sps:$4 sm:$0xff]  }
 0x12f   :  { %v6729_v48 = vld [vmem:[#allocation6 + $0xac] ss:$76 sps:$4 sm:$0xff]  }
 0x131   :  { %4216 = vmatpush2.bf16.msra.mxu0 %v6649_v49  ;;  %4267 = vmatpush2.bf16.msra.mxu1 %v6652_v50  ;;  %v6732_v49 = vld [vmem:[#allocation6 + $0xa2c] ss:$76 sps:$4 sm:$0xff]   ;;  %v6727_v50 = vld [vmem:[#allocation6 + $0xa8] ss:$76 sps:$4 sm:$0xff]  }
 0x132   :  { %4217 = vmatprep.subr.bf16.mxu0 %v6657_v51  ;;  %4268 = vmatprep.subr.bf16.mxu1 %v6660_v52  ;;  %v6730_v51 = vld [vmem:[#allocation6 + $0xa28] ss:$76 sps:$4 sm:$0xff]  }
 0x133   :  { %v6735_v52 = vld [vmem:[#allocation6 + $0x14] ss:$76 sps:$4 sm:$0xff]  }
 0x135   :  { %4218 = vmatpush2.bf16.msra.mxu0 %v6655_v53  ;;  %4269 = vmatpush2.bf16.msra.mxu1 %v6658_v54  ;;  %v6738_v53 = vld [vmem:[#allocation6 + $0x994] ss:$76 sps:$4 sm:$0xff]   ;;  %v6733_v54 = vld [vmem:[#allocation6 + $0x10] ss:$76 sps:$4 sm:$0xff]  }
 0x136   :  { %4219 = vmatprep.subr.bf16.mxu0 %v6663_v55  ;;  %4270 = vmatprep.subr.bf16.mxu1 %v6666_v56  ;;  %v6736_v55 = vld [vmem:[#allocation6 + $0x990] ss:$76 sps:$4 sm:$0xff]  }
 0x137   :  { %v6741_v56 = vld [vmem:[#allocation6 + $0x8fc] ss:$76 sps:$4 sm:$0xff]  }
 0x139   :  { %4220 = vmatpush2.bf16.msra.mxu0 %v6661_v57  ;;  %4271 = vmatpush2.bf16.msra.mxu1 %v6664_v60  ;;  %v6744_v57 = vld [vmem:[#allocation6 + $0x127c] ss:$76 sps:$4 sm:$0xff]   ;;  %v6739_v60 = vld [vmem:[#allocation6 + $0x8f8] ss:$76 sps:$4 sm:$0xff]  }
 0x13a   :  { %4221 = vmatprep.subr.bf16.mxu0 %v6669_v61  ;;  %4272 = vmatprep.subr.bf16.mxu1 %v6672_v0  ;;  %v6742_v61 = vld [vmem:[#allocation6 + $0x1278] ss:$76 sps:$4 sm:$0xff]  }
 0x13b   :  { %v6747_v0 = vld [vmem:[#allocation6 + $0x864] ss:$76 sps:$4 sm:$0xff]  }
 0x13d   :  { %4222 = vmatpush2.bf16.msra.mxu0 %v6667_v1  ;;  %4273 = vmatpush2.bf16.msra.mxu1 %v6670_v2  ;;  %v6750_v1 = vld [vmem:[#allocation6 + $0x11e4] ss:$76 sps:$4 sm:$0xff]   ;;  %v6745_v2 = vld [vmem:[#allocation6 + $0x860] ss:$76 sps:$4 sm:$0xff]  }
 0x13e   :  { %4223 = vmatprep.subr.bf16.mxu0 %v6675_v3  ;;  %4274 = vmatprep.subr.bf16.mxu1 %v6678_v4  ;;  %v6748_v3 = vld [vmem:[#allocation6 + $0x11e0] ss:$76 sps:$4 sm:$0xff]  }
 0x13f   :  { %v6753_v4 = vld [vmem:[#allocation6 + $0x7cc] ss:$76 sps:$4 sm:$0xff]  }
 0x141   :  { %4224 = vmatpush2.bf16.msra.mxu0 %v6673_v5  ;;  %4275 = vmatpush2.bf16.msra.mxu1 %v6676_v6  ;;  %v6756_v5 = vld [vmem:[#allocation6 + $0x114c] ss:$76 sps:$4 sm:$0xff]   ;;  %v6751_v6 = vld [vmem:[#allocation6 + $0x7c8] ss:$76 sps:$4 sm:$0xff]  }
 0x142   :  { %4225 = vmatprep.subr.bf16.mxu0 %v6681_v7  ;;  %4276 = vmatprep.subr.bf16.mxu1 %v6684_v8  ;;  %v6754_v7 = vld [vmem:[#allocation6 + $0x1148] ss:$76 sps:$4 sm:$0xff]  }
 0x143   :  { %v6759_v8 = vld [vmem:[#allocation6 + $0x734] ss:$76 sps:$4 sm:$0xff]  }
 0x145   :  { %4226 = vmatpush2.bf16.msra.mxu0 %v6679_v9  ;;  %4277 = vmatpush2.bf16.msra.mxu1 %v6682_v10  ;;  %v6762_v9 = vld [vmem:[#allocation6 + $0x10b4] ss:$76 sps:$4 sm:$0xff]   ;;  %v6757_v10 = vld [vmem:[#allocation6 + $0x730] ss:$76 sps:$4 sm:$0xff]  }
 0x146   :  { %4227 = vmatprep.subr.bf16.mxu0 %v6687_v11  ;;  %4278 = vmatprep.subr.bf16.mxu1 %v6690_v21  ;;  %v6760_v11 = vld [vmem:[#allocation6 + $0x10b0] ss:$76 sps:$4 sm:$0xff]  }
 0x147   :  { %v6765_v21 = vld [vmem:[#allocation6 + $0x69c] ss:$76 sps:$4 sm:$0xff]  }
 0x149   :  { %4228 = vmatpush2.bf16.msra.mxu0 %v6685_v22  ;;  %4279 = vmatpush2.bf16.msra.mxu1 %v6688_v23  ;;  %v6768_v22 = vld [vmem:[#allocation6 + $0x101c] ss:$76 sps:$4 sm:$0xff]   ;;  %v6763_v23 = vld [vmem:[#allocation6 + $0x698] ss:$76 sps:$4 sm:$0xff]  }
 0x14a   :  { %4299 = vmatprep.subr.bf16.mxu0 %v6693_v24  ;;  %4350 = vmatprep.subr.bf16.mxu1 %v6696_v25  ;;  %v6766_v24 = vld [vmem:[#allocation6 + $0x1018] ss:$76 sps:$4 sm:$0xff]  }
 0x14b   :  { %v6771_v25 = vld [vmem:[#allocation6 + $0x604] ss:$76 sps:$4 sm:$0xff]  }
 0x14c   :  { %4230 = vmatmul.mubr.bf16.vlgmr.msra.gmra.mxu0 %v7793_v62  ;;  %4281 = vmatmul.mubr.bf16.vlgmr.msra.gmra.mxu1 %v7795_v63 }
 0x14d   :  { %4239 = vmatprep.mubr.bf16.mxu0 %v7801_v12  ;;  %4290 = vmatprep.mubr.bf16.mxu1 %v7803_v13 }
 0x14e   :  { %4300 = vmatpush1.bf16.msra.mxu0 %v6691_v26  ;;  %4351 = vmatpush1.bf16.msra.mxu1 %v6694_v27  ;;  %v6774_v26 = vld [vmem:[#allocation6 + $0xf84] ss:$76 sps:$4 sm:$0xff]   ;;  %v6769_v27 = vld [vmem:[#allocation6 + $0x600] ss:$76 sps:$4 sm:$0xff]  }
 0x14f   :  { %4301 = vmatprep.subr.bf16.mxu0 %v6699_v28  ;;  %4352 = vmatprep.subr.bf16.mxu1 %v6702_v29  ;;  %v6772_v28 = vld [vmem:[#allocation6 + $0xf80] ss:$76 sps:$4 sm:$0xff]  }
 0x150   :  { %v6777_v29 = vld [vmem:[#allocation6 + $0x56c] ss:$76 sps:$4 sm:$0xff]  }
 0x152   :  { %4302 = vmatpush1.bf16.msra.mxu0 %v6697_v30  ;;  %4353 = vmatpush1.bf16.msra.mxu1 %v6700_v31  ;;  %v6780_v30 = vld [vmem:[#allocation6 + $0xeec] ss:$76 sps:$4 sm:$0xff]   ;;  %v6775_v31 = vld [vmem:[#allocation6 + $0x568] ss:$76 sps:$4 sm:$0xff]  }
 0x153   :  { %4303 = vmatprep.subr.bf16.mxu0 %v6705_v32  ;;  %4354 = vmatprep.subr.bf16.mxu1 %v6708_v33  ;;  %v6778_v32 = vld [vmem:[#allocation6 + $0xee8] ss:$76 sps:$4 sm:$0xff]  }
 0x154   :  { %4240 = vmatmul.mubr.bf16.gmra.mxu0 %v7807_v15  ;;  %4291 = vmatmul.mubr.bf16.gmra.mxu1 %v7809_v20  ;;  %v6783_v33 = vld [vmem:[#allocation6 + $0x4d4] ss:$76 sps:$4 sm:$0xff]  }
 0x155   :  { %4331 = vmatprep.mubr.bf16.mxu0 %v7789_v58  ;;  %4382 = vmatprep.mubr.bf16.mxu1 %v7791_v59 }
 0x156   :  { %4304 = vmatpush1.bf16.msra.mxu0 %v6703_v34  ;;  %4355 = vmatpush1.bf16.msra.mxu1 %v6706_v35  ;;  %v6786_v34 = vld [vmem:[#allocation6 + $0xe54] ss:$76 sps:$4 sm:$0xff]   ;;  %v6781_v35 = vld [vmem:[#allocation6 + $0x4d0] ss:$76 sps:$4 sm:$0xff]  }
 0x157   :  { %4305 = vmatprep.subr.bf16.mxu0 %v6711_v36  ;;  %4356 = vmatprep.subr.bf16.mxu1 %v6714_v37  ;;  %v6784_v36 = vld [vmem:[#allocation6 + $0xe50] ss:$76 sps:$4 sm:$0xff]  }
 0x158   :  { %v6789_v37 = vld [vmem:[#allocation6 + $0x444] ss:$76 sps:$4 sm:$0xff]  }
 0x15a   :  { %4306 = vmatpush1.bf16.msra.mxu0 %v6709_v38  ;;  %4357 = vmatpush1.bf16.msra.mxu1 %v6712_v39  ;;  %v6792_v38 = vld [vmem:[#allocation6 + $0xdc4] ss:$76 sps:$4 sm:$0xff]   ;;  %v6787_v39 = vld [vmem:[#allocation6 + $0x440] ss:$76 sps:$4 sm:$0xff]  }
 0x15b   :  { %4307 = vmatprep.subr.bf16.mxu0 %v6717_v40  ;;  %4358 = vmatprep.subr.bf16.mxu1 %v6720_v41  ;;  %v6790_v40 = vld [vmem:[#allocation6 + $0xdc0] ss:$76 sps:$4 sm:$0xff]  }
 0x15c   :  { %v6795_v41 = vld [vmem:[#allocation6 + $0x3ac] ss:$76 sps:$4 sm:$0xff]  }
 0x15e   :  { %4308 = vmatpush1.bf16.msra.mxu0 %v6715_v42  ;;  %4359 = vmatpush1.bf16.msra.mxu1 %v6718_v43  ;;  %v6798_v42 = vld [vmem:[#allocation6 + $0xd2c] ss:$76 sps:$4 sm:$0xff]   ;;  %v6793_v43 = vld [vmem:[#allocation6 + $0x3a8] ss:$76 sps:$4 sm:$0xff]  }
 0x15f   :  { %4309 = vmatprep.subr.bf16.mxu0 %v6723_v44  ;;  %4360 = vmatprep.subr.bf16.mxu1 %v6726_v45  ;;  %v6796_v44 = vld [vmem:[#allocation6 + $0xd28] ss:$76 sps:$4 sm:$0xff]  }
 0x160   :  { %v6801_v45 = vld [vmem:[#allocation6 + $0x314] ss:$76 sps:$4 sm:$0xff]  }
 0x162   :  { %4310 = vmatpush1.bf16.msra.mxu0 %v6721_v46  ;;  %4361 = vmatpush1.bf16.msra.mxu1 %v6724_v47  ;;  %v6804_v46 = vld [vmem:[#allocation6 + $0xc94] ss:$76 sps:$4 sm:$0xff]   ;;  %v6799_v47 = vld [vmem:[#allocation6 + $0x310] ss:$76 sps:$4 sm:$0xff]  }
 0x163   :  { %4311 = vmatprep.subr.bf16.mxu0 %v6729_v48  ;;  %4362 = vmatprep.subr.bf16.mxu1 %v6732_v49  ;;  %v6802_v48 = vld [vmem:[#allocation6 + $0xc90] ss:$76 sps:$4 sm:$0xff]  }
 0x164   :  { %v6807_v49 = vld [vmem:[#allocation6 + $0x27c] ss:$76 sps:$4 sm:$0xff]  }
 0x166   :  { %4312 = vmatpush1.bf16.msra.mxu0 %v6727_v50  ;;  %4363 = vmatpush1.bf16.msra.mxu1 %v6730_v51  ;;  %v6810_v50 = vld [vmem:[#allocation6 + $0xbfc] ss:$76 sps:$4 sm:$0xff]   ;;  %v6805_v51 = vld [vmem:[#allocation6 + $0x278] ss:$76 sps:$4 sm:$0xff]  }
 0x167   :  { %4313 = vmatprep.subr.bf16.mxu0 %v6735_v52  ;;  %4364 = vmatprep.subr.bf16.mxu1 %v6738_v53  ;;  %v6808_v52 = vld [vmem:[#allocation6 + $0xbf8] ss:$76 sps:$4 sm:$0xff]  }
 0x168   :  { %v6813_v53 = vld [vmem:[#allocation6 + $0x1e4] ss:$76 sps:$4 sm:$0xff]  }
 0x16a   :  { %4314 = vmatpush1.bf16.msra.mxu0 %v6733_v54  ;;  %4365 = vmatpush1.bf16.msra.mxu1 %v6736_v55  ;;  %v6816_v54 = vld [vmem:[#allocation6 + $0xb64] ss:$76 sps:$4 sm:$0xff]   ;;  %v6811_v55 = vld [vmem:[#allocation6 + $0x1e0] ss:$76 sps:$4 sm:$0xff]  }
 0x16b   :  { %4315 = vmatprep.subr.bf16.mxu0 %v6741_v56  ;;  %4366 = vmatprep.subr.bf16.mxu1 %v6744_v57  ;;  %v6814_v56 = vld [vmem:[#allocation6 + $0xb60] ss:$76 sps:$4 sm:$0xff]  }
 0x16c   :  { %v6819_v57 = vld [vmem:[#allocation6 + $0x14c] ss:$76 sps:$4 sm:$0xff]  }
 0x16e   :  { %4316 = vmatpush2.bf16.msra.mxu0 %v6739_v60  ;;  %4367 = vmatpush2.bf16.msra.mxu1 %v6742_v61  ;;  %v6822_v60 = vld [vmem:[#allocation6 + $0xacc] ss:$76 sps:$4 sm:$0xff]   ;;  %v6817_v61 = vld [vmem:[#allocation6 + $0x148] ss:$76 sps:$4 sm:$0xff]  }
 0x16f   :  { %4317 = vmatprep.subr.bf16.mxu0 %v6747_v0  ;;  %4368 = vmatprep.subr.bf16.mxu1 %v6750_v1  ;;  %v6820_v0 = vld [vmem:[#allocation6 + $0xac8] ss:$76 sps:$4 sm:$0xff]  }
 0x170   :  { %v6825_v1 = vld [vmem:[#allocation6 + $0xb4] ss:$76 sps:$4 sm:$0xff]  }
 0x172   :  { %4318 = vmatpush2.bf16.msra.mxu0 %v6745_v2  ;;  %4369 = vmatpush2.bf16.msra.mxu1 %v6748_v3  ;;  %v6828_v2 = vld [vmem:[#allocation6 + $0xa34] ss:$76 sps:$4 sm:$0xff]   ;;  %v6823_v3 = vld [vmem:[#allocation6 + $0xb0] ss:$76 sps:$4 sm:$0xff]  }
 0x173   :  { %4319 = vmatprep.subr.bf16.mxu0 %v6753_v4  ;;  %4370 = vmatprep.subr.bf16.mxu1 %v6756_v5  ;;  %v6826_v4 = vld [vmem:[#allocation6 + $0xa30] ss:$76 sps:$4 sm:$0xff]  }
 0x174   :  { %v6831_v5 = vld [vmem:[#allocation6 + $0x1c] ss:$76 sps:$4 sm:$0xff]  }
 0x176   :  { %4320 = vmatpush2.bf16.msra.mxu0 %v6751_v6  ;;  %4371 = vmatpush2.bf16.msra.mxu1 %v6754_v7  ;;  %v6834_v6 = vld [vmem:[#allocation6 + $0x99c] ss:$76 sps:$4 sm:$0xff]   ;;  %v6829_v7 = vld [vmem:[#allocation6 + $0x18] ss:$76 sps:$4 sm:$0xff]  }
 0x177   :  { %4321 = vmatprep.subr.bf16.mxu0 %v6759_v8  ;;  %4372 = vmatprep.subr.bf16.mxu1 %v6762_v9  ;;  %v6832_v8 = vld [vmem:[#allocation6 + $0x998] ss:$76 sps:$4 sm:$0xff]  }
 0x178   :  { %v6837_v9 = vld [vmem:[#allocation6 + $0x904] ss:$76 sps:$4 sm:$0xff]  }
 0x17a   :  { %4322 = vmatpush2.bf16.msra.mxu0 %v6757_v10  ;;  %4373 = vmatpush2.bf16.msra.mxu1 %v6760_v11  ;;  %v6840_v10 = vld [vmem:[#allocation6 + $0x1284] ss:$76 sps:$4 sm:$0xff]   ;;  %v6835_v11 = vld [vmem:[#allocation6 + $0x900] ss:$76 sps:$4 sm:$0xff]  }
 0x17b   :  { %4323 = vmatprep.subr.bf16.mxu0 %v6765_v21  ;;  %4374 = vmatprep.subr.bf16.mxu1 %v6768_v22  ;;  %v6838_v21 = vld [vmem:[#allocation6 + $0x1280] ss:$76 sps:$4 sm:$0xff]  }
 0x17c   :  { %v6843_v22 = vld [vmem:[#allocation6 + $0x86c] ss:$76 sps:$4 sm:$0xff]  }
 0x17e   :  { %4324 = vmatpush2.bf16.msra.mxu0 %v6763_v23  ;;  %4375 = vmatpush2.bf16.msra.mxu1 %v6766_v24  ;;  %v6846_v23 = vld [vmem:[#allocation6 + $0x11ec] ss:$76 sps:$4 sm:$0xff]   ;;  %v6841_v24 = vld [vmem:[#allocation6 + $0x868] ss:$76 sps:$4 sm:$0xff]  }
 0x17f   :  { %4325 = vmatprep.subr.bf16.mxu0 %v6771_v25  ;;  %4376 = vmatprep.subr.bf16.mxu1 %v6774_v26  ;;  %v6844_v25 = vld [vmem:[#allocation6 + $0x11e8] ss:$76 sps:$4 sm:$0xff]  }
 0x180   :  { %v6849_v26 = vld [vmem:[#allocation6 + $0x7d4] ss:$76 sps:$4 sm:$0xff]  }
 0x182   :  { %4326 = vmatpush2.bf16.msra.mxu0 %v6769_v27  ;;  %4377 = vmatpush2.bf16.msra.mxu1 %v6772_v28  ;;  %v6852_v27 = vld [vmem:[#allocation6 + $0x1154] ss:$76 sps:$4 sm:$0xff]   ;;  %v6847_v28 = vld [vmem:[#allocation6 + $0x7d0] ss:$76 sps:$4 sm:$0xff]  }
 0x183   :  { %4327 = vmatprep.subr.bf16.mxu0 %v6777_v29  ;;  %4378 = vmatprep.subr.bf16.mxu1 %v6780_v30  ;;  %v6850_v29 = vld [vmem:[#allocation6 + $0x1150] ss:$76 sps:$4 sm:$0xff]  }
 0x184   :  { %v6855_v30 = vld [vmem:[#allocation6 + $0x73c] ss:$76 sps:$4 sm:$0xff]  }
 0x186   :  { %4328 = vmatpush2.bf16.msra.mxu0 %v6775_v31  ;;  %4379 = vmatpush2.bf16.msra.mxu1 %v6778_v32  ;;  %v6858_v31 = vld [vmem:[#allocation6 + $0x10bc] ss:$76 sps:$4 sm:$0xff]   ;;  %v6853_v32 = vld [vmem:[#allocation6 + $0x738] ss:$76 sps:$4 sm:$0xff]  }
 0x187   :  { %4329 = vmatprep.subr.bf16.mxu0 %v6783_v33  ;;  %4380 = vmatprep.subr.bf16.mxu1 %v6786_v34  ;;  %v6856_v33 = vld [vmem:[#allocation6 + $0x10b8] ss:$76 sps:$4 sm:$0xff]  }
 0x188   :  { %v6861_v34 = vld [vmem:[#allocation6 + $0x6a4] ss:$76 sps:$4 sm:$0xff]  }
 0x18a   :  { %4330 = vmatpush2.bf16.msra.mxu0 %v6781_v35  ;;  %4381 = vmatpush2.bf16.msra.mxu1 %v6784_v36  ;;  %v6864_v35 = vld [vmem:[#allocation6 + $0x1024] ss:$76 sps:$4 sm:$0xff]   ;;  %v6859_v36 = vld [vmem:[#allocation6 + $0x6a0] ss:$76 sps:$4 sm:$0xff]  }
 0x18b   :  { %4401 = vmatprep.subr.bf16.mxu0 %v6789_v37  ;;  %4452 = vmatprep.subr.bf16.mxu1 %v6792_v38  ;;  %v6862_v37 = vld [vmem:[#allocation6 + $0x1020] ss:$76 sps:$4 sm:$0xff]  }
 0x18c   :  { %v6867_v38 = vld [vmem:[#allocation6 + $0x60c] ss:$76 sps:$4 sm:$0xff]  }
 0x18d   :  { %4332 = vmatmul.mubr.bf16.vlgmr.msra.gmra.mxu0 %v7793_v62  ;;  %4383 = vmatmul.mubr.bf16.vlgmr.msra.gmra.mxu1 %v7795_v63 }
 0x18e   :  { %4341 = vmatprep.mubr.bf16.mxu0 %v7801_v12  ;;  %4392 = vmatprep.mubr.bf16.mxu1 %v7803_v13 }
 0x18f   :  { %4402 = vmatpush1.bf16.msra.mxu0 %v6787_v39  ;;  %4453 = vmatpush1.bf16.msra.mxu1 %v6790_v40  ;;  %v6870_v39 = vld [vmem:[#allocation6 + $0xf8c] ss:$76 sps:$4 sm:$0xff]   ;;  %v6865_v40 = vld [vmem:[#allocation6 + $0x608] ss:$76 sps:$4 sm:$0xff]  }
 0x190   :  { %4403 = vmatprep.subr.bf16.mxu0 %v6795_v41  ;;  %4454 = vmatprep.subr.bf16.mxu1 %v6798_v42  ;;  %v6868_v41 = vld [vmem:[#allocation6 + $0xf88] ss:$76 sps:$4 sm:$0xff]  }
 0x191   :  { %v6873_v42 = vld [vmem:[#allocation6 + $0x574] ss:$76 sps:$4 sm:$0xff]  }
 0x193   :  { %4404 = vmatpush1.bf16.msra.mxu0 %v6793_v43  ;;  %4455 = vmatpush1.bf16.msra.mxu1 %v6796_v44  ;;  %v6876_v43 = vld [vmem:[#allocation6 + $0xef4] ss:$76 sps:$4 sm:$0xff]   ;;  %v6871_v44 = vld [vmem:[#allocation6 + $0x570] ss:$76 sps:$4 sm:$0xff]  }
 0x194   :  { %4405 = vmatprep.subr.bf16.mxu0 %v6801_v45  ;;  %4456 = vmatprep.subr.bf16.mxu1 %v6804_v46  ;;  %v6874_v45 = vld [vmem:[#allocation6 + $0xef0] ss:$76 sps:$4 sm:$0xff]  }
 0x195   :  { %4342 = vmatmul.mubr.bf16.gmra.mxu0 %v7807_v15  ;;  %4393 = vmatmul.mubr.bf16.gmra.mxu1 %v7809_v20  ;;  %v6879_v46 = vld [vmem:[#allocation6 + $0x4dc] ss:$76 sps:$4 sm:$0xff]  }
 0x196   :  { %4433 = vmatprep.mubr.bf16.mxu0 %v7789_v58  ;;  %4484 = vmatprep.mubr.bf16.mxu1 %v7791_v59 }
 0x197   :  { %4406 = vmatpush1.bf16.msra.mxu0 %v6799_v47  ;;  %4457 = vmatpush1.bf16.msra.mxu1 %v6802_v48  ;;  %v6882_v47 = vld [vmem:[#allocation6 + $0xe5c] ss:$76 sps:$4 sm:$0xff]   ;;  %v7831_v48 = vld [vmem:[#allocation7] sm:$0xff] }
 0x198   :  { %4407 = vmatprep.subr.bf16.mxu0 %v6807_v49  ;;  %4458 = vmatprep.subr.bf16.mxu1 %v6810_v50  ;;  %v6877_v49 = vld [vmem:[#allocation6 + $0x4d8] ss:$76 sps:$4 sm:$0xff]  }
 0x199   :  { %v6880_v50 = vld [vmem:[#allocation6 + $0xe58] ss:$76 sps:$4 sm:$0xff]  }
 0x19b   :  { %4408 = vmatpush1.bf16.msra.mxu0 %v6805_v51  ;;  %4459 = vmatpush1.bf16.msra.mxu1 %v6808_v52  ;;  %v6885_v51 = vld [vmem:[#allocation6 + $0x44c] ss:$76 sps:$4 sm:$0xff]  }
 0x19c   :  { %4409 = vmatprep.subr.bf16.mxu0 %v6813_v53  ;;  %4460 = vmatprep.subr.bf16.mxu1 %v6816_v54  ;;  %v6888_v52 = vld [vmem:[#allocation6 + $0xdcc] ss:$76 sps:$4 sm:$0xff]   ;;  %v931_v53 = vrot.slane %v7831_v48, %v7780_v18  ;;  %v935_v54 = vrot.slane %v7831_v48, %v7774_v16 }
 0x19f   :  { %4410 = vmatpush1.bf16.msra.mxu0 %v6811_v55  ;;  %4461 = vmatpush1.bf16.msra.mxu1 %v6814_v56  ;;  %v6883_v55 = vld [vmem:[#allocation6 + $0x448] ss:$76 sps:$4 sm:$0xff]  }
 0x1a0   :  { %4411 = vmatprep.subr.bf16.mxu0 %v6819_v57  ;;  %4462 = vmatprep.subr.bf16.mxu1 %v6822_v60  ;;  %v6886_v56 = vld [vmem:[#allocation6 + $0xdc8] ss:$76 sps:$4 sm:$0xff]  }
 0x1a3   :  { %4412 = vmatpush1.bf16.msra.mxu0 %v6817_v61  ;;  %4463 = vmatpush1.bf16.msra.mxu1 %v6820_v0  ;;  %v6891_v0 = vld [vmem:[#allocation6 + $0x3b4] ss:$76 sps:$4 sm:$0xff]  }
 0x1a4   :  { %4413 = vmatprep.subr.bf16.mxu0 %v6825_v1  ;;  %4464 = vmatprep.subr.bf16.mxu1 %v6828_v2  ;;  %v6894_v1 = vld [vmem:[#allocation6 + $0xd34] ss:$76 sps:$4 sm:$0xff]  }
 0x1a7   :  { %4414 = vmatpush1.bf16.msra.mxu0 %v6823_v3  ;;  %4465 = vmatpush1.bf16.msra.mxu1 %v6826_v4 }
 0x1a8   :  { %4415 = vmatprep.subr.bf16.mxu0 %v6831_v5  ;;  %4466 = vmatprep.subr.bf16.mxu1 %v6834_v6  ;;  %v6889_v6 = vld [vmem:[#allocation6 + $0x3b0] ss:$76 sps:$4 sm:$0xff]  }
 0x1ab   :  { %4416 = vmatpush1.bf16.msra.mxu0 %v6829_v7  ;;  %4467 = vmatpush1.bf16.msra.mxu1 %v6832_v8  ;;  %v6892_v7 = vld [vmem:[#allocation6 + $0xd30] ss:$76 sps:$4 sm:$0xff]  }
 0x1ac   :  { %4417 = vmatprep.subr.bf16.mxu0 %v6837_v9  ;;  %4468 = vmatprep.subr.bf16.mxu1 %v6840_v10 }
 0x1af   :  { %4418 = vmatpush2.bf16.msra.mxu0 %v6835_v11  ;;  %4469 = vmatpush2.bf16.msra.mxu1 %v6838_v21 }
 0x1b0   :  { %4419 = vmatprep.subr.bf16.mxu0 %v6843_v22  ;;  %4470 = vmatprep.subr.bf16.mxu1 %v6846_v23  ;;  %v6897_v22 = vld [vmem:[#allocation6 + $0x31c] ss:$76 sps:$4 sm:$0xff]  }
 0x1b1   :  { %v6900_v23 = vld [vmem:[#allocation6 + $0xc9c] ss:$76 sps:$4 sm:$0xff]  }
 0x1b3   :  { %4420 = vmatpush2.bf16.msra.mxu0 %v6841_v24  ;;  %4471 = vmatpush2.bf16.msra.mxu1 %v6844_v25 }
 0x1b4   :  { %4421 = vmatprep.subr.bf16.mxu0 %v6849_v26  ;;  %4472 = vmatprep.subr.bf16.mxu1 %v6852_v27 }
 0x1b7   :  { %4422 = vmatpush2.bf16.msra.mxu0 %v6847_v28  ;;  %4473 = vmatpush2.bf16.msra.mxu1 %v6850_v29  ;;  %v6895_v29 = vld [vmem:[#allocation6 + $0x318] ss:$76 sps:$4 sm:$0xff]  }
 0x1b8   :  { %4423 = vmatprep.subr.bf16.mxu0 %v6855_v30  ;;  %4474 = vmatprep.subr.bf16.mxu1 %v6858_v31  ;;  %v6898_v30 = vld [vmem:[#allocation6 + $0xc98] ss:$76 sps:$4 sm:$0xff]  }
 0x1bb   :  { %4424 = vmatpush2.bf16.msra.mxu0 %v6853_v32  ;;  %4475 = vmatpush2.bf16.msra.mxu1 %v6856_v33 }
 0x1bc   :  { %4425 = vmatprep.subr.bf16.mxu0 %v6861_v34  ;;  %4476 = vmatprep.subr.bf16.mxu1 %v6864_v35  ;;  %v6903_v35 = vld [vmem:[#allocation6 + $0x284] ss:$76 sps:$4 sm:$0xff]  }
 0x1bf   :  { %4426 = vmatpush2.bf16.msra.mxu0 %v6859_v36  ;;  %4477 = vmatpush2.bf16.msra.mxu1 %v6862_v37  ;;  %v6906_v36 = vld [vmem:[#allocation6 + $0xc04] ss:$76 sps:$4 sm:$0xff]  }
 0x1c0   :  { %4427 = vmatprep.subr.bf16.mxu0 %v6867_v38  ;;  %4478 = vmatprep.subr.bf16.mxu1 %v6870_v39 }
 0x1c3   :  { %4428 = vmatpush2.bf16.msra.mxu0 %v6865_v40  ;;  %4479 = vmatpush2.bf16.msra.mxu1 %v6868_v41 }
 0x1c4   :  { %4429 = vmatprep.subr.bf16.mxu0 %v6873_v42  ;;  %4480 = vmatprep.subr.bf16.mxu1 %v6876_v43  ;;  %v6901_v43 = vld [vmem:[#allocation6 + $0x280] ss:$76 sps:$4 sm:$0xff]  }
 0x1c7   :  { %4430 = vmatpush2.bf16.msra.mxu0 %v6871_v44  ;;  %4481 = vmatpush2.bf16.msra.mxu1 %v6874_v45  ;;  %v6904_v44 = vld [vmem:[#allocation6 + $0xc00] ss:$76 sps:$4 sm:$0xff]  }
 0x1c8   :  { %4431 = vmatprep.subr.bf16.mxu0 %v6879_v46  ;;  %4482 = vmatprep.subr.bf16.mxu1 %v6882_v47  ;;  %v6909_v47 = vld [vmem:[#allocation6 + $0x1ec] ss:$76 sps:$4 sm:$0xff]  }
 0x1cb   :  { %4432 = vmatpush2.bf16.msra.mxu0 %v6877_v49  ;;  %4483 = vmatpush2.bf16.msra.mxu1 %v6880_v50  ;;  %v6912_v49 = vld [vmem:[#allocation6 + $0xb6c] ss:$76 sps:$4 sm:$0xff]  }
 0x1cc   :  { %4503 = vmatprep.subr.bf16.mxu0 %v6885_v51  ;;  %4554 = vmatprep.subr.bf16.mxu1 %v6888_v52  ;;  %v4129_v57 = vpop.f32.mrf.mxu0  ;;  %v4180_v60 = vpop.f32.mrf.mxu1 }
 0x1cd   :  { %v4130_v61 = vadd.f32 %v4129_v57, %v931_v53  ;;  %v6915_v57 = vld [vmem:[#allocation6 + $0x154] ss:$76 sps:$4 sm:$0xff]  }
 0x1ce   :  { %4434 = vmatmul.mubr.bf16.vlgmr.msra.gmra.mxu0 %v7793_v62  ;;  %4485 = vmatmul.mubr.bf16.vlgmr.msra.gmra.mxu1 %v7795_v63  ;;  %v4131_v2 = vpop.f32.mrf.mxu0  ;;  %v4182_v3 = vpop.f32.mrf.mxu1 }
 0x1cf   :  { %v4181_v4 = vadd.f32 %v4180_v60, %v4130_v61  ;;  %4443 = vmatprep.mubr.bf16.mxu0 %v7801_v12  ;;  %4494 = vmatprep.mubr.bf16.mxu1 %v7803_v13  ;;  %v4132_v5 = vadd.f32 %v4131_v2, %v935_v54  ;;  %v6918_v60 = vld [vmem:[#allocation6 + $0xad4] ss:$76 sps:$4 sm:$0xff]  }
 0x1d0   :  { %4504 = vmatpush1.bf16.msra.mxu0 %v6883_v55  ;;  %4555 = vmatpush1.bf16.msra.mxu1 %v6886_v56  ;;  %v4133_v8 = vpop.f32.mrf.mxu0  ;;  %v4184_v9 = vpop.f32.mrf.mxu1  ;;  %v6910_v56 = vld [vmem:[#allocation6 + $0xb68] ss:$76 sps:$4 sm:$0xff]  }
 0x1d1   :  { %v6303_v10 = vmul.f32 -1.442695, %v4181_v4  ;;  %v4183_v11 = vadd.f32 %v4182_v3, %v4132_v5  ;;  %4505 = vmatprep.subr.bf16.mxu0 %v6891_v0  ;;  %4556 = vmatprep.subr.bf16.mxu1 %v6894_v1  ;;  %v4134_v21 = vadd.f32 %v4133_v8, %v931_v53  ;;  %v6913_v0 = vld [vmem:[#allocation6 + $0x150] ss:$76 sps:$4 sm:$0xff]   ;;  %v6919_v8 = vld [vmem:[#allocation6 + $0xb8] ss:$76 sps:$4 sm:$0xff]  }
 0x1d2   :  { %v4135_v24 = vpop.f32.mrf.mxu0  ;;  %v4186_v25 = vpop.f32.mrf.mxu1  ;;  %v6916_v1 = vld [vmem:[#allocation6 + $0xad0] ss:$76 sps:$4 sm:$0xff]  }
 0x1d3   :  { %7395 = vpow2.f32 %v6303_v10  ;;  %v6304_v26 = vmul.f32 -1.442695, %v4183_v11  ;;  %v4185_v27 = vadd.f32 %v4184_v9, %v4134_v21  ;;  %v4136_v28 = vadd.f32 %v4135_v24, %v935_v54  ;;  %v6921_v3 = vld [vmem:[#allocation6 + $0xbc] ss:$76 sps:$4 sm:$0xff]   ;;  %v6922_v9 = vld [vmem:[#allocation6 + $0xa38] ss:$76 sps:$4 sm:$0xff]  }
 0x1d4   :  { %4506 = vmatpush1.bf16.msra.mxu0 %v6889_v6  ;;  %4557 = vmatpush1.bf16.msra.mxu1 %v6892_v7  ;;  %v4139_v31 = vpop.f32.mrf.mxu0  ;;  %v4190_v32 = vpop.f32.mrf.mxu1  ;;  %v6924_v4 = vld [vmem:[#allocation6 + $0xa3c] ss:$76 sps:$4 sm:$0xff]   ;;  %v6927_v11 = vld [vmem:[#allocation6 + $0x24] ss:$76 sps:$4 sm:$0xff]  }
 0x1d5   :  { %7397 = vpow2.f32 %v6304_v26  ;;  %v6322_v33 = vmul.f32 -1.442695, %v4185_v27  ;;  %v4187_v34 = vadd.f32 %v4186_v25, %v4136_v28  ;;  %4507 = vmatprep.subr.bf16.mxu0 %v6897_v22  ;;  %4558 = vmatprep.subr.bf16.mxu1 %v6900_v23  ;;  %v4140_v37 = vadd.f32 %v4139_v31, %v931_v53  ;;  %v6930_v21 = vld [vmem:[#allocation6 + $0x9a4] ss:$76 sps:$4 sm:$0xff]   ;;  %v6925_v25 = vld [vmem:[#allocation6 + $0x20] ss:$76 sps:$4 sm:$0xff]  }
 0x1d6   :  { %4444 = vmatmul.mubr.bf16.gmra.mxu0 %v7807_v15  ;;  %4495 = vmatmul.mubr.bf16.gmra.mxu1 %v7809_v20  ;;  %v4141_v38 = vpop.f32.mrf.mxu0  ;;  %v4192_v39 = vpop.f32.mrf.mxu1  ;;  %v6928_v26 = vld [vmem:[#allocation6 + $0x9a0] ss:$76 sps:$4 sm:$0xff]  }
 0x1d7   :  { %7399 = vpow2.f32 %v6322_v33  ;;  %v6323_v40 = vmul.f32 -1.442695, %v4187_v34  ;;  %4535 = vmatprep.mubr.bf16.mxu0 %v7789_v58  ;;  %4586 = vmatprep.mubr.bf16.mxu1 %v7791_v59  ;;  %v4142_v41 = vadd.f32 %v4141_v38, %v935_v54  ;;  %v4191_v42 = vadd.f32 %v4190_v32, %v4140_v37  ;;  %v6907_v54 = vld [vmem:[#allocation6 + $0x1e8] ss:$76 sps:$4 sm:$0xff]   ;;  %v6933_v27 = vld [vmem:[#allocation6 + $0x90c] ss:$76 sps:$4 sm:$0xff]  }
 0x1d8   :  { %4508 = vmatpush1.bf16.msra.mxu0 %v6895_v29  ;;  %4559 = vmatpush1.bf16.msra.mxu1 %v6898_v30  ;;  %v4143_v45 = vpop.f32.mrf.mxu0  ;;  %v4194_v46 = vpop.f32.mrf.mxu1  ;;  %v6936_v28 = vld [vmem:[#allocation6 + $0x128c] ss:$76 sps:$4 sm:$0xff]   ;;  %v6931_v32 = vld [vmem:[#allocation6 + $0x908] ss:$76 sps:$4 sm:$0xff]   ;;  %v6940_v37 = vld [vmem:[#allocation6 + $0x11f0] ss:$76 sps:$4 sm:$0xff]  }
 0x1d9   :  { %7401 = vpow2.f32 %v6323_v40  ;;  %4509 = vmatprep.subr.bf16.mxu0 %v6903_v35  ;;  %4560 = vmatprep.subr.bf16.mxu1 %v6906_v36  ;;  %v6341_v50 = vmul.f32 -1.442695, %v4191_v42  ;;  %v4193_v51 = vadd.f32 %v4192_v39, %v4142_v41  ;;  %v6934_v33 = vld [vmem:[#allocation6 + $0x1288] ss:$76 sps:$4 sm:$0xff]   ;;  %v6937_v36 = vld [vmem:[#allocation6 + $0x870] ss:$76 sps:$4 sm:$0xff]  }
 0x1da   :  { %v4144_v52 = vpop.f32.mrf.mxu0  ;;  %v4195_v53 = vpop.f32.mrf.mxu1  ;;  %v6939_v34 = vld [vmem:[#allocation6 + $0x874] ss:$76 sps:$4 sm:$0xff]   ;;  %v6945_v39 = vld [vmem:[#allocation6 + $0x7dc] ss:$76 sps:$4 sm:$0xff]   ;;  %v6951_v46 = vld [vmem:[#allocation6 + $0x744] ss:$76 sps:$4 sm:$0xff]  }
 0x1db   :  { %7403 = vpow2.f32 %v6341_v50  ;;  %v6342_v55 = vmul.f32 -1.442695, %v4193_v51  ;;  %v6942_v35 = vld [vmem:[#allocation6 + $0x11f4] ss:$76 sps:$4 sm:$0xff]   ;;  %v6948_v40 = vld [vmem:[#allocation6 + $0x115c] ss:$76 sps:$4 sm:$0xff]  }
 0x1dc   :  { %4510 = vmatpush1.bf16.msra.mxu0 %v6901_v43  ;;  %4561 = vmatpush1.bf16.msra.mxu1 %v6904_v44  ;;  %v6943_v43 = vld [vmem:[#allocation6 + $0x7d8] ss:$76 sps:$4 sm:$0xff]   ;;  %v6949_v52 = vld [vmem:[#allocation6 + $0x740] ss:$76 sps:$4 sm:$0xff]  }
 0x1dd   :  { %4511 = vmatprep.subr.bf16.mxu0 %v6909_v47  ;;  %4562 = vmatprep.subr.bf16.mxu1 %v6912_v49  ;;  %7405 = vpow2.f32 %v6342_v55  ;;  %v6946_v44 = vld [vmem:[#allocation6 + $0x1158] ss:$76 sps:$4 sm:$0xff]   ;;  %v6952_v53 = vld [vmem:[#allocation6 + $0x10c0] ss:$76 sps:$4 sm:$0xff]  }
 0x1de   :  { %v6954_v47 = vld [vmem:[#allocation6 + $0x10c4] ss:$76 sps:$4 sm:$0xff]   ;;  %v6957_v55 = vld [vmem:[#allocation6 + $0x6ac] ss:$76 sps:$4 sm:$0xff]  }
 0x1e0   :  { %v7396_v61 = vpop.eup %7395  ;;  %4512 = vmatpush1.bf16.msra.mxu0 %v6907_v54  ;;  %4563 = vmatpush1.bf16.msra.mxu1 %v6910_v56  ;;  %v6960_v54 = vld [vmem:[#allocation6 + $0x102c] ss:$76 sps:$4 sm:$0xff]  }
 0x1e1   :  { %v5280_v2 = vadd.f32 1.0, %v7396_v61  ;;  %4513 = vmatprep.subr.bf16.mxu0 %v6915_v57  ;;  %4564 = vmatprep.subr.bf16.mxu1 %v6918_v60  ;;  %v6955_v60 = vld [vmem:[#allocation6 + $0x6a8] ss:$76 sps:$4 sm:$0xff]  }
 0x1e2   :  { %v7398_v5 = vpop.eup %7397  ;;  %v6958_v61 = vld [vmem:[#allocation6 + $0x1028] ss:$76 sps:$4 sm:$0xff]  }
 0x1e3   :  { %v5281_v6 = vadd.f32 1.0, %v7398_v5  ;;  %7407 = vrcp.f32 %v5280_v2  ;;  %v6961_v2 = vld [vmem:[#allocation6 + $0x610] ss:$76 sps:$4 sm:$0xff]  }
 0x1e4   :  { %v7400_v7 = vpop.eup %7399  ;;  %4514 = vmatpush1.bf16.msra.mxu0 %v6913_v0  ;;  %4565 = vmatpush1.bf16.msra.mxu1 %v6916_v1  ;;  %v6963_v0 = vld [vmem:[#allocation6 + $0x614] ss:$76 sps:$4 sm:$0xff]   ;;  %v6972_v5 = vld [vmem:[#allocation6 + $0xefc] ss:$76 sps:$4 sm:$0xff]  }
 0x1e5   :  { %7409 = vrcp.f32 %v5281_v6  ;;  %v5299_v10 = vadd.f32 1.0, %v7400_v7  ;;  %4515 = vmatprep.subr.bf16.mxu0 %v6921_v3  ;;  %4566 = vmatprep.subr.bf16.mxu1 %v6924_v4  ;;  %v6966_v1 = vld [vmem:[#allocation6 + $0xf94] ss:$76 sps:$4 sm:$0xff]   ;;  %v6964_v3 = vld [vmem:[#allocation6 + $0xf90] ss:$76 sps:$4 sm:$0xff]  }
 0x1e6   :  { %v7402_v22 = vpop.eup %7401  ;;  %v6969_v4 = vld [vmem:[#allocation6 + $0x57c] ss:$76 sps:$4 sm:$0xff]   ;;  %v6967_v6 = vld [vmem:[#allocation6 + $0x578] ss:$76 sps:$4 sm:$0xff]  }
 0x1e7   :  { %v5300_v23 = vadd.f32 1.0, %v7402_v22  ;;  %7411 = vrcp.f32 %v5299_v10  ;;  %v6970_v7 = vld [vmem:[#allocation6 + $0xef8] ss:$76 sps:$4 sm:$0xff]   ;;  %v6973_v10 = vld [vmem:[#allocation6 + $0x4e0] ss:$76 sps:$4 sm:$0xff]  }
 0x1e8   :  { %v7404_v24 = vpop.eup %7403  ;;  %4516 = vmatpush1.bf16.msra.mxu0 %v6919_v8  ;;  %4567 = vmatpush1.bf16.msra.mxu1 %v6922_v9  ;;  %v6975_v8 = vld [vmem:[#allocation6 + $0x4e4] ss:$76 sps:$4 sm:$0xff]   ;;  %v6981_v22 = vld [vmem:[#allocation6 + $0x454] ss:$76 sps:$4 sm:$0xff]  }
 0x1e9   :  { %7413 = vrcp.f32 %v5300_v23  ;;  %4517 = vmatprep.subr.bf16.mxu0 %v6927_v11  ;;  %4568 = vmatprep.subr.bf16.mxu1 %v6930_v21  ;;  %v5318_v29 = vadd.f32 1.0, %v7404_v24  ;;  %v6978_v9 = vld [vmem:[#allocation6 + $0xe64] ss:$76 sps:$4 sm:$0xff]   ;;  %v6976_v11 = vld [vmem:[#allocation6 + $0xe60] ss:$76 sps:$4 sm:$0xff]   ;;  %v939_v21 = vrot.slane %v7831_v48, %v7783_v19  ;;  %v943_v24 = vrot.slane %v7831_v48, %v7777_v17 }
 0x1ea   :  { %v7406_v30 = vpop.eup %7405  ;;  %v6984_v23 = vld [vmem:[#allocation6 + $0xdd4] ss:$76 sps:$4 sm:$0xff]  }
 0x1eb   :  { %7415 = vrcp.f32 %v5318_v29  ;;  %v5319_v31 = vadd.f32 1.0, %v7406_v30  ;;  %v6982_v29 = vld [vmem:[#allocation6 + $0xdd0] ss:$76 sps:$4 sm:$0xff]  }
 0x1ec   :  { %4518 = vmatpush1.bf16.msra.mxu0 %v6925_v25  ;;  %4569 = vmatpush1.bf16.msra.mxu1 %v6928_v26 }
 0x1ed   :  { %4519 = vmatprep.subr.bf16.mxu0 %v6933_v27  ;;  %4570 = vmatprep.subr.bf16.mxu1 %v6936_v28  ;;  %7417 = vrcp.f32 %v5319_v31  ;;  %v6979_v28 = vld [vmem:[#allocation6 + $0x450] ss:$76 sps:$4 sm:$0xff]  }
 0x1f0   :  { %4520 = vmatpush2.bf16.msra.mxu0 %v6931_v32  ;;  %4571 = vmatpush2.bf16.msra.mxu1 %v6934_v33  ;;  %v7408_v38 = vpop.eup %7407  ;;  %v6987_v32 = vld [vmem:[#allocation6 + $0x3bc] ss:$76 sps:$4 sm:$0xff]  }
 0x1f1   :  { %4521 = vmatprep.subr.bf16.mxu0 %v6939_v34  ;;  %4572 = vmatprep.subr.bf16.mxu1 %v6942_v35  ;;  %v6990_v33 = vld [vmem:[#allocation6 + $0xd3c] ss:$76 sps:$4 sm:$0xff]  }
 0x1f2   :  { %v7410_v41 = vpop.eup %7409 }
 0x1f3   :  { %v6390_v42 = vpack.c.bf16 %v7410_v41, %v7408_v38  ;;  %v6985_v41 = vld [vmem:[#allocation6 + $0x3b8] ss:$76 sps:$4 sm:$0xff]  }
 0x1f4   :  { %4522 = vmatpush2.bf16.msra.mxu0 %v6937_v36  ;;  %4573 = vmatpush2.bf16.msra.mxu1 %v6940_v37  ;;  %v7412_v45 = vpop.eup %7411 }
 0x1f5   :  { %5644 = vst [vmem:[%s8034_s5] sm:$0xff] %v6390_v42  ;;  %4523 = vmatprep.subr.bf16.mxu0 %v6945_v39  ;;  %4574 = vmatprep.subr.bf16.mxu1 %v6948_v40  ;;  %v6988_v42 = vld [vmem:[#allocation6 + $0xd38] ss:$76 sps:$4 sm:$0xff]  }
 0x1f6   :  { %v7414_v49 = vpop.eup %7413 }
 0x1f7   :  { %v6400_v50 = vpack.c.bf16 %v7414_v49, %v7412_v45  ;;  %v6993_v45 = vld [vmem:[#allocation6 + $0x324] ss:$76 sps:$4 sm:$0xff]  }
 0x1f8   :  { %v7416_v51 = vpop.eup %7415  ;;  %4524 = vmatpush2.bf16.msra.mxu0 %v6943_v43  ;;  %4575 = vmatpush2.bf16.msra.mxu1 %v6946_v44 }
 0x1f9   :  { %5654 = vst [vmem:[%s8034_s5 + $0x4c] sm:$0xff] %v6400_v50  ;;  %4525 = vmatprep.subr.bf16.mxu0 %v6951_v46  ;;  %4576 = vmatprep.subr.bf16.mxu1 %v6954_v47  ;;  %v6996_v46 = vld [vmem:[#allocation6 + $0xca4] ss:$76 sps:$4 sm:$0xff]  }
 0x1fa   :  { %v7418_v56 = vpop.eup %7417 }
 0x1fb   :  { %v6410_v57 = vpack.c.bf16 %v7418_v56, %v7416_v51  ;;  %v6991_v56 = vld [vmem:[#allocation6 + $0x320] ss:$76 sps:$4 sm:$0xff]  }
 0x1fc   :  { %4526 = vmatpush2.bf16.msra.mxu0 %v6949_v52  ;;  %4577 = vmatpush2.bf16.msra.mxu1 %v6952_v53 }
 0x1fd   :  { %4527 = vmatprep.subr.bf16.mxu0 %v6957_v55  ;;  %4578 = vmatprep.subr.bf16.mxu1 %v6960_v54  ;;  %5664 = vst [vmem:[%s8034_s5 + $0x98] sm:$0xff] %v6410_v57  ;;  %v6994_v57 = vld [vmem:[#allocation6 + $0xca0] ss:$76 sps:$4 sm:$0xff]  }
 0x200   :  { %4528 = vmatpush2.bf16.msra.mxu0 %v6955_v60  ;;  %4579 = vmatpush2.bf16.msra.mxu1 %v6958_v61 }
 0x201   :  { %4529 = vmatprep.subr.bf16.mxu0 %v6963_v0  ;;  %4580 = vmatprep.subr.bf16.mxu1 %v6966_v1  ;;  %v6999_v0 = vld [vmem:[#allocation6 + $0x28c] ss:$76 sps:$4 sm:$0xff]  }
 0x202   :  { %v7002_v1 = vld [vmem:[#allocation6 + $0xc0c] ss:$76 sps:$4 sm:$0xff]  }
 0x204   :  { %4530 = vmatpush2.bf16.msra.mxu0 %v6961_v2  ;;  %4581 = vmatpush2.bf16.msra.mxu1 %v6964_v3 }
 0x205   :  { %4531 = vmatprep.subr.bf16.mxu0 %v6969_v4  ;;  %4582 = vmatprep.subr.bf16.mxu1 %v6972_v5 }
 0x208   :  { %4532 = vmatpush2.bf16.msra.mxu0 %v6967_v6  ;;  %4583 = vmatpush2.bf16.msra.mxu1 %v6970_v7 }
 0x209   :  { %4533 = vmatprep.subr.bf16.mxu0 %v6975_v8  ;;  %4584 = vmatprep.subr.bf16.mxu1 %v6978_v9  ;;  %v6997_v9 = vld [vmem:[#allocation6 + $0x288] ss:$76 sps:$4 sm:$0xff]  }
 0x20c   :  { %4534 = vmatpush2.bf16.msra.mxu0 %v6973_v10  ;;  %4585 = vmatpush2.bf16.msra.mxu1 %v6976_v11  ;;  %v4231_v25 = vpop.f32.mrf.mxu0  ;;  %v4282_v26 = vpop.f32.mrf.mxu1  ;;  %v7000_v10 = vld [vmem:[#allocation6 + $0xc08] ss:$76 sps:$4 sm:$0xff]  }
 0x20d   :  { %v4232_v27 = vadd.f32 %v4231_v25, %v939_v21  ;;  %4605 = vmatprep.subr.bf16.mxu0 %v6981_v22  ;;  %4656 = vmatprep.subr.bf16.mxu1 %v6984_v23  ;;  %v7005_v22 = vld [vmem:[#allocation6 + $0x1f4] ss:$76 sps:$4 sm:$0xff]   ;;  %v7003_v25 = vld [vmem:[#allocation6 + $0x1f0] ss:$76 sps:$4 sm:$0xff]  }
 0x20e   :  { %v4233_v30 = vpop.f32.mrf.mxu0  ;;  %v4284_v31 = vpop.f32.mrf.mxu1  ;;  %v7008_v23 = vld [vmem:[#allocation6 + $0xb74] ss:$76 sps:$4 sm:$0xff]  }
 0x20f   :  { %v4283_v34 = vadd.f32 %v4282_v26, %v4232_v27  ;;  %4536 = vmatmul.mubr.bf16.vlgmr.msra.gmra.mxu0 %v7793_v62  ;;  %4587 = vmatmul.mubr.bf16.vlgmr.msra.gmra.mxu1 %v7795_v63  ;;  %v4234_v35 = vadd.f32 %v4233_v30, %v943_v24  ;;  %v7006_v26 = vld [vmem:[#allocation6 + $0xb70] ss:$76 sps:$4 sm:$0xff]  }
 0x210   :  { %4545 = vmatprep.mubr.bf16.mxu0 %v7801_v12  ;;  %4596 = vmatprep.mubr.bf16.mxu1 %v7803_v13  ;;  %v4235_v36 = vpop.f32.mrf.mxu0  ;;  %v4286_v37 = vpop.f32.mrf.mxu1  ;;  %v7011_v27 = vld [vmem:[#allocation6 + $0x15c] ss:$76 sps:$4 sm:$0xff]  }
 0x211   :  { %v6305_v38 = vmul.f32 -1.442695, %v4283_v34  ;;  %4606 = vmatpush1.bf16.msra.mxu0 %v6979_v28  ;;  %4657 = vmatpush1.bf16.msra.mxu1 %v6982_v29  ;;  %v4285_v39 = vadd.f32 %v4284_v31, %v4234_v35  ;;  %v4236_v40 = vadd.f32 %v4235_v36, %v939_v21  ;;  %v7014_v28 = vld [vmem:[#allocation6 + $0xadc] ss:$76 sps:$4 sm:$0xff]   ;;  %v7009_v31 = vld [vmem:[#allocation6 + $0x158] ss:$76 sps:$4 sm:$0xff]  }
 0x212   :  { %4607 = vmatprep.subr.bf16.mxu0 %v6987_v32  ;;  %4658 = vmatprep.subr.bf16.mxu1 %v6990_v33  ;;  %v4237_v43 = vpop.f32.mrf.mxu0  ;;  %v4288_v44 = vpop.f32.mrf.mxu1  ;;  %v7012_v32 = vld [vmem:[#allocation6 + $0xad8] ss:$76 sps:$4 sm:$0xff]  }
 0x213   :  { %7419 = vpow2.f32 %v6305_v38  ;;  %v6306_v47 = vmul.f32 -1.442695, %v4285_v39  ;;  %v4287_v49 = vadd.f32 %v4286_v37, %v4236_v40  ;;  %v4238_v50 = vadd.f32 %v4237_v43, %v943_v24  ;;  %v7017_v34 = vld [vmem:[#allocation6 + $0xc4] ss:$76 sps:$4 sm:$0xff]   ;;  %v7015_v39 = vld [vmem:[#allocation6 + $0xc0] ss:$76 sps:$4 sm:$0xff]  }
 0x214   :  { %v4241_v51 = vpop.f32.mrf.mxu0  ;;  %v4292_v52 = vpop.f32.mrf.mxu1  ;;  %v7020_v35 = vld [vmem:[#allocation6 + $0xa44] ss:$76 sps:$4 sm:$0xff]   ;;  %v7018_v40 = vld [vmem:[#allocation6 + $0xa40] ss:$76 sps:$4 sm:$0xff]  }
 0x215   :  { %7421 = vpow2.f32 %v6306_v47  ;;  %v6324_v53 = vmul.f32 -1.442695, %v4287_v49  ;;  %4608 = vmatpush1.bf16.msra.mxu0 %v6985_v41  ;;  %4659 = vmatpush1.bf16.msra.mxu1 %v6988_v42  ;;  %v4289_v55 = vadd.f32 %v4288_v44, %v4238_v50  ;;  %v4242_v54 = vadd.f32 %v4241_v51, %v939_v21  ;;  %v7023_v42 = vld [vmem:[#allocation6 + $0x2c] ss:$76 sps:$4 sm:$0xff]   ;;  %v7021_v47 = vld [vmem:[#allocation6 + $0x28] ss:$76 sps:$4 sm:$0xff]  }
 0x216   :  { %4609 = vmatprep.subr.bf16.mxu0 %v6993_v45  ;;  %4660 = vmatprep.subr.bf16.mxu1 %v6996_v46  ;;  %v4243_v60 = vpop.f32.mrf.mxu0  ;;  %v4294_v61 = vpop.f32.mrf.mxu1  ;;  %v7026_v43 = vld [vmem:[#allocation6 + $0x9ac] ss:$76 sps:$4 sm:$0xff]   ;;  %v7024_v49 = vld [vmem:[#allocation6 + $0x9a8] ss:$76 sps:$4 sm:$0xff]  }
 0x217   :  { %7423 = vpow2.f32 %v6324_v53  ;;  %v6325_v2 = vmul.f32 -1.442695, %v4289_v55  ;;  %v4293_v3 = vadd.f32 %v4292_v52, %v4242_v54  ;;  %4546 = vmatmul.mubr.bf16.gmra.mxu0 %v7807_v15  ;;  %4597 = vmatmul.mubr.bf16.gmra.mxu1 %v7809_v20  ;;  %v4244_v4 = vadd.f32 %v4243_v60, %v943_v24  ;;  %v7029_v51 = vld [vmem:[#allocation6 + $0x914] ss:$76 sps:$4 sm:$0xff]   ;;  %v7027_v55 = vld [vmem:[#allocation6 + $0x910] ss:$76 sps:$4 sm:$0xff]  }
 0x218   :  { %4637 = vmatprep.mubr.bf16.mxu0 %v7789_v58  ;;  %4688 = vmatprep.mubr.bf16.mxu1 %v7791_v59  ;;  %v4245_v5 = vpop.f32.mrf.mxu0  ;;  %v4296_v6 = vpop.f32.mrf.mxu1  ;;  %v7032_v52 = vld [vmem:[#allocation6 + $0x1294] ss:$76 sps:$4 sm:$0xff]   ;;  %v7030_v54 = vld [vmem:[#allocation6 + $0x1290] ss:$76 sps:$4 sm:$0xff]  }
 0x219   :  { %7425 = vpow2.f32 %v6325_v2  ;;  %v6343_v7 = vmul.f32 -1.442695, %v4293_v3  ;;  %4610 = vmatpush1.bf16.msra.mxu0 %v6991_v56  ;;  %4661 = vmatpush1.bf16.msra.mxu1 %v6994_v57  ;;  %v4295_v8 = vadd.f32 %v4294_v61, %v4244_v4  ;;  %v7035_v56 = vld [vmem:[#allocation6 + $0x87c] ss:$76 sps:$4 sm:$0xff]   ;;  %v7033_v61 = vld [vmem:[#allocation6 + $0x878] ss:$76 sps:$4 sm:$0xff]  }
 0x21a   :  { %4611 = vmatprep.subr.bf16.mxu0 %v6999_v0  ;;  %4662 = vmatprep.subr.bf16.mxu1 %v7002_v1  ;;  %v4246_v11 = vpop.f32.mrf.mxu0  ;;  %v4297_v21 = vpop.f32.mrf.mxu1  ;;  %v7038_v57 = vld [vmem:[#allocation6 + $0x11fc] ss:$76 sps:$4 sm:$0xff]   ;;  %v7036_v0 = vld [vmem:[#allocation6 + $0x11f8] ss:$76 sps:$4 sm:$0xff]   ;;  %v7039_v6 = vld [vmem:[#allocation6 + $0x7e0] ss:$76 sps:$4 sm:$0xff]  }
 0x21b   :  { %7427 = vpow2.f32 %v6343_v7  ;;  %v6344_v24 = vmul.f32 -1.442695, %v4295_v8  ;;  %v7041_v2 = vld [vmem:[#allocation6 + $0x7e4] ss:$76 sps:$4 sm:$0xff]   ;;  %v7042_v7 = vld [vmem:[#allocation6 + $0x1160] ss:$76 sps:$4 sm:$0xff]  }
 0x21c   :  { %v7044_v3 = vld [vmem:[#allocation6 + $0x1164] ss:$76 sps:$4 sm:$0xff]  }
 0x21d   :  { %7429 = vpow2.f32 %v6344_v24  ;;  %4612 = vmatpush1.bf16.msra.mxu0 %v6997_v9  ;;  %4663 = vmatpush1.bf16.msra.mxu1 %v7000_v10  ;;  %v7047_v9 = vld [vmem:[#allocation6 + $0x74c] ss:$76 sps:$4 sm:$0xff]  }
 0x21e   :  { %4613 = vmatprep.subr.bf16.mxu0 %v7005_v22  ;;  %4664 = vmatprep.subr.bf16.mxu1 %v7008_v23  ;;  %v7050_v10 = vld [vmem:[#allocation6 + $0x10cc] ss:$76 sps:$4 sm:$0xff]   ;;  %v7045_v22 = vld [vmem:[#allocation6 + $0x748] ss:$76 sps:$4 sm:$0xff]  }
 0x21f   :  { %v7048_v23 = vld [vmem:[#allocation6 + $0x10c8] ss:$76 sps:$4 sm:$0xff]  }
 0x220   :  { %v7420_v29 = vpop.eup %7419 }
 0x221   :  { %v5282_v30 = vadd.f32 1.0, %v7420_v29  ;;  %4614 = vmatpush1.bf16.msra.mxu0 %v7003_v25  ;;  %4665 = vmatpush1.bf16.msra.mxu1 %v7006_v26  ;;  %v7053_v25 = vld [vmem:[#allocation6 + $0x6b4] ss:$76 sps:$4 sm:$0xff]   ;;  %v7054_v29 = vld [vmem:[#allocation6 + $0x1030] ss:$76 sps:$4 sm:$0xff]  }
 0x222   :  { %v7422_v33 = vpop.eup %7421  ;;  %4615 = vmatprep.subr.bf16.mxu0 %v7011_v27  ;;  %4666 = vmatprep.subr.bf16.mxu1 %v7014_v28  ;;  %v7056_v26 = vld [vmem:[#allocation6 + $0x1034] ss:$76 sps:$4 sm:$0xff]   ;;  %v7051_v28 = vld [vmem:[#allocation6 + $0x6b0] ss:$76 sps:$4 sm:$0xff]  }
 0x223   :  { %v5283_v36 = vadd.f32 1.0, %v7422_v33  ;;  %7431 = vrcp.f32 %v5282_v30  ;;  %v7059_v30 = vld [vmem:[#allocation6 + $0x61c] ss:$76 sps:$4 sm:$0xff]   ;;  %v7060_v33 = vld [vmem:[#allocation6 + $0xf98] ss:$76 sps:$4 sm:$0xff]  }
 0x224   :  { %v7424_v37 = vpop.eup %7423 }
 0x225   :  { %7433 = vrcp.f32 %v5283_v36  ;;  %v5301_v38 = vadd.f32 1.0, %v7424_v37  ;;  %4616 = vmatpush1.bf16.msra.mxu0 %v7009_v31  ;;  %4667 = vmatpush1.bf16.msra.mxu1 %v7012_v32  ;;  %v7062_v31 = vld [vmem:[#allocation6 + $0xf9c] ss:$76 sps:$4 sm:$0xff]   ;;  %v7057_v32 = vld [vmem:[#allocation6 + $0x618] ss:$76 sps:$4 sm:$0xff]  }
 0x226   :  { %v7426_v41 = vpop.eup %7425  ;;  %4617 = vmatprep.subr.bf16.mxu0 %v7017_v34  ;;  %4668 = vmatprep.subr.bf16.mxu1 %v7020_v35  ;;  %v7065_v34 = vld [vmem:[#allocation6 + $0x584] ss:$76 sps:$4 sm:$0xff]   ;;  %v7063_v36 = vld [vmem:[#allocation6 + $0x580] ss:$76 sps:$4 sm:$0xff]  }
 0x227   :  { %v5302_v44 = vadd.f32 1.0, %v7426_v41  ;;  %7435 = vrcp.f32 %v5301_v38  ;;  %v7068_v35 = vld [vmem:[#allocation6 + $0xf04] ss:$76 sps:$4 sm:$0xff]   ;;  %v7066_v37 = vld [vmem:[#allocation6 + $0xf00] ss:$76 sps:$4 sm:$0xff]   ;;  %v950_v41 = vsub.s32 5, %v7771_v14 }
 0x228   :  { %v7428_v45 = vpop.eup %7427  ;;  %v7071_v38 = vld [vmem:[#allocation6 + $0x4ec] ss:$76 sps:$4 sm:$0xff]  }
 0x229   :  { %7437 = vrcp.f32 %v5302_v44  ;;  %v5320_v46 = vadd.f32 1.0, %v7428_v45  ;;  %4618 = vmatpush1.bf16.msra.mxu0 %v7015_v39  ;;  %4669 = vmatpush1.bf16.msra.mxu1 %v7018_v40  ;;  %v7074_v39 = vld [vmem:[#allocation6 + $0xe6c] ss:$76 sps:$4 sm:$0xff]   ;;  %v946_v40 = vsub.s32 4, %v7771_v14  ;;  %v7077_v45 = vld [vmem:[#allocation6 + $0x45c] ss:$76 sps:$4 sm:$0xff]  }
 0x22a   :  { %v7430_v50 = vpop.eup %7429  ;;  %4619 = vmatprep.subr.bf16.mxu0 %v7023_v42  ;;  %4670 = vmatprep.subr.bf16.mxu1 %v7026_v43  ;;  %v7069_v42 = vld [vmem:[#allocation6 + $0x4e8] ss:$76 sps:$4 sm:$0xff]  }
 0x22b   :  { %v5321_v53 = vadd.f32 1.0, %v7430_v50  ;;  %7439 = vrcp.f32 %v5320_v46  ;;  %v7072_v43 = vld [vmem:[#allocation6 + $0xe68] ss:$76 sps:$4 sm:$0xff]   ;;  %v947_v44 = vrot.slane %v7831_v48, %v946_v40 }
 0x22c   :  { %v7080_v46 = vld [vmem:[#allocation6 + $0xddc] ss:$76 sps:$4 sm:$0xff]  }
 0x22d   :  { %7441 = vrcp.f32 %v5321_v53  ;;  %4620 = vmatpush1.bf16.msra.mxu0 %v7021_v47  ;;  %4671 = vmatpush1.bf16.msra.mxu1 %v7024_v49  ;;  %v951_v47 = vrot.slane %v7831_v48, %v950_v41  ;;  %v7078_v53 = vld [vmem:[#allocation6 + $0xdd8] ss:$76 sps:$4 sm:$0xff]  }
 0x22e   :  { %4621 = vmatprep.subr.bf16.mxu0 %v7029_v51  ;;  %4672 = vmatprep.subr.bf16.mxu1 %v7032_v52  ;;  %v7075_v52 = vld [vmem:[#allocation6 + $0x458] ss:$76 sps:$4 sm:$0xff]  }
 0x230   :  { %v7432_v60 = vpop.eup %7431 }
 0x231   :  { %4622 = vmatpush2.bf16.msra.mxu0 %v7027_v55  ;;  %4673 = vmatpush2.bf16.msra.mxu1 %v7030_v54 }
 0x232   :  { %v7434_v1 = vpop.eup %7433  ;;  %4623 = vmatprep.subr.bf16.mxu0 %v7035_v56  ;;  %4674 = vmatprep.subr.bf16.mxu1 %v7038_v57  ;;  %v7083_v56 = vld [vmem:[#allocation6 + $0x3c4] ss:$76 sps:$4 sm:$0xff]  }
 0x233   :  { %v6391_v4 = vpack.c.bf16 %v7434_v1, %v7432_v60  ;;  %v7086_v57 = vld [vmem:[#allocation6 + $0xd44] ss:$76 sps:$4 sm:$0xff]  }
 0x234   :  { %v7436_v5 = vpop.eup %7435 }
 0x235   :  { %5645 = vst [vmem:[%s8034_s5 + $0x8] sm:$0xff] %v6391_v4  ;;  %4624 = vmatpush2.bf16.msra.mxu0 %v7033_v61  ;;  %4675 = vmatpush2.bf16.msra.mxu1 %v7036_v0  ;;  %v7081_v4 = vld [vmem:[#allocation6 + $0x3c0] ss:$76 sps:$4 sm:$0xff]  }
 0x236   :  { %v7438_v8 = vpop.eup %7437  ;;  %4625 = vmatprep.subr.bf16.mxu0 %v7041_v2  ;;  %4676 = vmatprep.subr.bf16.mxu1 %v7044_v3 }
 0x237   :  { %v6401_v11 = vpack.c.bf16 %v7438_v8, %v7436_v5  ;;  %v7084_v5 = vld [vmem:[#allocation6 + $0xd40] ss:$76 sps:$4 sm:$0xff]  }
 0x238   :  { %v7440_v21 = vpop.eup %7439  ;;  %v7089_v8 = vld [vmem:[#allocation6 + $0x32c] ss:$76 sps:$4 sm:$0xff]  }
 0x239   :  { %5655 = vst [vmem:[%s8034_s5 + $0x54] sm:$0xff] %v6401_v11  ;;  %4626 = vmatpush2.bf16.msra.mxu0 %v7039_v6  ;;  %4677 = vmatpush2.bf16.msra.mxu1 %v7042_v7 }
 0x23a   :  { %v7442_v24 = vpop.eup %7441  ;;  %4627 = vmatprep.subr.bf16.mxu0 %v7047_v9  ;;  %4678 = vmatprep.subr.bf16.mxu1 %v7050_v10  ;;  %v7092_v9 = vld [vmem:[#allocation6 + $0xcac] ss:$76 sps:$4 sm:$0xff]  }
 0x23b   :  { %v6411_v27 = vpack.c.bf16 %v7442_v24, %v7440_v21 }
 0x23d   :  { %5665 = vst [vmem:[%s8034_s5 + $0xa0] sm:$0xff] %v6411_v27  ;;  %4628 = vmatpush2.bf16.msra.mxu0 %v7045_v22  ;;  %4679 = vmatpush2.bf16.msra.mxu1 %v7048_v23  ;;  %v7087_v27 = vld [vmem:[#allocation6 + $0x328] ss:$76 sps:$4 sm:$0xff]  }
 0x23e   :  { %4629 = vmatprep.subr.bf16.mxu0 %v7053_v25  ;;  %4680 = vmatprep.subr.bf16.mxu1 %v7056_v26 }
 0x241   :  { %4630 = vmatpush2.bf16.msra.mxu0 %v7051_v28  ;;  %4681 = vmatpush2.bf16.msra.mxu1 %v7054_v29  ;;  %v7090_v28 = vld [vmem:[#allocation6 + $0xca8] ss:$76 sps:$4 sm:$0xff]  }
 0x242   :  { %4631 = vmatprep.subr.bf16.mxu0 %v7059_v30  ;;  %4682 = vmatprep.subr.bf16.mxu1 %v7062_v31  ;;  %v7095_v31 = vld [vmem:[#allocation6 + $0x294] ss:$76 sps:$4 sm:$0xff]  }
 0x245   :  { %4632 = vmatpush2.bf16.msra.mxu0 %v7057_v32  ;;  %4683 = vmatpush2.bf16.msra.mxu1 %v7060_v33  ;;  %v7098_v32 = vld [vmem:[#allocation6 + $0xc14] ss:$76 sps:$4 sm:$0xff]  }
 0x246   :  { %4633 = vmatprep.subr.bf16.mxu0 %v7065_v34  ;;  %4684 = vmatprep.subr.bf16.mxu1 %v7068_v35 }
 0x249   :  { %4634 = vmatpush2.bf16.msra.mxu0 %v7063_v36  ;;  %4685 = vmatpush2.bf16.msra.mxu1 %v7066_v37 }
 0x24a   :  { %4635 = vmatprep.subr.bf16.mxu0 %v7071_v38  ;;  %4686 = vmatprep.subr.bf16.mxu1 %v7074_v39 }
 0x24d   :  { %4636 = vmatpush2.bf16.msra.mxu0 %v7069_v42  ;;  %4687 = vmatpush2.bf16.msra.mxu1 %v7072_v43  ;;  %v4333_v49 = vpop.f32.mrf.mxu0  ;;  %v4384_v50 = vpop.f32.mrf.mxu1  ;;  %v7093_v42 = vld [vmem:[#allocation6 + $0x290] ss:$76 sps:$4 sm:$0xff]  }
 0x24e   :  { %v4334_v51 = vadd.f32 %v4333_v49, %v947_v44  ;;  %4707 = vmatprep.subr.bf16.mxu0 %v7077_v45  ;;  %4758 = vmatprep.subr.bf16.mxu1 %v7080_v46  ;;  %v7096_v43 = vld [vmem:[#allocation6 + $0xc10] ss:$76 sps:$4 sm:$0xff]  }
 0x24f   :  { %v4335_v55 = vpop.f32.mrf.mxu0  ;;  %v4386_v54 = vpop.f32.mrf.mxu1  ;;  %v7101_v46 = vld [vmem:[#allocation6 + $0x1fc] ss:$76 sps:$4 sm:$0xff]  }
 0x250   :  { %v4385_v60 = vadd.f32 %v4384_v50, %v4334_v51  ;;  %4638 = vmatmul.mubr.bf16.vlgmr.msra.gmra.mxu0 %v7793_v62  ;;  %4689 = vmatmul.mubr.bf16.vlgmr.msra.gmra.mxu1 %v7795_v63  ;;  %v4336_v61 = vadd.f32 %v4335_v55, %v951_v47  ;;  %v7104_v49 = vld [vmem:[#allocation6 + $0xb7c] ss:$76 sps:$4 sm:$0xff]   ;;  %v7099_v50 = vld [vmem:[#allocation6 + $0x1f8] ss:$76 sps:$4 sm:$0xff]  }
 0x251   :  { %4647 = vmatprep.mubr.bf16.mxu0 %v7801_v12  ;;  %4698 = vmatprep.mubr.bf16.mxu1 %v7803_v13  ;;  %v4337_v48 = vpop.f32.mrf.mxu0  ;;  %v4388_v0 = vpop.f32.mrf.mxu1  ;;  %v7102_v51 = vld [vmem:[#allocation6 + $0xb78] ss:$76 sps:$4 sm:$0xff]  }
 0x252   :  { %v6307_v1 = vmul.f32 -1.442695, %v4385_v60  ;;  %4708 = vmatpush1.bf16.msra.mxu0 %v7075_v52  ;;  %4759 = vmatpush1.bf16.msra.mxu1 %v7078_v53  ;;  %v4387_v2 = vadd.f32 %v4386_v54, %v4336_v61  ;;  %v4338_v3 = vadd.f32 %v4337_v48, %v947_v44  ;;  %v7107_v52 = vld [vmem:[#allocation6 + $0x164] ss:$76 sps:$4 sm:$0xff]   ;;  %v7113_v61 = vld [vmem:[#allocation6 + $0xcc] ss:$76 sps:$4 sm:$0xff]  }
 0x253   :  { %4709 = vmatprep.subr.bf16.mxu0 %v7083_v56  ;;  %4760 = vmatprep.subr.bf16.mxu1 %v7086_v57  ;;  %v4339_v6 = vpop.f32.mrf.mxu0  ;;  %v4390_v7 = vpop.f32.mrf.mxu1  ;;  %v7110_v53 = vld [vmem:[#allocation6 + $0xae4] ss:$76 sps:$4 sm:$0xff]   ;;  %v7105_v56 = vld [vmem:[#allocation6 + $0x160] ss:$76 sps:$4 sm:$0xff]  }
 0x254   :  { %7443 = vpow2.f32 %v6307_v1  ;;  %v6308_v10 = vmul.f32 -1.442695, %v4387_v2  ;;  %v4389_v11 = vadd.f32 %v4388_v0, %v4338_v3  ;;  %v4340_v21 = vadd.f32 %v4339_v6, %v951_v47  ;;  %v7108_v57 = vld [vmem:[#allocation6 + $0xae0] ss:$76 sps:$4 sm:$0xff]   ;;  %v7111_v3 = vld [vmem:[#allocation6 + $0xc8] ss:$76 sps:$4 sm:$0xff]  }
 0x255   :  { %v4343_v22 = vpop.f32.mrf.mxu0  ;;  %v4394_v23 = vpop.f32.mrf.mxu1  ;;  %v7116_v48 = vld [vmem:[#allocation6 + $0xa4c] ss:$76 sps:$4 sm:$0xff]   ;;  %v7119_v6 = vld [vmem:[#allocation6 + $0x34] ss:$76 sps:$4 sm:$0xff]  }
 0x256   :  { %7445 = vpow2.f32 %v6308_v10  ;;  %v6326_v24 = vmul.f32 -1.442695, %v4389_v11  ;;  %4710 = vmatpush1.bf16.msra.mxu0 %v7081_v4  ;;  %4761 = vmatpush1.bf16.msra.mxu1 %v7084_v5  ;;  %v4391_v25 = vadd.f32 %v4390_v7, %v4340_v21  ;;  %v4344_v26 = vadd.f32 %v4343_v22, %v947_v44  ;;  %v7114_v4 = vld [vmem:[#allocation6 + $0xa48] ss:$76 sps:$4 sm:$0xff]   ;;  %v7117_v11 = vld [vmem:[#allocation6 + $0x30] ss:$76 sps:$4 sm:$0xff]  }
 0x257   :  { %4711 = vmatprep.subr.bf16.mxu0 %v7089_v8  ;;  %4762 = vmatprep.subr.bf16.mxu1 %v7092_v9  ;;  %v4345_v29 = vpop.f32.mrf.mxu0  ;;  %v4396_v30 = vpop.f32.mrf.mxu1  ;;  %v7122_v7 = vld [vmem:[#allocation6 + $0x9b4] ss:$76 sps:$4 sm:$0xff]   ;;  %v7120_v21 = vld [vmem:[#allocation6 + $0x9b0] ss:$76 sps:$4 sm:$0xff]  }
 0x258   :  { %7447 = vpow2.f32 %v6326_v24  ;;  %v6327_v33 = vmul.f32 -1.442695, %v4391_v25  ;;  %v4395_v34 = vadd.f32 %v4394_v23, %v4344_v26  ;;  %4648 = vmatmul.mubr.bf16.gmra.mxu0 %v7807_v15  ;;  %4699 = vmatmul.mubr.bf16.gmra.mxu1 %v7809_v20  ;;  %v4346_v35 = vadd.f32 %v4345_v29, %v951_v47  ;;  %v7125_v23 = vld [vmem:[#allocation6 + $0x91c] ss:$76 sps:$4 sm:$0xff]   ;;  %v7123_v26 = vld [vmem:[#allocation6 + $0x918] ss:$76 sps:$4 sm:$0xff]  }
 0x259   :  { %4739 = vmatprep.mubr.bf16.mxu0 %v7789_v58  ;;  %4790 = vmatprep.mubr.bf16.mxu1 %v7791_v59  ;;  %v4347_v36 = vpop.f32.mrf.mxu0  ;;  %v4398_v37 = vpop.f32.mrf.mxu1  ;;  %v7128_v24 = vld [vmem:[#allocation6 + $0x129c] ss:$76 sps:$4 sm:$0xff]   ;;  %v7134_v29 = vld [vmem:[#allocation6 + $0x1204] ss:$76 sps:$4 sm:$0xff]  }
 0x25a   :  { %7449 = vpow2.f32 %v6327_v33  ;;  %v6345_v38 = vmul.f32 -1.442695, %v4395_v34  ;;  %4712 = vmatpush1.bf16.msra.mxu0 %v7087_v27  ;;  %4763 = vmatpush1.bf16.msra.mxu1 %v7090_v28  ;;  %v4397_v39 = vadd.f32 %v4396_v30, %v4346_v35  ;;  %v7126_v27 = vld [vmem:[#allocation6 + $0x1298] ss:$76 sps:$4 sm:$0xff]  }
 0x25b   :  { %4713 = vmatprep.subr.bf16.mxu0 %v7095_v31  ;;  %4764 = vmatprep.subr.bf16.mxu1 %v7098_v32  ;;  %v4348_v44 = vpop.f32.mrf.mxu0  ;;  %v4399_v45 = vpop.f32.mrf.mxu1  ;;  %v7131_v28 = vld [vmem:[#allocation6 + $0x884] ss:$76 sps:$4 sm:$0xff]   ;;  %v7129_v31 = vld [vmem:[#allocation6 + $0x880] ss:$76 sps:$4 sm:$0xff]  }
 0x25c   :  { %7451 = vpow2.f32 %v6345_v38  ;;  %v6346_v47 = vmul.f32 -1.442695, %v4397_v39  ;;  %v7132_v32 = vld [vmem:[#allocation6 + $0x1200] ss:$76 sps:$4 sm:$0xff]   ;;  %v7135_v38 = vld [vmem:[#allocation6 + $0x7e8] ss:$76 sps:$4 sm:$0xff]  }
 0x25d   :  { %v7137_v34 = vld [vmem:[#allocation6 + $0x7ec] ss:$76 sps:$4 sm:$0xff]   ;;  %v7138_v39 = vld [vmem:[#allocation6 + $0x1168] ss:$76 sps:$4 sm:$0xff]  }
 0x25e   :  { %7453 = vpow2.f32 %v6346_v47  ;;  %4714 = vmatpush1.bf16.msra.mxu0 %v7093_v42  ;;  %4765 = vmatpush1.bf16.msra.mxu1 %v7096_v43  ;;  %v7140_v35 = vld [vmem:[#allocation6 + $0x116c] ss:$76 sps:$4 sm:$0xff]   ;;  %v7143_v43 = vld [vmem:[#allocation6 + $0x754] ss:$76 sps:$4 sm:$0xff]   ;;  %v7144_v47 = vld [vmem:[#allocation6 + $0x10d0] ss:$76 sps:$4 sm:$0xff]  }
 0x25f   :  { %4715 = vmatprep.subr.bf16.mxu0 %v7101_v46  ;;  %4766 = vmatprep.subr.bf16.mxu1 %v7104_v49  ;;  %v7146_v44 = vld [vmem:[#allocation6 + $0x10d4] ss:$76 sps:$4 sm:$0xff]   ;;  %v7141_v49 = vld [vmem:[#allocation6 + $0x750] ss:$76 sps:$4 sm:$0xff]  }
 0x261   :  { %v7444_v55 = vpop.eup %7443 }
 0x262   :  { %v5284_v54 = vadd.f32 1.0, %v7444_v55  ;;  %4716 = vmatpush1.bf16.msra.mxu0 %v7099_v50  ;;  %4767 = vmatpush1.bf16.msra.mxu1 %v7102_v51  ;;  %v7149_v51 = vld [vmem:[#allocation6 + $0x6bc] ss:$76 sps:$4 sm:$0xff]   ;;  %v7147_v55 = vld [vmem:[#allocation6 + $0x6b8] ss:$76 sps:$4 sm:$0xff]  }
 0x263   :  { %v7446_v60 = vpop.eup %7445  ;;  %4717 = vmatprep.subr.bf16.mxu0 %v7107_v52  ;;  %4768 = vmatprep.subr.bf16.mxu1 %v7110_v53  ;;  %v7152_v52 = vld [vmem:[#allocation6 + $0x103c] ss:$76 sps:$4 sm:$0xff]  }
 0x264   :  { %v5285_v0 = vadd.f32 1.0, %v7446_v60  ;;  %7455 = vrcp.f32 %v5284_v54  ;;  %v7150_v54 = vld [vmem:[#allocation6 + $0x1038] ss:$76 sps:$4 sm:$0xff]   ;;  %v7153_v60 = vld [vmem:[#allocation6 + $0x620] ss:$76 sps:$4 sm:$0xff]  }
 0x265   :  { %v7448_v1 = vpop.eup %7447 }
 0x266   :  { %7457 = vrcp.f32 %v5285_v0  ;;  %v5303_v2 = vadd.f32 1.0, %v7448_v1  ;;  %4718 = vmatpush1.bf16.msra.mxu0 %v7105_v56  ;;  %4769 = vmatpush1.bf16.msra.mxu1 %v7108_v57  ;;  %v7155_v56 = vld [vmem:[#allocation6 + $0x624] ss:$76 sps:$4 sm:$0xff]   ;;  %v7164_v0 = vld [vmem:[#allocation6 + $0xf0c] ss:$76 sps:$4 sm:$0xff]  }
 0x267   :  { %v7450_v5 = vpop.eup %7449  ;;  %4719 = vmatprep.subr.bf16.mxu0 %v7113_v61  ;;  %4770 = vmatprep.subr.bf16.mxu1 %v7116_v48  ;;  %v7158_v57 = vld [vmem:[#allocation6 + $0xfa4] ss:$76 sps:$4 sm:$0xff]   ;;  %v7156_v61 = vld [vmem:[#allocation6 + $0xfa0] ss:$76 sps:$4 sm:$0xff]   ;;  %v7159_v1 = vld [vmem:[#allocation6 + $0x588] ss:$76 sps:$4 sm:$0xff]  }
 0x268   :  { %v5304_v8 = vadd.f32 1.0, %v7450_v5  ;;  %7459 = vrcp.f32 %v5303_v2  ;;  %v7161_v48 = vld [vmem:[#allocation6 + $0x58c] ss:$76 sps:$4 sm:$0xff]   ;;  %v7162_v2 = vld [vmem:[#allocation6 + $0xf08] ss:$76 sps:$4 sm:$0xff]   ;;  %v954_v5 = vsub.s32 6, %v7771_v14 }
 0x269   :  { %v7452_v9 = vpop.eup %7451 }
 0x26a   :  { %7461 = vrcp.f32 %v5304_v8  ;;  %v5322_v10 = vadd.f32 1.0, %v7452_v9  ;;  %4720 = vmatpush1.bf16.msra.mxu0 %v7111_v3  ;;  %4771 = vmatpush1.bf16.msra.mxu1 %v7114_v4  ;;  %v7167_v3 = vld [vmem:[#allocation6 + $0x4f4] ss:$76 sps:$4 sm:$0xff]   ;;  %v7168_v8 = vld [vmem:[#allocation6 + $0xe70] ss:$76 sps:$4 sm:$0xff]  }
 0x26b   :  { %v7454_v22 = vpop.eup %7453  ;;  %4721 = vmatprep.subr.bf16.mxu0 %v7119_v6  ;;  %4772 = vmatprep.subr.bf16.mxu1 %v7122_v7  ;;  %v7170_v4 = vld [vmem:[#allocation6 + $0xe74] ss:$76 sps:$4 sm:$0xff]   ;;  %v958_v6 = vsub.s32 7, %v7771_v14  ;;  %v7165_v7 = vld [vmem:[#allocation6 + $0x4f0] ss:$76 sps:$4 sm:$0xff]  }
 0x26c   :  { %v5323_v25 = vadd.f32 1.0, %v7454_v22  ;;  %7463 = vrcp.f32 %v5322_v10  ;;  %v7623_v9 = vld [vmem:[#allocation7] sm:$0xff] }
 0x26d   :  { %v955_v10 = vrot.slane %v7623_v9, %v954_v5  ;;  %v959_v22 = vrot.slane %v7623_v9, %v958_v6 }
 0x26e   :  { %7465 = vrcp.f32 %v5323_v25  ;;  %4722 = vmatpush1.bf16.msra.mxu0 %v7117_v11  ;;  %4773 = vmatpush1.bf16.msra.mxu1 %v7120_v21  ;;  %v7173_v11 = vld [vmem:[#allocation6 + $0x464] ss:$76 sps:$4 sm:$0xff]  }
 0x26f   :  { %4723 = vmatprep.subr.bf16.mxu0 %v7125_v23  ;;  %4774 = vmatprep.subr.bf16.mxu1 %v7128_v24  ;;  %v7176_v21 = vld [vmem:[#allocation6 + $0xde4] ss:$76 sps:$4 sm:$0xff]  }
 0x271   :  { %v7456_v30 = vpop.eup %7455 }
 0x272   :  { %4724 = vmatpush2.bf16.msra.mxu0 %v7123_v26  ;;  %4775 = vmatpush2.bf16.msra.mxu1 %v7126_v27  ;;  %v7171_v26 = vld [vmem:[#allocation6 + $0x460] ss:$76 sps:$4 sm:$0xff]  }
 0x273   :  { %v7458_v33 = vpop.eup %7457  ;;  %4725 = vmatprep.subr.bf16.mxu0 %v7131_v28  ;;  %4776 = vmatprep.subr.bf16.mxu1 %v7134_v29  ;;  %v7174_v27 = vld [vmem:[#allocation6 + $0xde0] ss:$76 sps:$4 sm:$0xff]  }
 0x274   :  { %v6392_v36 = vpack.c.bf16 %v7458_v33, %v7456_v30  ;;  %v7179_v30 = vld [vmem:[#allocation6 + $0x3cc] ss:$76 sps:$4 sm:$0xff]  }
 0x275   :  { %v7460_v37 = vpop.eup %7459 }
 0x276   :  { %5646 = vst [vmem:[%s8034_s5 + $0x10] sm:$0xff] %v6392_v36  ;;  %4726 = vmatpush2.bf16.msra.mxu0 %v7129_v31  ;;  %4777 = vmatpush2.bf16.msra.mxu1 %v7132_v32  ;;  %v7182_v31 = vld [vmem:[#allocation6 + $0xd4c] ss:$76 sps:$4 sm:$0xff]  }
 0x277   :  { %v7462_v42 = vpop.eup %7461  ;;  %4727 = vmatprep.subr.bf16.mxu0 %v7137_v34  ;;  %4778 = vmatprep.subr.bf16.mxu1 %v7140_v35 }
 0x278   :  { %v6402_v45 = vpack.c.bf16 %v7462_v42, %v7460_v37  ;;  %v7180_v42 = vld [vmem:[#allocation6 + $0xd48] ss:$76 sps:$4 sm:$0xff]  }
 0x279   :  { %v7464_v46 = vpop.eup %7463 }
 0x27a   :  { %5656 = vst [vmem:[%s8034_s5 + $0x5c] sm:$0xff] %v6402_v45  ;;  %4728 = vmatpush2.bf16.msra.mxu0 %v7135_v38  ;;  %4779 = vmatpush2.bf16.msra.mxu1 %v7138_v39  ;;  %v7177_v39 = vld [vmem:[#allocation6 + $0x3c8] ss:$76 sps:$4 sm:$0xff]  }
 0x27b   :  { %v7466_v50 = vpop.eup %7465  ;;  %4729 = vmatprep.subr.bf16.mxu0 %v7143_v43  ;;  %4780 = vmatprep.subr.bf16.mxu1 %v7146_v44  ;;  %v7185_v45 = vld [vmem:[#allocation6 + $0x334] ss:$76 sps:$4 sm:$0xff]  }
 0x27c   :  { %v6412_v53 = vpack.c.bf16 %v7466_v50, %v7464_v46  ;;  %v7188_v46 = vld [vmem:[#allocation6 + $0xcb4] ss:$76 sps:$4 sm:$0xff]  }
 0x27e   :  { %5666 = vst [vmem:[%s8034_s5 + $0xa8] sm:$0xff] %v6412_v53  ;;  %4730 = vmatpush2.bf16.msra.mxu0 %v7141_v49  ;;  %4781 = vmatpush2.bf16.msra.mxu1 %v7144_v47 }
 0x27f   :  { %4731 = vmatprep.subr.bf16.mxu0 %v7149_v51  ;;  %4782 = vmatprep.subr.bf16.mxu1 %v7152_v52 }
 0x282   :  { %4732 = vmatpush2.bf16.msra.mxu0 %v7147_v55  ;;  %4783 = vmatpush2.bf16.msra.mxu1 %v7150_v54 }
 0x283   :  { %4733 = vmatprep.subr.bf16.mxu0 %v7155_v56  ;;  %4784 = vmatprep.subr.bf16.mxu1 %v7158_v57  ;;  %v7183_v56 = vld [vmem:[#allocation6 + $0x330] ss:$76 sps:$4 sm:$0xff]  }
 0x284   :  { %v7186_v57 = vld [vmem:[#allocation6 + $0xcb0] ss:$76 sps:$4 sm:$0xff]  }
 0x286   :  { %4734 = vmatpush2.bf16.msra.mxu0 %v7153_v60  ;;  %4785 = vmatpush2.bf16.msra.mxu1 %v7156_v61 }
 0x287   :  { %4735 = vmatprep.subr.bf16.mxu0 %v7161_v48  ;;  %4786 = vmatprep.subr.bf16.mxu1 %v7164_v0  ;;  %v7191_v48 = vld [vmem:[#allocation6 + $0x29c] ss:$76 sps:$4 sm:$0xff]  }
 0x288   :  { %v7194_v0 = vld [vmem:[#allocation6 + $0xc1c] ss:$76 sps:$4 sm:$0xff]  }
 0x28a   :  { %4736 = vmatpush2.bf16.msra.mxu0 %v7159_v1  ;;  %4787 = vmatpush2.bf16.msra.mxu1 %v7162_v2 }
 0x28b   :  { %4737 = vmatprep.subr.bf16.mxu0 %v7167_v3  ;;  %4788 = vmatprep.subr.bf16.mxu1 %v7170_v4 }
 0x28e   :  { %4738 = vmatpush2.bf16.msra.mxu0 %v7165_v7  ;;  %4789 = vmatpush2.bf16.msra.mxu1 %v7168_v8  ;;  %v4435_v23 = vpop.f32.mrf.mxu0  ;;  %v4486_v24 = vpop.f32.mrf.mxu1 }
 0x28f   :  { %v4436_v25 = vadd.f32 %v4435_v23, %v955_v10  ;;  %4809 = vmatprep.subr.bf16.mxu0 %v7173_v11  ;;  %4860 = vmatprep.subr.bf16.mxu1 %v7176_v21  ;;  %v7192_v11 = vld [vmem:[#allocation6 + $0xc18] ss:$76 sps:$4 sm:$0xff]  }
 0x290   :  { %v4437_v28 = vpop.f32.mrf.mxu0  ;;  %v4488_v29 = vpop.f32.mrf.mxu1 }
 0x291   :  { %v4487_v32 = vadd.f32 %v4486_v24, %v4436_v25  ;;  %4740 = vmatmul.mubr.bf16.vlgmr.msra.gmra.mxu0 %v7793_v62  ;;  %4791 = vmatmul.mubr.bf16.vlgmr.msra.gmra.mxu1 %v7795_v63  ;;  %v4438_v33 = vadd.f32 %v4437_v28, %v959_v22  ;;  %v7197_v24 = vld [vmem:[#allocation6 + $0x204] ss:$76 sps:$4 sm:$0xff]   ;;  %v7203_v28 = vld [vmem:[#allocation6 + $0x16c] ss:$76 sps:$4 sm:$0xff]  }
 0x292   :  { %4749 = vmatprep.mubr.bf16.mxu0 %v7801_v12  ;;  %4800 = vmatprep.mubr.bf16.mxu1 %v7803_v13  ;;  %v4439_v34 = vpop.f32.mrf.mxu0  ;;  %v4490_v35 = vpop.f32.mrf.mxu1  ;;  %v7200_v25 = vld [vmem:[#allocation6 + $0xb84] ss:$76 sps:$4 sm:$0xff]  }
 0x293   :  { %v6309_v36 = vmul.f32 -1.442695, %v4487_v32  ;;  %4810 = vmatpush1.bf16.msra.mxu0 %v7171_v26  ;;  %4861 = vmatpush1.bf16.msra.mxu1 %v7174_v27  ;;  %v4489_v37 = vadd.f32 %v4488_v29, %v4438_v33  ;;  %v4440_v38 = vadd.f32 %v4439_v34, %v955_v10  ;;  %v7195_v26 = vld [vmem:[#allocation6 + $0x200] ss:$76 sps:$4 sm:$0xff]   ;;  %v7201_v32 = vld [vmem:[#allocation6 + $0x168] ss:$76 sps:$4 sm:$0xff]  }
 0x294   :  { %4811 = vmatprep.subr.bf16.mxu0 %v7179_v30  ;;  %4862 = vmatprep.subr.bf16.mxu1 %v7182_v31  ;;  %v4441_v43 = vpop.f32.mrf.mxu0  ;;  %v4492_v44 = vpop.f32.mrf.mxu1  ;;  %v7198_v27 = vld [vmem:[#allocation6 + $0xb80] ss:$76 sps:$4 sm:$0xff]   ;;  %v7204_v33 = vld [vmem:[#allocation6 + $0xae8] ss:$76 sps:$4 sm:$0xff]  }
 0x295   :  { %7467 = vpow2.f32 %v6309_v36  ;;  %v6310_v49 = vmul.f32 -1.442695, %v4489_v37  ;;  %v4491_v47 = vadd.f32 %v4490_v35, %v4440_v38  ;;  %v4442_v50 = vadd.f32 %v4441_v43, %v959_v22  ;;  %v7206_v29 = vld [vmem:[#allocation6 + $0xaec] ss:$76 sps:$4 sm:$0xff]   ;;  %v7209_v35 = vld [vmem:[#allocation6 + $0xd4] ss:$76 sps:$4 sm:$0xff]  }
 0x296   :  { %v4445_v51 = vpop.f32.mrf.mxu0  ;;  %v4496_v52 = vpop.f32.mrf.mxu1  ;;  %v7212_v36 = vld [vmem:[#allocation6 + $0xa54] ss:$76 sps:$4 sm:$0xff]   ;;  %v7210_v43 = vld [vmem:[#allocation6 + $0xa50] ss:$76 sps:$4 sm:$0xff]  }
 0x297   :  { %7469 = vpow2.f32 %v6310_v49  ;;  %v6328_v53 = vmul.f32 -1.442695, %v4491_v47  ;;  %4812 = vmatpush1.bf16.msra.mxu0 %v7177_v39  ;;  %4863 = vmatpush1.bf16.msra.mxu1 %v7180_v42  ;;  %v4493_v55 = vadd.f32 %v4492_v44, %v4442_v50  ;;  %v4446_v54 = vadd.f32 %v4445_v51, %v955_v10  ;;  %v7189_v10 = vld [vmem:[#allocation6 + $0x298] ss:$76 sps:$4 sm:$0xff]   ;;  %v7207_v42 = vld [vmem:[#allocation6 + $0xd0] ss:$76 sps:$4 sm:$0xff]  }
 0x298   :  { %4813 = vmatprep.subr.bf16.mxu0 %v7185_v45  ;;  %4864 = vmatprep.subr.bf16.mxu1 %v7188_v46  ;;  %v4447_v60 = vpop.f32.mrf.mxu0  ;;  %v4498_v61 = vpop.f32.mrf.mxu1  ;;  %v7215_v45 = vld [vmem:[#allocation6 + $0x3c] ss:$76 sps:$4 sm:$0xff]   ;;  %v7213_v51 = vld [vmem:[#allocation6 + $0x38] ss:$76 sps:$4 sm:$0xff]  }
 0x299   :  { %7471 = vpow2.f32 %v6328_v53  ;;  %v6329_v1 = vmul.f32 -1.442695, %v4493_v55  ;;  %v4497_v2 = vadd.f32 %v4496_v52, %v4446_v54  ;;  %4750 = vmatmul.mubr.bf16.gmra.mxu0 %v7807_v15  ;;  %4801 = vmatmul.mubr.bf16.gmra.mxu1 %v7809_v20  ;;  %v4448_v3 = vadd.f32 %v4447_v60, %v959_v22  ;;  %v7218_v46 = vld [vmem:[#allocation6 + $0x9bc] ss:$76 sps:$4 sm:$0xff]   ;;  %v7216_v52 = vld [vmem:[#allocation6 + $0x9b8] ss:$76 sps:$4 sm:$0xff]  }
 0x29a   :  { %4841 = vmatprep.mubr.bf16.mxu0 %v7789_v58  ;;  %4892 = vmatprep.mubr.bf16.mxu1 %v7791_v59  ;;  %v4449_v4 = vpop.f32.mrf.mxu0  ;;  %v4500_v7 = vpop.f32.mrf.mxu1  ;;  %v7221_v55 = vld [vmem:[#allocation6 + $0x924] ss:$76 sps:$4 sm:$0xff]   ;;  %v7222_v60 = vld [vmem:[#allocation6 + $0x12a0] ss:$76 sps:$4 sm:$0xff]  }
 0x29b   :  { %7473 = vpow2.f32 %v6329_v1  ;;  %v6347_v8 = vmul.f32 -1.442695, %v4497_v2  ;;  %4814 = vmatpush1.bf16.msra.mxu0 %v7183_v56  ;;  %4865 = vmatpush1.bf16.msra.mxu1 %v7186_v57  ;;  %v4499_v9 = vadd.f32 %v4498_v61, %v4448_v3  ;;  %v7224_v54 = vld [vmem:[#allocation6 + $0x12a4] ss:$76 sps:$4 sm:$0xff]   ;;  %v7219_v57 = vld [vmem:[#allocation6 + $0x920] ss:$76 sps:$4 sm:$0xff]  }
 0x29c   :  { %4815 = vmatprep.subr.bf16.mxu0 %v7191_v48  ;;  %4866 = vmatprep.subr.bf16.mxu1 %v7194_v0  ;;  %v4450_v21 = vpop.f32.mrf.mxu0  ;;  %v4501_v23 = vpop.f32.mrf.mxu1  ;;  %v7227_v61 = vld [vmem:[#allocation6 + $0x88c] ss:$76 sps:$4 sm:$0xff]   ;;  %v7225_v1 = vld [vmem:[#allocation6 + $0x888] ss:$76 sps:$4 sm:$0xff]  }
 0x29d   :  { %7475 = vpow2.f32 %v6347_v8  ;;  %v6348_v22 = vmul.f32 -1.442695, %v4499_v9  ;;  %v7230_v48 = vld [vmem:[#allocation6 + $0x120c] ss:$76 sps:$4 sm:$0xff]   ;;  %v7228_v2 = vld [vmem:[#allocation6 + $0x1208] ss:$76 sps:$4 sm:$0xff]  }
 0x29e   :  { %v7233_v4 = vld [vmem:[#allocation6 + $0x7f4] ss:$76 sps:$4 sm:$0xff]   ;;  %v7239_v23 = vld [vmem:[#allocation6 + $0x75c] ss:$76 sps:$4 sm:$0xff]  }
 0x29f   :  { %7477 = vpow2.f32 %v6348_v22  ;;  %4816 = vmatpush1.bf16.msra.mxu0 %v7189_v10  ;;  %4867 = vmatpush1.bf16.msra.mxu1 %v7192_v11  ;;  %v7236_v7 = vld [vmem:[#allocation6 + $0x1174] ss:$76 sps:$4 sm:$0xff]   ;;  %v7231_v10 = vld [vmem:[#allocation6 + $0x7f0] ss:$76 sps:$4 sm:$0xff]  }
 0x2a0   :  { %4817 = vmatprep.subr.bf16.mxu0 %v7197_v24  ;;  %4868 = vmatprep.subr.bf16.mxu1 %v7200_v25  ;;  %v7234_v11 = vld [vmem:[#allocation6 + $0x1170] ss:$76 sps:$4 sm:$0xff]  }
 0x2a1   :  { %v7242_v24 = vld [vmem:[#allocation6 + $0x10dc] ss:$76 sps:$4 sm:$0xff]  }
 0x2a2   :  { %v7468_v30 = vpop.eup %7467 }
 0x2a3   :  { %v5286_v31 = vadd.f32 1.0, %v7468_v30  ;;  %4818 = vmatpush1.bf16.msra.mxu0 %v7195_v26  ;;  %4869 = vmatpush1.bf16.msra.mxu1 %v7198_v27  ;;  %v7237_v26 = vld [vmem:[#allocation6 + $0x758] ss:$76 sps:$4 sm:$0xff]  }
 0x2a4   :  { %v7470_v34 = vpop.eup %7469  ;;  %4819 = vmatprep.subr.bf16.mxu0 %v7203_v28  ;;  %4870 = vmatprep.subr.bf16.mxu1 %v7206_v29  ;;  %v7240_v27 = vld [vmem:[#allocation6 + $0x10d8] ss:$76 sps:$4 sm:$0xff]  }
 0x2a5   :  { %v5287_v37 = vadd.f32 1.0, %v7470_v34  ;;  %7479 = vrcp.f32 %v5286_v31  ;;  %v7245_v29 = vld [vmem:[#allocation6 + $0x6c4] ss:$76 sps:$4 sm:$0xff]   ;;  %v7251_v34 = vld [vmem:[#allocation6 + $0x62c] ss:$76 sps:$4 sm:$0xff]  }
 0x2a6   :  { %v7472_v38 = vpop.eup %7471  ;;  %v7248_v30 = vld [vmem:[#allocation6 + $0x1044] ss:$76 sps:$4 sm:$0xff]  }
 0x2a7   :  { %7481 = vrcp.f32 %v5287_v37  ;;  %v5305_v39 = vadd.f32 1.0, %v7472_v38  ;;  %4820 = vmatpush1.bf16.msra.mxu0 %v7201_v32  ;;  %4871 = vmatpush1.bf16.msra.mxu1 %v7204_v33  ;;  %v7243_v32 = vld [vmem:[#allocation6 + $0x6c0] ss:$76 sps:$4 sm:$0xff]   ;;  %v7252_v37 = vld [vmem:[#allocation6 + $0xfa8] ss:$76 sps:$4 sm:$0xff]  }
 0x2a8   :  { %v7474_v44 = vpop.eup %7473  ;;  %4821 = vmatprep.subr.bf16.mxu0 %v7209_v35  ;;  %4872 = vmatprep.subr.bf16.mxu1 %v7212_v36  ;;  %v7246_v33 = vld [vmem:[#allocation6 + $0x1040] ss:$76 sps:$4 sm:$0xff]   ;;  %v7249_v36 = vld [vmem:[#allocation6 + $0x628] ss:$76 sps:$4 sm:$0xff]  }
 0x2a9   :  { %v5306_v49 = vadd.f32 1.0, %v7474_v44  ;;  %7483 = vrcp.f32 %v5305_v39  ;;  %v7254_v35 = vld [vmem:[#allocation6 + $0xfac] ss:$76 sps:$4 sm:$0xff]   ;;  %v7257_v38 = vld [vmem:[#allocation6 + $0x594] ss:$76 sps:$4 sm:$0xff]  }
 0x2aa   :  { %v7476_v47 = vpop.eup %7475  ;;  %v7260_v39 = vld [vmem:[#allocation6 + $0xf14] ss:$76 sps:$4 sm:$0xff]   ;;  %v7263_v44 = vld [vmem:[#allocation6 + $0x4fc] ss:$76 sps:$4 sm:$0xff]  }
 0x2ab   :  { %7485 = vrcp.f32 %v5306_v49  ;;  %v5324_v50 = vadd.f32 1.0, %v7476_v47  ;;  %4822 = vmatpush1.bf16.msra.mxu0 %v7207_v42  ;;  %4873 = vmatpush1.bf16.msra.mxu1 %v7210_v43  ;;  %v7255_v42 = vld [vmem:[#allocation6 + $0x590] ss:$76 sps:$4 sm:$0xff]   ;;  %v7261_v49 = vld [vmem:[#allocation6 + $0x4f8] ss:$76 sps:$4 sm:$0xff]  }
 0x2ac   :  { %v7478_v53 = vpop.eup %7477  ;;  %4823 = vmatprep.subr.bf16.mxu0 %v7215_v45  ;;  %4874 = vmatprep.subr.bf16.mxu1 %v7218_v46  ;;  %v7258_v43 = vld [vmem:[#allocation6 + $0xf10] ss:$76 sps:$4 sm:$0xff]   ;;  %v7923_v46 = vld [vmem:[#allocation7 + $0x8] sm:$0xff]  ;;  %v7264_v47 = vld [vmem:[#allocation6 + $0xe78] ss:$76 sps:$4 sm:$0xff]  }
 0x2ad   :  { %v5325_v56 = vadd.f32 1.0, %v7478_v53  ;;  %7487 = vrcp.f32 %v5324_v50  ;;  %v7266_v45 = vld [vmem:[#allocation6 + $0xe7c] ss:$76 sps:$4 sm:$0xff]   ;;  %v963_v50 = vrot.slane %v7923_v46, %v7780_v18  ;;  %v967_v53 = vrot.slane %v7923_v46, %v7774_v16 }
 0x2af   :  { %7489 = vrcp.f32 %v5325_v56  ;;  %4824 = vmatpush1.bf16.msra.mxu0 %v7213_v51  ;;  %4875 = vmatpush1.bf16.msra.mxu1 %v7216_v52  ;;  %v7269_v51 = vld [vmem:[#allocation6 + $0x46c] ss:$76 sps:$4 sm:$0xff]  }
 0x2b0   :  { %4825 = vmatprep.subr.bf16.mxu0 %v7221_v55  ;;  %4876 = vmatprep.subr.bf16.mxu1 %v7224_v54  ;;  %v7272_v52 = vld [vmem:[#allocation6 + $0xdec] ss:$76 sps:$4 sm:$0xff]  }
 0x2b2   :  { %v7480_v0 = vpop.eup %7479 }
 0x2b3   :  { %4826 = vmatpush2.bf16.msra.mxu0 %v7219_v57  ;;  %4877 = vmatpush2.bf16.msra.mxu1 %v7222_v60  ;;  %v7267_v57 = vld [vmem:[#allocation6 + $0x468] ss:$76 sps:$4 sm:$0xff]  }
 0x2b4   :  { %v7482_v3 = vpop.eup %7481  ;;  %4827 = vmatprep.subr.bf16.mxu0 %v7227_v61  ;;  %4878 = vmatprep.subr.bf16.mxu1 %v7230_v48  ;;  %v7270_v60 = vld [vmem:[#allocation6 + $0xde8] ss:$76 sps:$4 sm:$0xff]  }
 0x2b5   :  { %v6393_v8 = vpack.c.bf16 %v7482_v3, %v7480_v0  ;;  %v7275_v0 = vld [vmem:[#allocation6 + $0x3d4] ss:$76 sps:$4 sm:$0xff]  }
 0x2b6   :  { %v7484_v9 = vpop.eup %7483 }
 0x2b7   :  { %5647 = vst [vmem:[%s8034_s5 + $0x18] sm:$0xff] %v6393_v8  ;;  %4828 = vmatpush2.bf16.msra.mxu0 %v7225_v1  ;;  %4879 = vmatpush2.bf16.msra.mxu1 %v7228_v2  ;;  %v7278_v1 = vld [vmem:[#allocation6 + $0xd54] ss:$76 sps:$4 sm:$0xff]  }
 0x2b8   :  { %v7486_v21 = vpop.eup %7485  ;;  %4829 = vmatprep.subr.bf16.mxu0 %v7233_v4  ;;  %4880 = vmatprep.subr.bf16.mxu1 %v7236_v7 }
 0x2b9   :  { %v6403_v25 = vpack.c.bf16 %v7486_v21, %v7484_v9  ;;  %v7276_v21 = vld [vmem:[#allocation6 + $0xd50] ss:$76 sps:$4 sm:$0xff]  }
 0x2ba   :  { %v7488_v22 = vpop.eup %7487 }
 0x2bb   :  { %5657 = vst [vmem:[%s8034_s5 + $0x64] sm:$0xff] %v6403_v25  ;;  %4830 = vmatpush2.bf16.msra.mxu0 %v7231_v10  ;;  %4881 = vmatpush2.bf16.msra.mxu1 %v7234_v11  ;;  %v7273_v11 = vld [vmem:[#allocation6 + $0x3d0] ss:$76 sps:$4 sm:$0xff]  }
 0x2bc   :  { %v7490_v28 = vpop.eup %7489  ;;  %4831 = vmatprep.subr.bf16.mxu0 %v7239_v23  ;;  %4882 = vmatprep.subr.bf16.mxu1 %v7242_v24  ;;  %v7281_v25 = vld [vmem:[#allocation6 + $0x33c] ss:$76 sps:$4 sm:$0xff]  }
 0x2bd   :  { %v6413_v31 = vpack.c.bf16 %v7490_v28, %v7488_v22  ;;  %v7284_v22 = vld [vmem:[#allocation6 + $0xcbc] ss:$76 sps:$4 sm:$0xff]  }
 0x2bf   :  { %5667 = vst [vmem:[%s8034_s5 + $0xb0] sm:$0xff] %v6413_v31  ;;  %4832 = vmatpush2.bf16.msra.mxu0 %v7237_v26  ;;  %4883 = vmatpush2.bf16.msra.mxu1 %v7240_v27 }
 0x2c0   :  { %4833 = vmatprep.subr.bf16.mxu0 %v7245_v29  ;;  %4884 = vmatprep.subr.bf16.mxu1 %v7248_v30 }
 0x2c3   :  { %4834 = vmatpush2.bf16.msra.mxu0 %v7243_v32  ;;  %4885 = vmatpush2.bf16.msra.mxu1 %v7246_v33 }
 0x2c4   :  { %4835 = vmatprep.subr.bf16.mxu0 %v7251_v34  ;;  %4886 = vmatprep.subr.bf16.mxu1 %v7254_v35  ;;  %v7279_v34 = vld [vmem:[#allocation6 + $0x338] ss:$76 sps:$4 sm:$0xff]  }
 0x2c5   :  { %v7282_v35 = vld [vmem:[#allocation6 + $0xcb8] ss:$76 sps:$4 sm:$0xff]  }
 0x2c7   :  { %4836 = vmatpush2.bf16.msra.mxu0 %v7249_v36  ;;  %4887 = vmatpush2.bf16.msra.mxu1 %v7252_v37 }
 0x2c8   :  { %4837 = vmatprep.subr.bf16.mxu0 %v7257_v38  ;;  %4888 = vmatprep.subr.bf16.mxu1 %v7260_v39  ;;  %v7287_v38 = vld [vmem:[#allocation6 + $0x2a4] ss:$76 sps:$4 sm:$0xff]  }
 0x2c9   :  { %v7290_v39 = vld [vmem:[#allocation6 + $0xc24] ss:$76 sps:$4 sm:$0xff]  }
 0x2cb   :  { %4838 = vmatpush2.bf16.msra.mxu0 %v7255_v42  ;;  %4889 = vmatpush2.bf16.msra.mxu1 %v7258_v43 }
 0x2cc   :  { %4839 = vmatprep.subr.bf16.mxu0 %v7263_v44  ;;  %4890 = vmatprep.subr.bf16.mxu1 %v7266_v45 }
 0x2cf   :  { %4840 = vmatpush2.bf16.msra.mxu0 %v7261_v49  ;;  %4891 = vmatpush2.bf16.msra.mxu1 %v7264_v47  ;;  %v4537_v55 = vpop.f32.mrf.mxu0  ;;  %v4588_v54 = vpop.f32.mrf.mxu1 }
 0x2d0   :  { %v4538_v56 = vadd.f32 %v4537_v55, %v963_v50  ;;  %4911 = vmatprep.subr.bf16.mxu0 %v7269_v51  ;;  %4962 = vmatprep.subr.bf16.mxu1 %v7272_v52  ;;  %v7285_v51 = vld [vmem:[#allocation6 + $0x2a0] ss:$76 sps:$4 sm:$0xff]  }
 0x2d1   :  { %v4539_v61 = vpop.f32.mrf.mxu0  ;;  %v4590_v48 = vpop.f32.mrf.mxu1  ;;  %v7288_v52 = vld [vmem:[#allocation6 + $0xc20] ss:$76 sps:$4 sm:$0xff]  }
 0x2d2   :  { %v4589_v2 = vadd.f32 %v4588_v54, %v4538_v56  ;;  %4842 = vmatmul.mubr.bf16.vlgmr.msra.gmra.mxu0 %v7793_v62  ;;  %4893 = vmatmul.mubr.bf16.vlgmr.msra.gmra.mxu1 %v7795_v63  ;;  %v4540_v3 = vadd.f32 %v4539_v61, %v967_v53  ;;  %v7293_v56 = vld [vmem:[#allocation6 + $0x20c] ss:$76 sps:$4 sm:$0xff]   ;;  %v7294_v61 = vld [vmem:[#allocation6 + $0xb88] ss:$76 sps:$4 sm:$0xff]  }
 0x2d3   :  { %4851 = vmatprep.mubr.bf16.mxu0 %v7801_v12  ;;  %4902 = vmatprep.mubr.bf16.mxu1 %v7803_v13  ;;  %v4541_v4 = vpop.f32.mrf.mxu0  ;;  %v4592_v7 = vpop.f32.mrf.mxu1 }
 0x2d4   :  { %v6311_v8 = vmul.f32 -1.442695, %v4589_v2  ;;  %4912 = vmatpush1.bf16.msra.mxu0 %v7267_v57  ;;  %4963 = vmatpush1.bf16.msra.mxu1 %v7270_v60  ;;  %v4591_v9 = vadd.f32 %v4590_v48, %v4540_v3  ;;  %v4542_v10 = vadd.f32 %v4541_v4, %v963_v50  ;;  %v7296_v57 = vld [vmem:[#allocation6 + $0xb8c] ss:$76 sps:$4 sm:$0xff]   ;;  %v7291_v60 = vld [vmem:[#allocation6 + $0x208] ss:$76 sps:$4 sm:$0xff]  }
 0x2d5   :  { %4913 = vmatprep.subr.bf16.mxu0 %v7275_v0  ;;  %4964 = vmatprep.subr.bf16.mxu1 %v7278_v1  ;;  %v4543_v23 = vpop.f32.mrf.mxu0  ;;  %v4594_v24 = vpop.f32.mrf.mxu1  ;;  %v7299_v48 = vld [vmem:[#allocation6 + $0x174] ss:$76 sps:$4 sm:$0xff]   ;;  %v7297_v3 = vld [vmem:[#allocation6 + $0x170] ss:$76 sps:$4 sm:$0xff]  }
 0x2d6   :  { %7491 = vpow2.f32 %v6311_v8  ;;  %v6312_v26 = vmul.f32 -1.442695, %v4591_v9  ;;  %v4593_v27 = vadd.f32 %v4592_v7, %v4542_v10  ;;  %v4544_v28 = vadd.f32 %v4543_v23, %v967_v53  ;;  %v7302_v0 = vld [vmem:[#allocation6 + $0xaf4] ss:$76 sps:$4 sm:$0xff]   ;;  %v7300_v4 = vld [vmem:[#allocation6 + $0xaf0] ss:$76 sps:$4 sm:$0xff]  }
 0x2d7   :  { %v4547_v29 = vpop.f32.mrf.mxu0  ;;  %v4598_v30 = vpop.f32.mrf.mxu1  ;;  %v7305_v8 = vld [vmem:[#allocation6 + $0xdc] ss:$76 sps:$4 sm:$0xff]   ;;  %v7303_v23 = vld [vmem:[#allocation6 + $0xd8] ss:$76 sps:$4 sm:$0xff]  }
 0x2d8   :  { %7493 = vpow2.f32 %v6312_v26  ;;  %v6330_v31 = vmul.f32 -1.442695, %v4593_v27  ;;  %4914 = vmatpush1.bf16.msra.mxu0 %v7273_v11  ;;  %4965 = vmatpush1.bf16.msra.mxu1 %v7276_v21  ;;  %v4595_v32 = vadd.f32 %v4594_v24, %v4544_v28  ;;  %v4548_v33 = vadd.f32 %v4547_v29, %v963_v50  ;;  %v7308_v9 = vld [vmem:[#allocation6 + $0xa5c] ss:$76 sps:$4 sm:$0xff]   ;;  %v7306_v24 = vld [vmem:[#allocation6 + $0xa58] ss:$76 sps:$4 sm:$0xff]  }
 0x2d9   :  { %4915 = vmatprep.subr.bf16.mxu0 %v7281_v25  ;;  %4966 = vmatprep.subr.bf16.mxu1 %v7284_v22  ;;  %v4549_v36 = vpop.f32.mrf.mxu0  ;;  %v4600_v37 = vpop.f32.mrf.mxu1  ;;  %v7311_v22 = vld [vmem:[#allocation6 + $0x44] ss:$76 sps:$4 sm:$0xff]  }
 0x2da   :  { %7495 = vpow2.f32 %v6330_v31  ;;  %v6331_v42 = vmul.f32 -1.442695, %v4595_v32  ;;  %v4599_v43 = vadd.f32 %v4598_v30, %v4548_v33  ;;  %4852 = vmatmul.mubr.bf16.gmra.mxu0 %v7807_v15  ;;  %4903 = vmatmul.mubr.bf16.gmra.mxu1 %v7809_v20  ;;  %v4550_v44 = vadd.f32 %v4549_v36, %v967_v53  ;;  %v7314_v26 = vld [vmem:[#allocation6 + $0x9c4] ss:$76 sps:$4 sm:$0xff]   ;;  %v7309_v30 = vld [vmem:[#allocation6 + $0x40] ss:$76 sps:$4 sm:$0xff]  }
 0x2db   :  { %4943 = vmatprep.mubr.bf16.mxu0 %v7789_v58  ;;  %4994 = vmatprep.mubr.bf16.mxu1 %v7791_v59  ;;  %v4551_v45 = vpop.f32.mrf.mxu0  ;;  %v4602_v49 = vpop.f32.mrf.mxu1  ;;  %v7312_v31 = vld [vmem:[#allocation6 + $0x9c0] ss:$76 sps:$4 sm:$0xff]   ;;  %v7315_v36 = vld [vmem:[#allocation6 + $0x928] ss:$76 sps:$4 sm:$0xff]  }
 0x2dc   :  { %7497 = vpow2.f32 %v6331_v42  ;;  %v6349_v47 = vmul.f32 -1.442695, %v4599_v43  ;;  %4916 = vmatpush1.bf16.msra.mxu0 %v7279_v34  ;;  %4967 = vmatpush1.bf16.msra.mxu1 %v7282_v35  ;;  %v4601_v50 = vadd.f32 %v4600_v37, %v4550_v44  ;;  %v7317_v33 = vld [vmem:[#allocation6 + $0x92c] ss:$76 sps:$4 sm:$0xff]   ;;  %v7318_v37 = vld [vmem:[#allocation6 + $0x12a8] ss:$76 sps:$4 sm:$0xff]  }
 0x2dd   :  { %4917 = vmatprep.subr.bf16.mxu0 %v7287_v38  ;;  %4968 = vmatprep.subr.bf16.mxu1 %v7290_v39  ;;  %v4552_v55 = vpop.f32.mrf.mxu0  ;;  %v4603_v54 = vpop.f32.mrf.mxu1  ;;  %v7320_v34 = vld [vmem:[#allocation6 + $0x12ac] ss:$76 sps:$4 sm:$0xff]   ;;  %v7323_v38 = vld [vmem:[#allocation6 + $0x894] ss:$76 sps:$4 sm:$0xff]   ;;  %v7321_v43 = vld [vmem:[#allocation6 + $0x890] ss:$76 sps:$4 sm:$0xff]  }
 0x2de   :  { %7499 = vpow2.f32 %v6349_v47  ;;  %v6350_v53 = vmul.f32 -1.442695, %v4601_v50  ;;  %v7326_v39 = vld [vmem:[#allocation6 + $0x1214] ss:$76 sps:$4 sm:$0xff]   ;;  %v7324_v44 = vld [vmem:[#allocation6 + $0x1210] ss:$76 sps:$4 sm:$0xff]  }
 0x2df   :  { %v7329_v49 = vld [vmem:[#allocation6 + $0x7fc] ss:$76 sps:$4 sm:$0xff]   ;;  %v7330_v55 = vld [vmem:[#allocation6 + $0x1178] ss:$76 sps:$4 sm:$0xff]  }
 0x2e0   :  { %7501 = vpow2.f32 %v6350_v53  ;;  %4918 = vmatpush1.bf16.msra.mxu0 %v7285_v51  ;;  %4969 = vmatpush1.bf16.msra.mxu1 %v7288_v52  ;;  %v7332_v47 = vld [vmem:[#allocation6 + $0x117c] ss:$76 sps:$4 sm:$0xff]   ;;  %v7327_v52 = vld [vmem:[#allocation6 + $0x7f8] ss:$76 sps:$4 sm:$0xff]  }
 0x2e1   :  { %4919 = vmatprep.subr.bf16.mxu0 %v7293_v56  ;;  %4970 = vmatprep.subr.bf16.mxu1 %v7296_v57  ;;  %v7335_v56 = vld [vmem:[#allocation6 + $0x764] ss:$76 sps:$4 sm:$0xff]  }
 0x2e2   :  { %v7338_v57 = vld [vmem:[#allocation6 + $0x10e4] ss:$76 sps:$4 sm:$0xff]  }
 0x2e3   :  { %v7492_v1 = vpop.eup %7491 }
 0x2e4   :  { %v5288_v2 = vadd.f32 1.0, %v7492_v1  ;;  %4920 = vmatpush1.bf16.msra.mxu0 %v7291_v60  ;;  %4971 = vmatpush1.bf16.msra.mxu1 %v7294_v61  ;;  %v7333_v61 = vld [vmem:[#allocation6 + $0x760] ss:$76 sps:$4 sm:$0xff]  }
 0x2e5   :  { %v7494_v7 = vpop.eup %7493  ;;  %4921 = vmatprep.subr.bf16.mxu0 %v7299_v48  ;;  %4972 = vmatprep.subr.bf16.mxu1 %v7302_v0  ;;  %v7336_v48 = vld [vmem:[#allocation6 + $0x10e0] ss:$76 sps:$4 sm:$0xff]  }
 0x2e6   :  { %v5289_v10 = vadd.f32 1.0, %v7494_v7  ;;  %7503 = vrcp.f32 %v5288_v2  ;;  %v7341_v1 = vld [vmem:[#allocation6 + $0x6cc] ss:$76 sps:$4 sm:$0xff]   ;;  %v7342_v7 = vld [vmem:[#allocation6 + $0x1048] ss:$76 sps:$4 sm:$0xff]  }
 0x2e7   :  { %v7496_v11 = vpop.eup %7495  ;;  %v7344_v2 = vld [vmem:[#allocation6 + $0x104c] ss:$76 sps:$4 sm:$0xff]  }
 0x2e8   :  { %7505 = vrcp.f32 %v5289_v10  ;;  %v5307_v21 = vadd.f32 1.0, %v7496_v11  ;;  %4922 = vmatpush1.bf16.msra.mxu0 %v7297_v3  ;;  %4973 = vmatpush1.bf16.msra.mxu1 %v7300_v4  ;;  %v7339_v4 = vld [vmem:[#allocation6 + $0x6c8] ss:$76 sps:$4 sm:$0xff]   ;;  %v7345_v10 = vld [vmem:[#allocation6 + $0x630] ss:$76 sps:$4 sm:$0xff]  }
 0x2e9   :  { %v7498_v25 = vpop.eup %7497  ;;  %4923 = vmatprep.subr.bf16.mxu0 %v7305_v8  ;;  %4974 = vmatprep.subr.bf16.mxu1 %v7308_v9  ;;  %v7347_v8 = vld [vmem:[#allocation6 + $0x634] ss:$76 sps:$4 sm:$0xff]   ;;  %v7348_v11 = vld [vmem:[#allocation6 + $0xfb0] ss:$76 sps:$4 sm:$0xff]  }
 0x2ea   :  { %v5308_v27 = vadd.f32 1.0, %v7498_v25  ;;  %7507 = vrcp.f32 %v5307_v21  ;;  %v7350_v9 = vld [vmem:[#allocation6 + $0xfb4] ss:$76 sps:$4 sm:$0xff]   ;;  %v7353_v21 = vld [vmem:[#allocation6 + $0x59c] ss:$76 sps:$4 sm:$0xff]  }
 0x2eb   :  { %v7500_v28 = vpop.eup %7499  ;;  %v7354_v25 = vld [vmem:[#allocation6 + $0xf18] ss:$76 sps:$4 sm:$0xff]  }
 0x2ec   :  { %7509 = vrcp.f32 %v5308_v27  ;;  %v5326_v29 = vadd.f32 1.0, %v7500_v28  ;;  %4924 = vmatpush1.bf16.msra.mxu0 %v7303_v23  ;;  %4975 = vmatpush1.bf16.msra.mxu1 %v7306_v24  ;;  %v7356_v23 = vld [vmem:[#allocation6 + $0xf1c] ss:$76 sps:$4 sm:$0xff]   ;;  %v7351_v24 = vld [vmem:[#allocation6 + $0x598] ss:$76 sps:$4 sm:$0xff]  }
 0x2ed   :  { %v7502_v32 = vpop.eup %7501  ;;  %4925 = vmatprep.subr.bf16.mxu0 %v7311_v22  ;;  %4976 = vmatprep.subr.bf16.mxu1 %v7314_v26  ;;  %v7359_v22 = vld [vmem:[#allocation6 + $0x504] ss:$76 sps:$4 sm:$0xff]   ;;  %v7357_v27 = vld [vmem:[#allocation6 + $0x500] ss:$76 sps:$4 sm:$0xff]  }
 0x2ee   :  { %v5327_v35 = vadd.f32 1.0, %v7502_v32  ;;  %7511 = vrcp.f32 %v5326_v29  ;;  %v7362_v26 = vld [vmem:[#allocation6 + $0xe84] ss:$76 sps:$4 sm:$0xff]   ;;  %v7360_v28 = vld [vmem:[#allocation6 + $0xe80] ss:$76 sps:$4 sm:$0xff]   ;;  %v971_v29 = vrot.slane %v7923_v46, %v7783_v19  ;;  %v975_v32 = vrot.slane %v7923_v46, %v7777_v17 }
 0x2f0   :  { %7513 = vrcp.f32 %v5327_v35  ;;  %4926 = vmatpush1.bf16.msra.mxu0 %v7309_v30  ;;  %4977 = vmatpush1.bf16.msra.mxu1 %v7312_v31  ;;  %v7363_v30 = vld [vmem:[#allocation6 + $0x930] ss:$76 sps:$4 sm:$0xff]  }
 0x2f1   :  { %4927 = vmatprep.subr.bf16.mxu0 %v7317_v33  ;;  %4978 = vmatprep.subr.bf16.mxu1 %v7320_v34  ;;  %v7364_v31 = vld [vmem:[#allocation6 + $0x12b0] ss:$76 sps:$4 sm:$0xff]  }
 0x2f3   :  { %v7504_v42 = vpop.eup %7503 }
 0x2f4   :  { %4928 = vmatpush2.bf16.msra.mxu0 %v7315_v36  ;;  %4979 = vmatpush2.bf16.msra.mxu1 %v7318_v37  ;;  %v7365_v36 = vld [vmem:[#allocation6 + $0x470] ss:$76 sps:$4 sm:$0xff]  }
 0x2f5   :  { %v7506_v45 = vpop.eup %7505  ;;  %4929 = vmatprep.subr.bf16.mxu0 %v7323_v38  ;;  %4980 = vmatprep.subr.bf16.mxu1 %v7326_v39  ;;  %v7366_v37 = vld [vmem:[#allocation6 + $0xdf0] ss:$76 sps:$4 sm:$0xff]  }
 0x2f6   :  { %v6394_v50 = vpack.c.bf16 %v7506_v45, %v7504_v42  ;;  %v7367_v42 = vld [vmem:[#allocation6 + $0x898] ss:$76 sps:$4 sm:$0xff]  }
 0x2f7   :  { %v7508_v51 = vpop.eup %7507 }
 0x2f8   :  { %5648 = vst [vmem:[%s8034_s5 + $0x20] sm:$0xff] %v6394_v50  ;;  %4930 = vmatpush2.bf16.msra.mxu0 %v7321_v43  ;;  %4981 = vmatpush2.bf16.msra.mxu1 %v7324_v44  ;;  %v7368_v43 = vld [vmem:[#allocation6 + $0x1218] ss:$76 sps:$4 sm:$0xff]  }
 0x2f9   :  { %v7510_v54 = vpop.eup %7509  ;;  %4931 = vmatprep.subr.bf16.mxu0 %v7329_v49  ;;  %4982 = vmatprep.subr.bf16.mxu1 %v7332_v47 }
 0x2fa   :  { %v6404_v53 = vpack.c.bf16 %v7510_v54, %v7508_v51 }
 0x2fb   :  { %v7512_v60 = vpop.eup %7511 }
 0x2fc   :  { %5658 = vst [vmem:[%s8034_s5 + $0x6c] sm:$0xff] %v6404_v53  ;;  %4932 = vmatpush2.bf16.msra.mxu0 %v7327_v52  ;;  %4983 = vmatpush2.bf16.msra.mxu1 %v7330_v55  ;;  %v7369_v52 = vld [vmem:[#allocation6 + $0x3d8] ss:$76 sps:$4 sm:$0xff]   ;;  %v7372_v53 = vld [vmem:[#allocation6 + $0x1180] ss:$76 sps:$4 sm:$0xff]  }
 0x2fd   :  { %v7514_v0 = vpop.eup %7513  ;;  %4933 = vmatprep.subr.bf16.mxu0 %v7335_v56  ;;  %4984 = vmatprep.subr.bf16.mxu1 %v7338_v57  ;;  %v7370_v55 = vld [vmem:[#allocation6 + $0xd58] ss:$76 sps:$4 sm:$0xff]   ;;  %v7371_v57 = vld [vmem:[#allocation6 + $0x800] ss:$76 sps:$4 sm:$0xff]  }
 0x2fe   :  { %v6414_v3 = vpack.c.bf16 %v7514_v0, %v7512_v60 }
 0x300   :  { %5668 = vst [vmem:[%s8034_s5 + $0xb8] sm:$0xff] %v6414_v3  ;;  %4934 = vmatpush2.bf16.msra.mxu0 %v7333_v61  ;;  %4985 = vmatpush2.bf16.msra.mxu1 %v7336_v48 }
 0x301   :  { %4935 = vmatprep.subr.bf16.mxu0 %v7341_v1  ;;  %4986 = vmatprep.subr.bf16.mxu1 %v7344_v2 }
 0x304   :  { %4936 = vmatpush2.bf16.msra.mxu0 %v7339_v4  ;;  %4987 = vmatpush2.bf16.msra.mxu1 %v7342_v7  ;;  %v7373_v7 = vld [vmem:[#allocation6 + $0x340] ss:$76 sps:$4 sm:$0xff]  }
 0x305   :  { %4937 = vmatprep.subr.bf16.mxu0 %v7347_v8  ;;  %4988 = vmatprep.subr.bf16.mxu1 %v7350_v9  ;;  %v7374_v8 = vld [vmem:[#allocation6 + $0xcc0] ss:$76 sps:$4 sm:$0xff]  }
 0x308   :  { %4938 = vmatpush2.bf16.msra.mxu0 %v7345_v10  ;;  %4989 = vmatpush2.bf16.msra.mxu1 %v7348_v11  ;;  %v7375_v11 = vld [vmem:[#allocation6 + $0x768] ss:$76 sps:$4 sm:$0xff]  }
 0x309   :  { %4939 = vmatprep.subr.bf16.mxu0 %v7353_v21  ;;  %4990 = vmatprep.subr.bf16.mxu1 %v7356_v23  ;;  %v7376_v21 = vld [vmem:[#allocation6 + $0x10e8] ss:$76 sps:$4 sm:$0xff]  }
 0x30c   :  { %4940 = vmatpush2.bf16.msra.mxu0 %v7351_v24  ;;  %4991 = vmatpush2.bf16.msra.mxu1 %v7354_v25 }
 0x30d   :  { %4941 = vmatprep.subr.bf16.mxu0 %v7359_v22  ;;  %4992 = vmatprep.subr.bf16.mxu1 %v7362_v26 }
 0x310   :  { %4942 = vmatpush2.bf16.msra.mxu0 %v7357_v27  ;;  %4993 = vmatpush2.bf16.msra.mxu1 %v7360_v28  ;;  %v4639_v33 = vpop.f32.mrf.mxu0  ;;  %v4690_v34 = vpop.f32.mrf.mxu1 }
 0x311   :  { %v4640_v35 = vadd.f32 %v4639_v33, %v971_v29  ;;  %6420 = vmatprep.subr.bf16.mxu0 %v7363_v30  ;;  %6448 = vmatprep.subr.bf16.mxu1 %v7364_v31  ;;  %v7378_v30 = vld [vmem:[#allocation6 + $0xc28] ss:$76 sps:$4 sm:$0xff]  }
 0x312   :  { %v4641_v38 = vpop.f32.mrf.mxu0  ;;  %v4692_v39 = vpop.f32.mrf.mxu1 }
 0x313   :  { %v4691_v44 = vadd.f32 %v4690_v34, %v4640_v35  ;;  %4944 = vmatmul.mubr.bf16.vlgmr.msra.gmra.mxu0 %v7793_v62  ;;  %4995 = vmatmul.mubr.bf16.vlgmr.msra.gmra.mxu1 %v7795_v63  ;;  %v4642_v45 = vadd.f32 %v4641_v38, %v975_v32  ;;  %v7379_v34 = vld [vmem:[#allocation6 + $0x6d0] ss:$76 sps:$4 sm:$0xff]  }
 0x314   :  { %4953 = vmatprep.mubr.bf16.mxu0 %v7801_v12  ;;  %5004 = vmatprep.mubr.bf16.mxu1 %v7803_v13  ;;  %v4643_v17 = vpop.f32.mrf.mxu0  ;;  %v4694_v49 = vpop.f32.mrf.mxu1  ;;  %v7380_v35 = vld [vmem:[#allocation6 + $0x1050] ss:$76 sps:$4 sm:$0xff]  }
 0x315   :  { %v6313_v47 = vmul.f32 -1.442695, %v4691_v44  ;;  %6421 = vmatpush3.bf16.msra.mxu0 %v7365_v36  ;;  %6449 = vmatpush3.bf16.msra.mxu1 %v7366_v37  ;;  %v4693_v50 = vadd.f32 %v4692_v39, %v4642_v45  ;;  %v4644_v51 = vadd.f32 %v4643_v17, %v971_v29  ;;  %v7383_v36 = vld [vmem:[#allocation6 + $0x638] ss:$76 sps:$4 sm:$0xff]   ;;  %v7387_v45 = vld [vmem:[#allocation6 + $0x5a0] ss:$76 sps:$4 sm:$0xff]  }
 0x316   :  { %6422 = vmatprep.subr.bf16.mxu0 %v7367_v42  ;;  %6450 = vmatprep.subr.bf16.mxu1 %v7368_v43  ;;  %v4645_v54 = vpop.f32.mrf.mxu0  ;;  %v4696_v56 = vpop.f32.mrf.mxu1  ;;  %v7384_v37 = vld [vmem:[#allocation6 + $0xfb8] ss:$76 sps:$4 sm:$0xff]   ;;  %v7388_v17 = vld [vmem:[#allocation6 + $0xf20] ss:$76 sps:$4 sm:$0xff]  }
 0x317   :  { %7515 = vpow2.f32 %v6313_v47  ;;  %v6314_v60 = vmul.f32 -1.442695, %v4693_v50  ;;  %v4695_v61 = vadd.f32 %v4694_v49, %v4644_v51  ;;  %v4646_v48 = vadd.f32 %v4645_v54, %v975_v32  ;;  %v7385_v42 = vld [vmem:[#allocation6 + $0x178] ss:$76 sps:$4 sm:$0xff]   ;;  %v7389_v51 = vld [vmem:[#allocation6 + $0xe0] ss:$76 sps:$4 sm:$0xff]  }
 0x318   :  { %v4649_v0 = vpop.f32.mrf.mxu0  ;;  %v4700_v1 = vpop.f32.mrf.mxu1  ;;  %v7386_v43 = vld [vmem:[#allocation6 + $0xaf8] ss:$76 sps:$4 sm:$0xff]   ;;  %v7391_v54 = vld [vmem:[#allocation6 + $0x508] ss:$76 sps:$4 sm:$0xff]  }
 0x319   :  { %7517 = vpow2.f32 %v6314_v60  ;;  %v6332_v2 = vmul.f32 -1.442695, %v4695_v61  ;;  %6423 = vmatpush3.bf16.msra.mxu0 %v7369_v52  ;;  %6451 = vmatpush3.bf16.msra.mxu1 %v7370_v55  ;;  %v4697_v3 = vadd.f32 %v4696_v56, %v4646_v48  ;;  %v4650_v4 = vadd.f32 %v4649_v0, %v971_v29  ;;  %v7377_v29 = vld [vmem:[#allocation6 + $0x2a8] ss:$76 sps:$4 sm:$0xff]   ;;  %v7390_v52 = vld [vmem:[#allocation6 + $0xa60] ss:$76 sps:$4 sm:$0xff]  }
 0x31a   :  { %6424 = vmatprep.subr.bf16.mxu0 %v7371_v57  ;;  %6452 = vmatprep.subr.bf16.mxu1 %v7372_v53  ;;  %v4651_v9 = vpop.f32.mrf.mxu0  ;;  %v4702_v10 = vpop.f32.mrf.mxu1  ;;  %v7392_v56 = vld [vmem:[#allocation6 + $0xe88] ss:$76 sps:$4 sm:$0xff]  }
 0x31b   :  { %7519 = vpow2.f32 %v6332_v2  ;;  %v6333_v23 = vmul.f32 -1.442695, %v4697_v3  ;;  %v4701_v24 = vadd.f32 %v4700_v1, %v4650_v4  ;;  %4954 = vmatmul.mubr.bf16.gmra.mxu0 %v7807_v15  ;;  %5005 = vmatmul.mubr.bf16.gmra.mxu1 %v7809_v20  ;;  %v4652_v25 = vadd.f32 %v4651_v9, %v975_v32  ;;  %v7393_v61 = vld [vmem:[#allocation6 + $0x48] ss:$76 sps:$4 sm:$0xff]  }
 0x31c   :  { %5045 = vmatprep.mubr.bf16.mxu0 %v7789_v58  ;;  %5093 = vmatprep.mubr.bf16.mxu1 %v7791_v59  ;;  %v4653_v22 = vpop.f32.mrf.mxu0  ;;  %v4704_v26 = vpop.f32.mrf.mxu1  ;;  %v7381_v58 = vld [vmem:[#allocation6 + $0x210] ss:$76 sps:$4 sm:$0xff]   ;;  %v7394_v48 = vld [vmem:[#allocation6 + $0x9c8] ss:$76 sps:$4 sm:$0xff]  }
 0x31d   :  { %7521 = vpow2.f32 %v6333_v23  ;;  %v6351_v27 = vmul.f32 -1.442695, %v4701_v24  ;;  %6425 = vmatpush3.bf16.msra.mxu0 %v7373_v7  ;;  %6453 = vmatpush3.bf16.msra.mxu1 %v7374_v8  ;;  %v4703_v28 = vadd.f32 %v4702_v10, %v4652_v25  ;;  %v7382_v59 = vld [vmem:[#allocation6 + $0xb90] ss:$76 sps:$4 sm:$0xff]  }
 0x31e   :  { %6426 = vmatprep.subr.bf16.mxu0 %v7375_v11  ;;  %6454 = vmatprep.subr.bf16.mxu1 %v7376_v21  ;;  %v4654_v31 = vpop.f32.mrf.mxu0  ;;  %v4705_v33 = vpop.f32.mrf.mxu1 }
 0x31f   :  { %7523 = vpow2.f32 %v6351_v27  ;;  %v6352_v32 = vmul.f32 -1.442695, %v4703_v28 }
 0x321   :  { %7525 = vpow2.f32 %v6352_v32  ;;  %6427 = vmatpush3.bf16.msra.mxu0 %v7377_v29  ;;  %6455 = vmatpush3.bf16.msra.mxu1 %v7378_v30 }
 0x322   :  { %6428 = vmatprep.subr.bf16.mxu0 %v7379_v34  ;;  %6456 = vmatprep.subr.bf16.mxu1 %v7380_v35 }
 0x324   :  { %v7516_v38 = vpop.eup %7515 }
 0x325   :  { %v5290_v39 = vadd.f32 1.0, %v7516_v38  ;;  %6429 = vmatpush3.bf16.msra.mxu0 %v7381_v58  ;;  %6457 = vmatpush3.bf16.msra.mxu1 %v7382_v59 }
 0x326   :  { %v7518_v44 = vpop.eup %7517  ;;  %6430 = vmatprep.subr.bf16.mxu0 %v7383_v36  ;;  %6458 = vmatprep.subr.bf16.mxu1 %v7384_v37 }
 0x327   :  { %v5291_v49 = vadd.f32 1.0, %v7518_v44  ;;  %7527 = vrcp.f32 %v5290_v39 }
 0x328   :  { %v7520_v47 = vpop.eup %7519 }
 0x329   :  { %7529 = vrcp.f32 %v5291_v49  ;;  %v5309_v50 = vadd.f32 1.0, %v7520_v47  ;;  %6431 = vmatpush3.bf16.msra.mxu0 %v7385_v42  ;;  %6459 = vmatpush3.bf16.msra.mxu1 %v7386_v43 }
 0x32a   :  { %v7522_v55 = vpop.eup %7521  ;;  %6432 = vmatprep.subr.bf16.mxu0 %v7387_v45  ;;  %6460 = vmatprep.subr.bf16.mxu1 %v7388_v17 }
 0x32b   :  { %v5310_v57 = vadd.f32 1.0, %v7522_v55  ;;  %7531 = vrcp.f32 %v5309_v50 }
 0x32c   :  { %v7524_v53 = vpop.eup %7523 }
 0x32d   :  { %7533 = vrcp.f32 %v5310_v57  ;;  %v5328_v60 = vadd.f32 1.0, %v7524_v53  ;;  %6433 = vmatpush3.bf16.msra.mxu0 %v7389_v51  ;;  %6461 = vmatpush3.bf16.msra.mxu1 %v7390_v52 }
 0x32e   :  { %v7526_v0 = vpop.eup %7525  ;;  %6434 = vmatprep.subr.bf16.mxu0 %v7391_v54  ;;  %6462 = vmatprep.subr.bf16.mxu1 %v7392_v56 }
 0x32f   :  { %v5329_v1 = vadd.f32 1.0, %v7526_v0  ;;  %7535 = vrcp.f32 %v5328_v60 }
 0x331   :  { %7537 = vrcp.f32 %v5329_v1  ;;  %6435 = vmatpush3.bf16.msra.mxu0 %v7393_v61  ;;  %6463 = vmatpush3.bf16.msra.mxu1 %v7394_v48 }
 0x334   :  { %5046 = vmatmul.mubr.bf16.vlgmr.msra.gmra.mxu0 %v7793_v62  ;;  %5094 = vmatmul.mubr.bf16.vlgmr.msra.gmra.mxu1 %v7795_v63  ;;  %v7528_v2 = vpop.eup %7527 }
 0x335   :  { %5053 = vmatprep.mubr.bf16.mxu0 %v7801_v12  ;;  %5101 = vmatprep.mubr.bf16.mxu1 %v7803_v13  ;;  %v979_v13 = vrot.slane %v7923_v46, %v946_v40 }
 0x336   :  { %v7530_v3 = vpop.eup %7529 }
 0x337   :  { %v6395_v4 = vpack.c.bf16 %v7530_v3, %v7528_v2 }
 0x338   :  { %v7532_v7 = vpop.eup %7531 }
 0x339   :  { %5649 = vst [vmem:[%s8034_s5 + $0x28] sm:$0xff] %v6395_v4 }
 0x33a   :  { %v7534_v8 = vpop.eup %7533 }
 0x33b   :  { %v6405_v9 = vpack.c.bf16 %v7534_v8, %v7532_v7 }
 0x33c   :  { %5054 = vmatmul.mubr.bf16.gmra.mxu0 %v7807_v15  ;;  %5102 = vmatmul.mubr.bf16.gmra.mxu1 %v7809_v20  ;;  %v7536_v62 = vpop.eup %7535  ;;  %v983_v15 = vrot.slane %v7923_v46, %v950_v41 }
 0x33d   :  { %5659 = vst [vmem:[%s8034_s5 + $0x74] sm:$0xff] %v6405_v9 }
 0x33e   :  { %v7538_v63 = vpop.eup %7537 }
 0x33f   :  { %v6415_v12 = vpack.c.bf16 %v7538_v63, %v7536_v62 }
 0x341   :  { %5669 = vst [vmem:[%s8034_s5 + $0xc0] sm:$0xff] %v6415_v12 }
 0x351   :  { %v4741_v20 = vpop.f32.mrf.mxu0  ;;  %v4792_v10 = vpop.f32.mrf.mxu1 }
 0x352   :  { %v4742_v11 = vadd.f32 %v4741_v20, %v979_v13 }
 0x353   :  { %v4743_v21 = vpop.f32.mrf.mxu0  ;;  %v4794_v23 = vpop.f32.mrf.mxu1 }
 0x354   :  { %v4793_v24 = vadd.f32 %v4792_v10, %v4742_v11  ;;  %v4744_v25 = vadd.f32 %v4743_v21, %v983_v15 }
 0x355   :  { %v4745_v22 = vpop.f32.mrf.mxu0  ;;  %v4796_v26 = vpop.f32.mrf.mxu1 }
 0x356   :  { %v6315_v27 = vmul.f32 -1.442695, %v4793_v24  ;;  %v4795_v28 = vadd.f32 %v4794_v23, %v4744_v25  ;;  %v4746_v29 = vadd.f32 %v4745_v22, %v979_v13 }
 0x357   :  { %v4747_v30 = vpop.f32.mrf.mxu0  ;;  %v4798_v31 = vpop.f32.mrf.mxu1 }
 0x358   :  { %7539 = vpow2.f32 %v6315_v27  ;;  %v6316_v40 = vmul.f32 -1.442695, %v4795_v28  ;;  %v4797_v33 = vadd.f32 %v4796_v26, %v4746_v29  ;;  %v4748_v34 = vadd.f32 %v4747_v30, %v983_v15 }
 0x359   :  { %v4751_v35 = vpop.f32.mrf.mxu0  ;;  %v4802_v41 = vpop.f32.mrf.mxu1 }
 0x35a   :  { %7541 = vpow2.f32 %v6316_v40  ;;  %v6334_v32 = vmul.f32 -1.442695, %v4797_v33  ;;  %v4799_v58 = vadd.f32 %v4798_v31, %v4748_v34  ;;  %v4752_v59 = vadd.f32 %v4751_v35, %v979_v13 }
 0x35b   :  { %v4753_v36 = vpop.f32.mrf.mxu0  ;;  %v4804_v37 = vpop.f32.mrf.mxu1  ;;  %v987_v13 = vrot.slane %v7923_v46, %v954_v5 }
 0x35c   :  { %7543 = vpow2.f32 %v6334_v32  ;;  %v6335_v38 = vmul.f32 -1.442695, %v4799_v58  ;;  %v4803_v39 = vadd.f32 %v4802_v41, %v4752_v59  ;;  %v4754_v42 = vadd.f32 %v4753_v36, %v983_v15 }
 0x35d   :  { %v4755_v43 = vpop.f32.mrf.mxu0  ;;  %v4806_v44 = vpop.f32.mrf.mxu1  ;;  %v991_v15 = vrot.slane %v7923_v46, %v958_v6 }
 0x35e   :  { %7545 = vpow2.f32 %v6335_v38  ;;  %v6353_v45 = vmul.f32 -1.442695, %v4803_v39  ;;  %v4805_v17 = vadd.f32 %v4804_v37, %v4754_v42 }
 0x35f   :  { %v4756_v49 = vpop.f32.mrf.mxu0  ;;  %v4807_v47 = vpop.f32.mrf.mxu1 }
 0x360   :  { %7547 = vpow2.f32 %v6353_v45  ;;  %v6354_v50 = vmul.f32 -1.442695, %v4805_v17 }
 0x362   :  { %7549 = vpow2.f32 %v6354_v50 }
 0x365   :  { %v7540_v51 = vpop.eup %7539 }
 0x366   :  { %v5292_v52 = vadd.f32 1.0, %v7540_v51 }
 0x367   :  { %v7542_v55 = vpop.eup %7541 }
 0x368   :  { %v5293_v54 = vadd.f32 1.0, %v7542_v55  ;;  %7551 = vrcp.f32 %v5292_v52 }
 0x369   :  { %v7544_v56 = vpop.eup %7543 }
 0x36a   :  { %7553 = vrcp.f32 %v5293_v54  ;;  %v5311_v57 = vadd.f32 1.0, %v7544_v56 }
 0x36b   :  { %v7546_v53 = vpop.eup %7545 }
 0x36c   :  { %v5312_v60 = vadd.f32 1.0, %v7546_v53  ;;  %7555 = vrcp.f32 %v5311_v57 }
 0x36d   :  { %v7548_v61 = vpop.eup %7547 }
 0x36e   :  { %7557 = vrcp.f32 %v5312_v60  ;;  %v5330_v48 = vadd.f32 1.0, %v7548_v61 }
 0x36f   :  { %v7550_v0 = vpop.eup %7549 }
 0x370   :  { %v5331_v1 = vadd.f32 1.0, %v7550_v0  ;;  %7559 = vrcp.f32 %v5330_v48 }
 0x372   :  { %7561 = vrcp.f32 %v5331_v1 }
 0x375   :  { %v7552_v2 = vpop.eup %7551 }
 0x377   :  { %v7554_v3 = vpop.eup %7553 }
 0x378   :  { %v6396_v4 = vpack.c.bf16 %v7554_v3, %v7552_v2 }
 0x379   :  { %v7556_v7 = vpop.eup %7555 }
 0x37a   :  { %5650 = vst [vmem:[%s8034_s5 + $0x30] sm:$0xff] %v6396_v4 }
 0x37b   :  { %v7558_v8 = vpop.eup %7557 }
 0x37c   :  { %v6406_v9 = vpack.c.bf16 %v7558_v8, %v7556_v7 }
 0x37d   :  { %v7560_v62 = vpop.eup %7559 }
 0x37e   :  { %5660 = vst [vmem:[%s8034_s5 + $0x7c] sm:$0xff] %v6406_v9  ;;  %v8003_v9 = vld [vmem:[#allocation7 + $0x10] sm:$0x7] }
 0x37f   :  { %v7562_v63 = vpop.eup %7561 }
 0x380   :  { %v6416_v12 = vpack.c.bf16 %v7562_v63, %v7560_v62  ;;  %v995_v62 = vrot.slane %v8003_v9, %v7780_v18  ;;  %v999_v63 = vrot.slane %v8003_v9, %v7774_v16 }
 0x382   :  { %5670 = vst [vmem:[%s8034_s5 + $0xc8] sm:$0xff] %v6416_v12 }
 0x392   :  { %v4843_v20 = vpop.f32.mrf.mxu0  ;;  %v4894_v10 = vpop.f32.mrf.mxu1 }
 0x393   :  { %v4844_v11 = vadd.f32 %v4843_v20, %v987_v13 }
 0x394   :  { %v4845_v21 = vpop.f32.mrf.mxu0  ;;  %v4896_v23 = vpop.f32.mrf.mxu1 }
 0x395   :  { %v4895_v24 = vadd.f32 %v4894_v10, %v4844_v11  ;;  %v4846_v25 = vadd.f32 %v4845_v21, %v991_v15 }
 0x396   :  { %v4847_v22 = vpop.f32.mrf.mxu0  ;;  %v4898_v26 = vpop.f32.mrf.mxu1 }
 0x397   :  { %v6317_v27 = vmul.f32 -1.442695, %v4895_v24  ;;  %v4897_v28 = vadd.f32 %v4896_v23, %v4846_v25  ;;  %v4848_v29 = vadd.f32 %v4847_v22, %v987_v13 }
 0x398   :  { %v4849_v30 = vpop.f32.mrf.mxu0  ;;  %v4900_v31 = vpop.f32.mrf.mxu1 }
 0x399   :  { %7563 = vpow2.f32 %v6317_v27  ;;  %v6318_v5 = vmul.f32 -1.442695, %v4897_v28  ;;  %v4899_v40 = vadd.f32 %v4898_v26, %v4848_v29  ;;  %v4850_v14 = vadd.f32 %v4849_v30, %v991_v15 }
 0x39a   :  { %v4853_v33 = vpop.f32.mrf.mxu0  ;;  %v4904_v6 = vpop.f32.mrf.mxu1 }
 0x39b   :  { %7565 = vpow2.f32 %v6318_v5  ;;  %v6336_v46 = vmul.f32 -1.442695, %v4899_v40  ;;  %v4901_v34 = vadd.f32 %v4900_v31, %v4850_v14  ;;  %v4854_v35 = vadd.f32 %v4853_v33, %v987_v13 }
 0x39c   :  { %v4855_v41 = vpop.f32.mrf.mxu0  ;;  %v4906_v32 = vpop.f32.mrf.mxu1 }
 0x39d   :  { %7567 = vpow2.f32 %v6336_v46  ;;  %v6337_v58 = vmul.f32 -1.442695, %v4901_v34  ;;  %v4905_v59 = vadd.f32 %v4904_v6, %v4854_v35  ;;  %v4856_v36 = vadd.f32 %v4855_v41, %v991_v15 }
 0x39e   :  { %v4857_v37 = vpop.f32.mrf.mxu0  ;;  %v4908_v38 = vpop.f32.mrf.mxu1 }
 0x39f   :  { %7569 = vpow2.f32 %v6337_v58  ;;  %v6355_v39 = vmul.f32 -1.442695, %v4905_v59  ;;  %v4907_v42 = vadd.f32 %v4906_v32, %v4856_v36 }
 0x3a0   :  { %v4858_v43 = vpop.f32.mrf.mxu0  ;;  %v4909_v44 = vpop.f32.mrf.mxu1 }
 0x3a1   :  { %7571 = vpow2.f32 %v6355_v39  ;;  %v6356_v45 = vmul.f32 -1.442695, %v4907_v42 }
 0x3a3   :  { %7573 = vpow2.f32 %v6356_v45 }
 0x3a6   :  { %v7564_v17 = vpop.eup %7563 }
 0x3a7   :  { %v5294_v49 = vadd.f32 1.0, %v7564_v17 }
 0x3a8   :  { %v7566_v47 = vpop.eup %7565 }
 0x3a9   :  { %v5295_v50 = vadd.f32 1.0, %v7566_v47  ;;  %7575 = vrcp.f32 %v5294_v49 }
 0x3aa   :  { %v7568_v51 = vpop.eup %7567 }
 0x3ab   :  { %7577 = vrcp.f32 %v5295_v50  ;;  %v5313_v52 = vadd.f32 1.0, %v7568_v51 }
 0x3ac   :  { %v7570_v55 = vpop.eup %7569 }
 0x3ad   :  { %v5314_v54 = vadd.f32 1.0, %v7570_v55  ;;  %7579 = vrcp.f32 %v5313_v52 }
 0x3ae   :  { %v7572_v56 = vpop.eup %7571 }
 0x3af   :  { %7581 = vrcp.f32 %v5314_v54  ;;  %v5332_v57 = vadd.f32 1.0, %v7572_v56 }
 0x3b0   :  { %v7574_v53 = vpop.eup %7573 }
 0x3b1   :  { %v5333_v60 = vadd.f32 1.0, %v7574_v53  ;;  %7583 = vrcp.f32 %v5332_v57  ;;  %v1003_v57 = vrot.slane %v8003_v9, %v7783_v19 }
 0x3b3   :  { %7585 = vrcp.f32 %v5333_v60 }
 0x3b6   :  { %v7576_v61 = vpop.eup %7575 }
 0x3b8   :  { %v7578_v48 = vpop.eup %7577 }
 0x3b9   :  { %v6397_v0 = vpack.c.bf16 %v7578_v48, %v7576_v61 }
 0x3ba   :  { %v7580_v1 = vpop.eup %7579 }
 0x3bb   :  { %5651 = vst [vmem:[%s8034_s5 + $0x38] sm:$0xff] %v6397_v0 }
 0x3bc   :  { %v7582_v2 = vpop.eup %7581 }
 0x3bd   :  { %v6407_v3 = vpack.c.bf16 %v7582_v2, %v7580_v1 }
 0x3be   :  { %v7584_v4 = vpop.eup %7583 }
 0x3bf   :  { %5661 = vst [vmem:[%s8034_s5 + $0x84] sm:$0xff] %v6407_v3 }
 0x3c0   :  { %v7586_v7 = vpop.eup %7585 }
 0x3c1   :  { %v6417_v8 = vpack.c.bf16 %v7586_v7, %v7584_v4 }
 0x3c3   :  { %5671 = vst [vmem:[%s8034_s5 + $0xd0] sm:$0xff] %v6417_v8 }
 0x3d3   :  { %v4945_v12 = vpop.f32.mrf.mxu0  ;;  %v4996_v13 = vpop.f32.mrf.mxu1 }
 0x3d4   :  { %v4946_v15 = vadd.f32 %v4945_v12, %v995_v62 }
 0x3d5   :  { %v4947_v20 = vpop.f32.mrf.mxu0  ;;  %v4998_v10 = vpop.f32.mrf.mxu1 }
 0x3d6   :  { %v4997_v11 = vadd.f32 %v4996_v13, %v4946_v15  ;;  %v4948_v21 = vadd.f32 %v4947_v20, %v999_v63 }
 0x3d7   :  { %v4949_v23 = vpop.f32.mrf.mxu0  ;;  %v5000_v24 = vpop.f32.mrf.mxu1 }
 0x3d8   :  { %v6319_v25 = vmul.f32 -1.442695, %v4997_v11  ;;  %v4999_v22 = vadd.f32 %v4998_v10, %v4948_v21  ;;  %v4950_v26 = vadd.f32 %v4949_v23, %v995_v62 }
 0x3d9   :  { %v4951_v27 = vpop.f32.mrf.mxu0  ;;  %v5002_v28 = vpop.f32.mrf.mxu1 }
 0x3da   :  { %7587 = vpow2.f32 %v6319_v25  ;;  %v6320_v29 = vmul.f32 -1.442695, %v4999_v22  ;;  %v5001_v18 = vadd.f32 %v5000_v24, %v4950_v26  ;;  %v4952_v30 = vadd.f32 %v4951_v27, %v999_v63 }
 0x3db   :  { %v4955_v31 = vpop.f32.mrf.mxu0  ;;  %v5006_v16 = vpop.f32.mrf.mxu1 }
 0x3dc   :  { %7589 = vpow2.f32 %v6320_v29  ;;  %v6338_v5 = vmul.f32 -1.442695, %v5001_v18  ;;  %v5003_v40 = vadd.f32 %v5002_v28, %v4952_v30  ;;  %v4956_v14 = vadd.f32 %v4955_v31, %v995_v62 }
 0x3dd   :  { %v4957_v33 = vpop.f32.mrf.mxu0  ;;  %v5008_v6 = vpop.f32.mrf.mxu1 }
 0x3de   :  { %7591 = vpow2.f32 %v6338_v5  ;;  %v6339_v46 = vmul.f32 -1.442695, %v5003_v40  ;;  %v5007_v34 = vadd.f32 %v5006_v16, %v4956_v14  ;;  %v4958_v35 = vadd.f32 %v4957_v33, %v999_v63 }
 0x3df   :  { %v4959_v41 = vpop.f32.mrf.mxu0  ;;  %v5010_v32 = vpop.f32.mrf.mxu1 }
 0x3e0   :  { %7593 = vpow2.f32 %v6339_v46  ;;  %v6357_v58 = vmul.f32 -1.442695, %v5007_v34  ;;  %v5009_v59 = vadd.f32 %v5008_v6, %v4958_v35 }
 0x3e1   :  { %v4960_v36 = vpop.f32.mrf.mxu0  ;;  %v5011_v37 = vpop.f32.mrf.mxu1 }
 0x3e2   :  { %7595 = vpow2.f32 %v6357_v58  ;;  %v6358_v38 = vmul.f32 -1.442695, %v5009_v59 }
 0x3e4   :  { %7597 = vpow2.f32 %v6358_v38 }
 0x3e7   :  { %v7588_v39 = vpop.eup %7587 }
 0x3e8   :  { %v5296_v42 = vadd.f32 1.0, %v7588_v39 }
 0x3e9   :  { %v7590_v43 = vpop.eup %7589 }
 0x3ea   :  { %v5297_v44 = vadd.f32 1.0, %v7590_v43  ;;  %7599 = vrcp.f32 %v5296_v42 }
 0x3eb   :  { %v7592_v45 = vpop.eup %7591 }
 0x3ec   :  { %7601 = vrcp.f32 %v5297_v44  ;;  %v5315_v17 = vadd.f32 1.0, %v7592_v45 }
 0x3ed   :  { %v7594_v49 = vpop.eup %7593 }
 0x3ee   :  { %v5316_v47 = vadd.f32 1.0, %v7594_v49  ;;  %7603 = vrcp.f32 %v5315_v17 }
 0x3ef   :  { %v7596_v50 = vpop.eup %7595 }
 0x3f0   :  { %7605 = vrcp.f32 %v5316_v47  ;;  %v5334_v51 = vadd.f32 1.0, %v7596_v50 }
 0x3f1   :  { %v7598_v52 = vpop.eup %7597 }
 0x3f2   :  { %v5335_v55 = vadd.f32 1.0, %v7598_v52  ;;  %7607 = vrcp.f32 %v5334_v51 }
 0x3f4   :  { %7609 = vrcp.f32 %v5335_v55  ;;  %v6436_v54 = vpop.f32.mrf.mxu0  ;;  %v6464_v56 = vpop.f32.mrf.mxu1 }
 0x3f6   :  { %v6437_v53 = vpop.f32.mrf.mxu0  ;;  %v6465_v60 = vpop.f32.mrf.mxu1 }
 0x3f7   :  { %v6438_v61 = vadd.f32 %v6437_v53, %v6436_v54  ;;  %v7600_v48 = vpop.eup %7599  ;;  %v6466_v4 = vadd.f32 %v6465_v60, %v6464_v56 }
 0x3f8   :  { %v6439_v0 = vpop.f32.mrf.mxu0  ;;  %v6467_v1 = vpop.f32.mrf.mxu1 }
 0x3f9   :  { %v7602_v2 = vpop.eup %7601  ;;  %v5048_v3 = vadd.f32 %v6438_v61, %v1003_v57 }
 0x3fa   :  { %v6398_v7 = vpack.c.bf16 %v7602_v2, %v7600_v48  ;;  %v6440_v8 = vpop.f32.mrf.mxu0  ;;  %v6468_v62 = vpop.f32.mrf.mxu1 }
 0x3fb   :  { %v5096_v63 = vadd.f32 %v6466_v4, %v5048_v3  ;;  %v6441_v12 = vadd.f32 %v6440_v8, %v6439_v0  ;;  %v7604_v13 = vpop.eup %7603  ;;  %v6469_v11 = vadd.f32 %v6468_v62, %v6467_v1 }
 0x3fc   :  { %5652 = vst [vmem:[%s8034_s5 + $0x40] sm:$0xff] %v6398_v7  ;;  %v6442_v19 = vpop.f32.mrf.mxu0  ;;  %v6470_v9 = vpop.f32.mrf.mxu1 }
 0x3fd   :  { %v7606_v15 = vpop.eup %7605  ;;  %v6321_v20 = vmul.f32 -1.442695, %v5096_v63  ;;  %v5051_v10 = vadd.f32 %v6441_v12, %v1003_v57 }
 0x3fe   :  { %v6408_v21 = vpack.c.bf16 %v7606_v15, %v7604_v13  ;;  %v6443_v23 = vpop.f32.mrf.mxu0  ;;  %v6471_v24 = vpop.f32.mrf.mxu1 }
 0x3ff   :  { %7611 = vpow2.f32 %v6321_v20  ;;  %v5099_v25 = vadd.f32 %v6469_v11, %v5051_v10  ;;  %v6444_v22 = vadd.f32 %v6443_v23, %v6442_v19  ;;  %v7608_v26 = vpop.eup %7607  ;;  %v6472_v31 = vadd.f32 %v6471_v24, %v6470_v9 }
 0x400   :  { %5662 = vst [vmem:[%s8034_s5 + $0x8c] sm:$0xff] %v6408_v21  ;;  %v6445_v27 = vpop.f32.mrf.mxu0  ;;  %v6473_v28 = vpop.f32.mrf.mxu1 }
 0x401   :  { %v7610_v29 = vpop.eup %7609  ;;  %v6340_v18 = vmul.f32 -1.442695, %v5099_v25  ;;  %v5056_v30 = vadd.f32 %v6444_v22, %v1003_v57 }
 0x402   :  { %v6418_v16 = vpack.c.bf16 %v7610_v29, %v7608_v26  ;;  %v6446_v5 = vpop.f32.mrf.mxu0  ;;  %v6474_v40 = vpop.f32.mrf.mxu1 }
 0x403   :  { %7613 = vpow2.f32 %v6340_v18  ;;  %v5104_v14 = vadd.f32 %v6472_v31, %v5056_v30 }
 0x404   :  { %5672 = vst [vmem:[%s8034_s5 + $0xd8] sm:$0xff] %v6418_v16 }
 0x405   :  { %v6359_v33 = vmul.f32 -1.442695, %v5104_v14 }
 0x407   :  { %7615 = vpow2.f32 %v6359_v33 }
 0x40c   :  { %v7612_v6 = vpop.eup %7611 }
 0x40d   :  { %v5298_v46 = vadd.f32 1.0, %v7612_v6 }
 0x40f   :  { %7617 = vrcp.f32 %v5298_v46 }
 0x410   :  { %v7614_v34 = vpop.eup %7613 }
 0x411   :  { %v5317_v35 = vadd.f32 1.0, %v7614_v34 }
 0x413   :  { %7619 = vrcp.f32 %v5317_v35 }
 0x414   :  { %v7616_v41 = vpop.eup %7615 }
 0x415   :  { %v5336_v32 = vadd.f32 1.0, %v7616_v41 }
 0x417   :  { %7621 = vrcp.f32 %v5336_v32 }
 0x41c   :  { %v7618_v58 = vpop.eup %7617 }
 0x41d   :  { %v6399_v59 = vpack.c.bf16 %v7618_v58, %v7618_v58 }
 0x41f   :  { %5653 = vst [vmem:[%s8034_s5 + $0x48] sm:$0xf] %v6399_v59 }
 0x420   :  { %v7620_v36 = vpop.eup %7619 }
 0x421   :  { %v6409_v37 = vpack.c.bf16 %v7620_v36, %v7620_v36 }
 0x423   :  { %5663 = vst [vmem:[%s8034_s5 + $0x94] sm:$0xf] %v6409_v37 }
 0x424   :  { %v7622_v38 = vpop.eup %7621 }
 0x425   :  { %v6419_v39 = vpack.c.bf16 %v7622_v38, %v7622_v38 }
 0x427   :  { %5673 = vst [vmem:[%s8034_s5 + $0xe0] sm:$0xf] %v6419_v39 }
 0x428   :  { %5678 = vsyncpa [#allocation3], 1 }
 0x429   :  { %5679 = vsyncpa [#allocation5], 1 }
 0x42a   :  { %5680 = vsyncpa [#allocation8], 1 }

</bundles_post_ra>
